<compile_context>
chip_gen: v7x
topology: tpu7x:2x2x1
jax: 0.10.0
libtpu: 0.0.40
codegen_flags: <defaults>
</compile_context>

<pallas_src>
import functools

import jax
import jax.numpy as jnp
from jax.experimental import pallas as pl
from jax.experimental.pallas import tpu as pltpu

BN_EPS = 1e-5
LANES = 128
VMEM_LIMIT = 8 * 1024 * 1024  # sized to actual need; well under v7x's 64 MiB


def _round_up(x, m):
    return (x + m - 1) // m * m


# ----------------------------------------------------------------------------
# Pallas kernels
# ----------------------------------------------------------------------------
def conv_bn_relu_pool_kernel(x_ref, w_ref, shift_ref, o_ref):
    """Fused 3x3 conv (pad=1) + folded eval BN + ReLU + 2x2 maxpool.

    x_ref:     (B, 4, L, K)  bf16  tap-stacked patches per pooling phase;
                                   L = (H/2)*(W/2), K = 9*C_in.
    w_ref:     (K, C_op)     bf16  BN-folded conv weights, C_out padded to 128.
    shift_ref: (1, C_op)     f32   BN-folded bias.
    o_ref:     (B, L, C_op)  bf16  pooled activations, row = i*(W/2) + j.
    """
    w = w_ref[...]
    shift = shift_ref[...]
    nb = x_ref.shape[0]
    for b in range(nb):                       # small static unroll over images
        # one MXU matmul per pooling phase; running max = 2x2 maxpool
        acc = jnp.dot(x_ref[b, 0], w, preferred_element_type=jnp.float32)
        for ph in range(1, 4):
            acc = jnp.maximum(
                acc, jnp.dot(x_ref[b, ph], w, preferred_element_type=jnp.float32))
        # BN shift + ReLU once (ReLU/maxpool commute; shift is per-channel)
        o_ref[b] = jnp.maximum(acc + shift, 0.0).astype(o_ref.dtype)


def proto_dist_kernel(q_ref, qn_ref, protoT_ref, pn_ref, o_ref):
    """Pairwise L2 distances, Gram formulation with precomputed norms.

    q_ref:      (TQ, D)       bf16  query tile
    qn_ref:     (TQ, 1)       f32   ||q||^2
    protoT_ref: (D, way_pad)  bf16  prototypes (mean over shots), transposed
    pn_ref:     (1, way_pad)  f32   ||proto||^2
    o_ref:      (TQ, way_pad) f32   o[q, w] = || proto_w - query_q ||_2
    """
    cross = jnp.dot(q_ref[...], protoT_ref[...],
                    preferred_element_type=jnp.float32)        # (TQ, way_pad)
    d2 = qn_ref[...] + pn_ref[...] - 2.0 * cross
    o_ref[...] = jnp.sqrt(jnp.maximum(d2, 0.0))


# ----------------------------------------------------------------------------
# Wrappers
# ----------------------------------------------------------------------------
def _pool_phase_patches(x_nhwc):
    """(N,H,W,C) -> (N, 4, (H/2)*(W/2), 9*C) bf16 tap-stacked patches.

    Phase (py,px), pooled position (i,j), tap (dy,dx) holds
    xpad[2i+py+dy, 2j+px+dx, :] so the fused conv+pool is one matmul per phase.
    """
    n, h, w, c = x_nhwc.shape
    hh, wh = h // 2, w // 2
    xp = jnp.pad(x_nhwc, ((0, 0), (1, 1), (1, 1), (0, 0)))
    phases = []
    for py in range(2):
        for px in range(2):
            taps = []
            for dy in range(3):
                for dx in range(3):
                    y0, x0 = py + dy, px + dx
                    taps.append(xp[:, y0:y0 + 2 * hh:2, x0:x0 + 2 * wh:2, :])
            phases.append(jnp.concatenate(taps, axis=-1).reshape(n, hh * wh, 9 * c))
    return jnp.stack(phases, axis=1).astype(jnp.bfloat16)


def _conv_bn_relu_pool(x_nhwc, w, b, gamma, beta, mean, var):
    """3x3 conv (pad=1) + BatchNorm (eval) + ReLU + 2x2 maxpool, one Pallas call."""
    n, h, wd, c_in = x_nhwc.shape
    c_out = w.shape[0]
    hh, wh = h // 2, wd // 2
    L = hh * wh
    K = 9 * c_in
    c_op = _round_up(c_out, LANES)     # lane-dense output channels

    # Fold eval-mode BN (and conv bias) into weights / shift at trace time.
    scale = gamma / jnp.sqrt(var + BN_EPS)
    shift = beta + (b - mean) * scale
    # torch (C_out, C_in, 3, 3) -> (3, 3, C_in, C_out) -> (9*C_in, C_out), scale folded
    w_f = jnp.transpose(w, (2, 3, 1, 0)).reshape(K, c_out) * scale[None, :]
    w_f = jnp.pad(w_f, ((0, 0), (0, c_op - c_out))).astype(jnp.bfloat16)
    shift_p = jnp.pad(shift, (0, c_op - c_out)).reshape(1, c_op).astype(jnp.float32)

    patches = _pool_phase_patches(x_nhwc)                    # (n, 4, L, K) bf16

    # Batch images per grid step; keep >= 2 grid steps so v7x megacore shards.
    nb = min(8, -(-n // 2)) if n >= 2 else 1
    steps = -(-n // nb)
    n_pad = nb * steps
    if n_pad != n:
        patches = jnp.pad(patches, ((0, n_pad - n), (0, 0), (0, 0), (0, 0)))

    out = pl.pallas_call(
        conv_bn_relu_pool_kernel,
        out_shape=jax.ShapeDtypeStruct((n_pad, L, c_op), jnp.bfloat16),
        grid=(steps,),
        in_specs=[
            pl.BlockSpec((nb, 4, L, K), lambda i: (i, 0, 0, 0)),
            pl.BlockSpec((K, c_op), lambda i: (0, 0)),
            pl.BlockSpec((1, c_op), lambda i: (0, 0)),
        ],
        out_specs=pl.BlockSpec((nb, L, c_op), lambda i: (i, 0, 0)),
        compiler_params=pltpu.CompilerParams(
            dimension_semantics=("parallel",),
            vmem_limit_bytes=VMEM_LIMIT,
        ),
    )(patches, w_f, shift_p)

    return out[:n, :, :c_out].reshape(n, hh, wh, c_out)      # bf16


def _proto_distances(sup_emb, qry_emb):
    """distances[q, w] = || mean_shot(support)_w - query_q ||_2 via Pallas."""
    way, shot, d = sup_emb.shape
    nq = qry_emb.shape[0]
    way_pad = _round_up(way, LANES)

    # Prototype mean + squared norms precomputed once (f32) in the wrapper.
    proto = jnp.mean(sup_emb.astype(jnp.float32), axis=1)            # (way, D)
    pn = jnp.sum(proto * proto, axis=-1)                             # (way,)
    pn = jnp.pad(pn, (0, way_pad - way)).reshape(1, way_pad).astype(jnp.float32)
    protoT = jnp.transpose(jnp.pad(proto, ((0, way_pad - way), (0, 0))))
    protoT = protoT.astype(jnp.bfloat16)                             # (D, way_pad)

    q32 = qry_emb.astype(jnp.float32)
    qn = jnp.sum(q32 * q32, axis=-1, keepdims=True)                  # (nq, 1) f32

    tq = min(256, _round_up(nq, 8))
    nq_pad = _round_up(nq, tq)
    q = jnp.pad(qry_emb.astype(jnp.bfloat16), ((0, nq_pad - nq), (0, 0)))
    qn = jnp.pad(qn, ((0, nq_pad - nq), (0, 0)))

    dist = pl.pallas_call(
        proto_dist_kernel,
        out_shape=jax.ShapeDtypeStruct((nq_pad, way_pad), jnp.float32),
        grid=(nq_pad // tq,),
        in_specs=[
            pl.BlockSpec((tq, d), lambda i: (i, 0)),
            pl.BlockSpec((tq, 1), lambda i: (i, 0)),
            pl.BlockSpec((d, way_pad), lambda i: (0, 0)),
            pl.BlockSpec((1, way_pad), lambda i: (0, 0)),
        ],
        out_specs=pl.BlockSpec((tq, way_pad), lambda i: (i, 0)),
        compiler_params=pltpu.CompilerParams(
            dimension_semantics=("parallel",),
            vmem_limit_bytes=VMEM_LIMIT,
        ),
    )(q, qn, protoT, pn)
    return dist[:nq, :way]


# ----------------------------------------------------------------------------
# Parameters (deterministic, synthetic)
# ----------------------------------------------------------------------------
def init_params(key, channel_sizes=(8, 16), in_channels=3):
    params = {"embedding_extractor.channel_size": list(channel_sizes)}
    c_prev = in_channels
    for i, c_out in enumerate(channel_sizes, start=1):
        key, kw, kb, kg, kbe, km, kv = jax.random.split(key, 7)
        params[f"w{i}"] = 0.1 * jax.random.normal(
            kw, (c_out, c_prev, 3, 3), jnp.float32)
        params[f"b{i}"] = 0.05 * jax.random.normal(kb, (c_out,), jnp.float32)
        params[f"gamma{i}"] = 1.0 + 0.1 * jax.random.normal(kg, (c_out,), jnp.float32)
        params[f"beta{i}"] = 0.05 * jax.random.normal(kbe, (c_out,), jnp.float32)
        params[f"mean{i}"] = 0.05 * jax.random.normal(km, (c_out,), jnp.float32)
        params[f"var{i}"] = 1.0 + jnp.abs(
            0.1 * jax.random.normal(kv, (c_out,), jnp.float32))
        c_prev = c_out
    return params


# ----------------------------------------------------------------------------
# Forward pass (mirrors PrototypicalNet.forward)
# ----------------------------------------------------------------------------
def prototypical_net_forward(params, support_images, query_images):
    """
    support_images: (way, shot, C, H, W)  NCHW per image (PyTorch layout)
    query_images:   (A, B, C, H, W)       -> Q = A*B queries
    returns distances: (Q, way) float32,  distances[q, w] = ||proto_w - query_q||_2
    """
    way, shot = support_images.shape[0], support_images.shape[1]
    sup = support_images.reshape((-1,) + support_images.shape[2:])   # (way*shot, C,H,W)
    qry = query_images.reshape((-1,) + query_images.shape[2:])       # (Q, C,H,W)
    n_sup = sup.shape[0]

    x = jnp.concatenate([sup, qry], axis=0)           # (N, C, H, W)
    x = jnp.transpose(x, (0, 2, 3, 1))                # NCHW -> NHWC (channels on lanes)

    # reduced VGG-style embedding extractor (conv+BN+ReLU+pool fused per layer)
    x = _conv_bn_relu_pool(x, params["w1"], params["b1"], params["gamma1"],
                           params["beta1"], params["mean1"], params["var1"])   # 28 -> 14
    x = _conv_bn_relu_pool(x, params["w2"], params["b2"], params["gamma2"],
                           params["beta2"], params["mean2"], params["var2"])   # 14 -> 7
    # vgg16.avgpool = AdaptiveAvgPool2d((7,7)): identity on a 7x7 feature map.

    # NHWC flatten: L2 distances are invariant to a consistent feature permutation,
    # so the torch NCHW flatten order is not reproduced (saves a full re-layout).
    emb = x.reshape(x.shape[0], -1)                                   # (N, D) bf16

    sup_emb = emb[:n_sup].reshape(way, shot, -1)      # (way, shot, D)
    qry_emb = emb[n_sup:]                             # (Q, D)
    return _proto_distances(sup_emb, qry_emb)         # (Q, way)


# ----------------------------------------------------------------------------
# Demo
# ----------------------------------------------------------------------------
if __name__ == "__main__":
    key = jax.random.PRNGKey(0)
    key, k_params, k_sup, k_qry = jax.random.split(key, 4)

    way, shot, n_query_per_way = 2, 2, 2
    C, H, W = 3, 28, 28

    params = init_params(k_params, channel_sizes=(8, 16), in_channels=C)

    support_images = jax.random.normal(k_sup, (way, shot, C, H, W), jnp.float32)
    query_images = jax.random.normal(k_qry, (way, n_query_per_way, C, H, W), jnp.float32)

    fwd = jax.jit(functools.partial(prototypical_net_forward, params))
    distances = fwd(support_images, query_images)
    jax.block_until_ready(distances)

    assert distances.shape == (way * n_query_per_way, way)
    assert distances.dtype == jnp.float32
    assert bool(jnp.all(jnp.isfinite(distances)))
    print("KERNEL_OK")
</pallas_src>

<mosaic_0001>
module attributes {stable_mosaic.version = 11 : i64} {
  func.func @conv_bn_relu_pool_kernel(%arg0: i32, %arg1: memref<4x4x196x27xbf16, #tpu.memory_space<vmem>>, %arg2: memref<27x128xbf16, #tpu.memory_space<vmem>>, %arg3: memref<1x128xf32, #tpu.memory_space<vmem>>, %arg4: memref<4x196x128xbf16, #tpu.memory_space<vmem>>) attributes {dimension_semantics = [#tpu.dimension_semantics<parallel>], iteration_bounds = array<i64: 2>, scalar_prefetch = 0 : i64, scratch_operands = 0 : i64, tpu.core_type = #tpu.core_type<tc>, window_params = [{transform_indices = @transform_0, window_bounds = array<i64: 4, 4, 196, 27>}, {pipeline_mode = #tpu.pipeline_mode<synchronous>, transform_indices = @transform_1, window_bounds = array<i64: 27, 128>}, {pipeline_mode = #tpu.pipeline_mode<synchronous>, transform_indices = @transform_2, window_bounds = array<i64: 1, 128>}, {transform_indices = @transform_3, window_bounds = array<i64: 4, 196, 128>}]} {
    %c0 = arith.constant 0 : index
    %c0_0 = arith.constant 0 : index
    %0 = vector.load %arg2[%c0, %c0_0] : memref<27x128xbf16, #tpu.memory_space<vmem>>, vector<27x128xbf16>
    %c0_1 = arith.constant 0 : index
    %c0_2 = arith.constant 0 : index
    %1 = vector.load %arg3[%c0_1, %c0_2] : memref<1x128xf32, #tpu.memory_space<vmem>>, vector<1x128xf32>
    %c0_3 = arith.constant 0 : index
    %c0_4 = arith.constant 0 : index
    %c0_5 = arith.constant 0 : index
    %c0_6 = arith.constant 0 : index
    %2 = vector.load %arg1[%c0_3, %c0_4, %c0_5, %c0_6] : memref<4x4x196x27xbf16, #tpu.memory_space<vmem>>, vector<1x1x196x27xbf16>
    %3 = vector.shape_cast %2 : vector<1x1x196x27xbf16> to vector<196x27xbf16>
    %cst = arith.constant dense<0.000000e+00> : vector<196x128xf32>
    %4 = tpu.matmul %3, %0, %cst {dimension_numbers = #tpu.dot_dimension_numbers<[1], [0], [0], [1], [0, 0, 1, 1], [], []>} : vector<196x27xbf16>, vector<27x128xbf16>, vector<196x128xf32> -> vector<196x128xf32>
    %c0_7 = arith.constant 0 : index
    %c1 = arith.constant 1 : index
    %c0_8 = arith.constant 0 : index
    %c0_9 = arith.constant 0 : index
    %5 = vector.load %arg1[%c0_7, %c1, %c0_8, %c0_9] : memref<4x4x196x27xbf16, #tpu.memory_space<vmem>>, vector<1x1x196x27xbf16>
    %6 = vector.shape_cast %5 : vector<1x1x196x27xbf16> to vector<196x27xbf16>
    %cst_10 = arith.constant dense<0.000000e+00> : vector<196x128xf32>
    %7 = tpu.matmul %6, %0, %cst_10 {dimension_numbers = #tpu.dot_dimension_numbers<[1], [0], [0], [1], [0, 0, 1, 1], [], []>} : vector<196x27xbf16>, vector<27x128xbf16>, vector<196x128xf32> -> vector<196x128xf32>
    %8 = arith.maximumf %4, %7 : vector<196x128xf32>
    %c0_11 = arith.constant 0 : index
    %c2 = arith.constant 2 : index
    %c0_12 = arith.constant 0 : index
    %c0_13 = arith.constant 0 : index
    %9 = vector.load %arg1[%c0_11, %c2, %c0_12, %c0_13] : memref<4x4x196x27xbf16, #tpu.memory_space<vmem>>, vector<1x1x196x27xbf16>
    %10 = vector.shape_cast %9 : vector<1x1x196x27xbf16> to vector<196x27xbf16>
    %cst_14 = arith.constant dense<0.000000e+00> : vector<196x128xf32>
    %11 = tpu.matmul %10, %0, %cst_14 {dimension_numbers = #tpu.dot_dimension_numbers<[1], [0], [0], [1], [0, 0, 1, 1], [], []>} : vector<196x27xbf16>, vector<27x128xbf16>, vector<196x128xf32> -> vector<196x128xf32>
    %12 = arith.maximumf %8, %11 : vector<196x128xf32>
    %c0_15 = arith.constant 0 : index
    %c3 = arith.constant 3 : index
    %c0_16 = arith.constant 0 : index
    %c0_17 = arith.constant 0 : index
    %13 = vector.load %arg1[%c0_15, %c3, %c0_16, %c0_17] : memref<4x4x196x27xbf16, #tpu.memory_space<vmem>>, vector<1x1x196x27xbf16>
    %14 = vector.shape_cast %13 : vector<1x1x196x27xbf16> to vector<196x27xbf16>
    %cst_18 = arith.constant dense<0.000000e+00> : vector<196x128xf32>
    %15 = tpu.matmul %14, %0, %cst_18 {dimension_numbers = #tpu.dot_dimension_numbers<[1], [0], [0], [1], [0, 0, 1, 1], [], []>} : vector<196x27xbf16>, vector<27x128xbf16>, vector<196x128xf32> -> vector<196x128xf32>
    %16 = arith.maximumf %12, %15 : vector<196x128xf32>
    %17 = vector.broadcast %1 : vector<1x128xf32> to vector<196x128xf32>
    %18 = arith.addf %16, %17 : vector<196x128xf32>
    %cst_19 = arith.constant 0.000000e+00 : f32
    %19 = vector.broadcast %cst_19 : f32 to vector<196x128xf32>
    %20 = arith.maximumf %18, %19 : vector<196x128xf32>
    %21 = arith.truncf %20 : vector<196x128xf32> to vector<196x128xbf16>
    %c0_20 = arith.constant 0 : index
    %c0_21 = arith.constant 0 : index
    %c0_22 = arith.constant 0 : index
    %22 = vector.load %arg4[%c0_20, %c0_21, %c0_22] : memref<4x196x128xbf16, #tpu.memory_space<vmem>>, vector<1x196x128xbf16>
    %23 = vector.shape_cast %22 : vector<1x196x128xbf16> to vector<196x128xbf16>
    %24 = vector.shape_cast %21 : vector<196x128xbf16> to vector<1x196x128xbf16>
    tpu.vector_store %arg4[%c0_20, %c0_21, %c0_22], %24 {strides = array<i32>} : memref<4x196x128xbf16, #tpu.memory_space<vmem>>, vector<1x196x128xbf16>,
    %c1_23 = arith.constant 1 : index
    %c0_24 = arith.constant 0 : index
    %c0_25 = arith.constant 0 : index
    %c0_26 = arith.constant 0 : index
    %25 = vector.load %arg1[%c1_23, %c0_24, %c0_25, %c0_26] : memref<4x4x196x27xbf16, #tpu.memory_space<vmem>>, vector<1x1x196x27xbf16>
    %26 = vector.shape_cast %25 : vector<1x1x196x27xbf16> to vector<196x27xbf16>
    %cst_27 = arith.constant dense<0.000000e+00> : vector<196x128xf32>
    %27 = tpu.matmul %26, %0, %cst_27 {dimension_numbers = #tpu.dot_dimension_numbers<[1], [0], [0], [1], [0, 0, 1, 1], [], []>} : vector<196x27xbf16>, vector<27x128xbf16>, vector<196x128xf32> -> vector<196x128xf32>
    %c1_28 = arith.constant 1 : index
    %c1_29 = arith.constant 1 : index
    %c0_30 = arith.constant 0 : index
    %c0_31 = arith.constant 0 : index
    %28 = vector.load %arg1[%c1_28, %c1_29, %c0_30, %c0_31] : memref<4x4x196x27xbf16, #tpu.memory_space<vmem>>, vector<1x1x196x27xbf16>
    %29 = vector.shape_cast %28 : vector<1x1x196x27xbf16> to vector<196x27xbf16>
    %cst_32 = arith.constant dense<0.000000e+00> : vector<196x128xf32>
    %30 = tpu.matmul %29, %0, %cst_32 {dimension_numbers = #tpu.dot_dimension_numbers<[1], [0], [0], [1], [0, 0, 1, 1], [], []>} : vector<196x27xbf16>, vector<27x128xbf16>, vector<196x128xf32> -> vector<196x128xf32>
    %31 = arith.maximumf %27, %30 : vector<196x128xf32>
    %c1_33 = arith.constant 1 : index
    %c2_34 = arith.constant 2 : index
    %c0_35 = arith.constant 0 : index
    %c0_36 = arith.constant 0 : index
    %32 = vector.load %arg1[%c1_33, %c2_34, %c0_35, %c0_36] : memref<4x4x196x27xbf16, #tpu.memory_space<vmem>>, vector<1x1x196x27xbf16>
    %33 = vector.shape_cast %32 : vector<1x1x196x27xbf16> to vector<196x27xbf16>
    %cst_37 = arith.constant dense<0.000000e+00> : vector<196x128xf32>
    %34 = tpu.matmul %33, %0, %cst_37 {dimension_numbers = #tpu.dot_dimension_numbers<[1], [0], [0], [1], [0, 0, 1, 1], [], []>} : vector<196x27xbf16>, vector<27x128xbf16>, vector<196x128xf32> -> vector<196x128xf32>
    %35 = arith.maximumf %31, %34 : vector<196x128xf32>
    %c1_38 = arith.constant 1 : index
    %c3_39 = arith.constant 3 : index
    %c0_40 = arith.constant 0 : index
    %c0_41 = arith.constant 0 : index
    %36 = vector.load %arg1[%c1_38, %c3_39, %c0_40, %c0_41] : memref<4x4x196x27xbf16, #tpu.memory_space<vmem>>, vector<1x1x196x27xbf16>
    %37 = vector.shape_cast %36 : vector<1x1x196x27xbf16> to vector<196x27xbf16>
    %cst_42 = arith.constant dense<0.000000e+00> : vector<196x128xf32>
    %38 = tpu.matmul %37, %0, %cst_42 {dimension_numbers = #tpu.dot_dimension_numbers<[1], [0], [0], [1], [0, 0, 1, 1], [], []>} : vector<196x27xbf16>, vector<27x128xbf16>, vector<196x128xf32> -> vector<196x128xf32>
    %39 = arith.maximumf %35, %38 : vector<196x128xf32>
    %40 = vector.broadcast %1 : vector<1x128xf32> to vector<196x128xf32>
    %41 = arith.addf %39, %40 : vector<196x128xf32>
    %cst_43 = arith.constant 0.000000e+00 : f32
    %42 = vector.broadcast %cst_43 : f32 to vector<196x128xf32>
    %43 = arith.maximumf %41, %42 : vector<196x128xf32>
    %44 = arith.truncf %43 : vector<196x128xf32> to vector<196x128xbf16>
    %c1_44 = arith.constant 1 : index
    %c0_45 = arith.constant 0 : index
    %c0_46 = arith.constant 0 : index
    %45 = vector.load %arg4[%c1_44, %c0_45, %c0_46] : memref<4x196x128xbf16, #tpu.memory_space<vmem>>, vector<1x196x128xbf16>
    %46 = vector.shape_cast %45 : vector<1x196x128xbf16> to vector<196x128xbf16>
    %47 = vector.shape_cast %44 : vector<196x128xbf16> to vector<1x196x128xbf16>
    tpu.vector_store %arg4[%c1_44, %c0_45, %c0_46], %47 {strides = array<i32>} : memref<4x196x128xbf16, #tpu.memory_space<vmem>>, vector<1x196x128xbf16>,
    %c2_47 = arith.constant 2 : index
    %c0_48 = arith.constant 0 : index
    %c0_49 = arith.constant 0 : index
    %c0_50 = arith.constant 0 : index
    %48 = vector.load %arg1[%c2_47, %c0_48, %c0_49, %c0_50] : memref<4x4x196x27xbf16, #tpu.memory_space<vmem>>, vector<1x1x196x27xbf16>
    %49 = vector.shape_cast %48 : vector<1x1x196x27xbf16> to vector<196x27xbf16>
    %cst_51 = arith.constant dense<0.000000e+00> : vector<196x128xf32>
    %50 = tpu.matmul %49, %0, %cst_51 {dimension_numbers = #tpu.dot_dimension_numbers<[1], [0], [0], [1], [0, 0, 1, 1], [], []>} : vector<196x27xbf16>, vector<27x128xbf16>, vector<196x128xf32> -> vector<196x128xf32>
    %c2_52 = arith.constant 2 : index
    %c1_53 = arith.constant 1 : index
    %c0_54 = arith.constant 0 : index
    %c0_55 = arith.constant 0 : index
    %51 = vector.load %arg1[%c2_52, %c1_53, %c0_54, %c0_55] : memref<4x4x196x27xbf16, #tpu.memory_space<vmem>>, vector<1x1x196x27xbf16>
    %52 = vector.shape_cast %51 : vector<1x1x196x27xbf16> to vector<196x27xbf16>
    %cst_56 = arith.constant dense<0.000000e+00> : vector<196x128xf32>
    %53 = tpu.matmul %52, %0, %cst_56 {dimension_numbers = #tpu.dot_dimension_numbers<[1], [0], [0], [1], [0, 0, 1, 1], [], []>} : vector<196x27xbf16>, vector<27x128xbf16>, vector<196x128xf32> -> vector<196x128xf32>
    %54 = arith.maximumf %50, %53 : vector<196x128xf32>
    %c2_57 = arith.constant 2 : index
    %c2_58 = arith.constant 2 : index
    %c0_59 = arith.constant 0 : index
    %c0_60 = arith.constant 0 : index
    %55 = vector.load %arg1[%c2_57, %c2_58, %c0_59, %c0_60] : memref<4x4x196x27xbf16, #tpu.memory_space<vmem>>, vector<1x1x196x27xbf16>
    %56 = vector.shape_cast %55 : vector<1x1x196x27xbf16> to vector<196x27xbf16>
    %cst_61 = arith.constant dense<0.000000e+00> : vector<196x128xf32>
    %57 = tpu.matmul %56, %0, %cst_61 {dimension_numbers = #tpu.dot_dimension_numbers<[1], [0], [0], [1], [0, 0, 1, 1], [], []>} : vector<196x27xbf16>, vector<27x128xbf16>, vector<196x128xf32> -> vector<196x128xf32>
    %58 = arith.maximumf %54, %57 : vector<196x128xf32>
    %c2_62 = arith.constant 2 : index
    %c3_63 = arith.constant 3 : index
    %c0_64 = arith.constant 0 : index
    %c0_65 = arith.constant 0 : index
    %59 = vector.load %arg1[%c2_62, %c3_63, %c0_64, %c0_65] : memref<4x4x196x27xbf16, #tpu.memory_space<vmem>>, vector<1x1x196x27xbf16>
    %60 = vector.shape_cast %59 : vector<1x1x196x27xbf16> to vector<196x27xbf16>
    %cst_66 = arith.constant dense<0.000000e+00> : vector<196x128xf32>
    %61 = tpu.matmul %60, %0, %cst_66 {dimension_numbers = #tpu.dot_dimension_numbers<[1], [0], [0], [1], [0, 0, 1, 1], [], []>} : vector<196x27xbf16>, vector<27x128xbf16>, vector<196x128xf32> -> vector<196x128xf32>
    %62 = arith.maximumf %58, %61 : vector<196x128xf32>
    %63 = vector.broadcast %1 : vector<1x128xf32> to vector<196x128xf32>
    %64 = arith.addf %62, %63 : vector<196x128xf32>
    %cst_67 = arith.constant 0.000000e+00 : f32
    %65 = vector.broadcast %cst_67 : f32 to vector<196x128xf32>
    %66 = arith.maximumf %64, %65 : vector<196x128xf32>
    %67 = arith.truncf %66 : vector<196x128xf32> to vector<196x128xbf16>
    %c2_68 = arith.constant 2 : index
    %c0_69 = arith.constant 0 : index
    %c0_70 = arith.constant 0 : index
    %68 = vector.load %arg4[%c2_68, %c0_69, %c0_70] : memref<4x196x128xbf16, #tpu.memory_space<vmem>>, vector<1x196x128xbf16>
    %69 = vector.shape_cast %68 : vector<1x196x128xbf16> to vector<196x128xbf16>
    %70 = vector.shape_cast %67 : vector<196x128xbf16> to vector<1x196x128xbf16>
    tpu.vector_store %arg4[%c2_68, %c0_69, %c0_70], %70 {strides = array<i32>} : memref<4x196x128xbf16, #tpu.memory_space<vmem>>, vector<1x196x128xbf16>,
    %c3_71 = arith.constant 3 : index
    %c0_72 = arith.constant 0 : index
    %c0_73 = arith.constant 0 : index
    %c0_74 = arith.constant 0 : index
    %71 = vector.load %arg1[%c3_71, %c0_72, %c0_73, %c0_74] : memref<4x4x196x27xbf16, #tpu.memory_space<vmem>>, vector<1x1x196x27xbf16>
    %72 = vector.shape_cast %71 : vector<1x1x196x27xbf16> to vector<196x27xbf16>
    %cst_75 = arith.constant dense<0.000000e+00> : vector<196x128xf32>
    %73 = tpu.matmul %72, %0, %cst_75 {dimension_numbers = #tpu.dot_dimension_numbers<[1], [0], [0], [1], [0, 0, 1, 1], [], []>} : vector<196x27xbf16>, vector<27x128xbf16>, vector<196x128xf32> -> vector<196x128xf32>
    %c3_76 = arith.constant 3 : index
    %c1_77 = arith.constant 1 : index
    %c0_78 = arith.constant 0 : index
    %c0_79 = arith.constant 0 : index
    %74 = vector.load %arg1[%c3_76, %c1_77, %c0_78, %c0_79] : memref<4x4x196x27xbf16, #tpu.memory_space<vmem>>, vector<1x1x196x27xbf16>
    %75 = vector.shape_cast %74 : vector<1x1x196x27xbf16> to vector<196x27xbf16>
    %cst_80 = arith.constant dense<0.000000e+00> : vector<196x128xf32>
    %76 = tpu.matmul %75, %0, %cst_80 {dimension_numbers = #tpu.dot_dimension_numbers<[1], [0], [0], [1], [0, 0, 1, 1], [], []>} : vector<196x27xbf16>, vector<27x128xbf16>, vector<196x128xf32> -> vector<196x128xf32>
    %77 = arith.maximumf %73, %76 : vector<196x128xf32>
    %c3_81 = arith.constant 3 : index
    %c2_82 = arith.constant 2 : index
    %c0_83 = arith.constant 0 : index
    %c0_84 = arith.constant 0 : index
    %78 = vector.load %arg1[%c3_81, %c2_82, %c0_83, %c0_84] : memref<4x4x196x27xbf16, #tpu.memory_space<vmem>>, vector<1x1x196x27xbf16>
    %79 = vector.shape_cast %78 : vector<1x1x196x27xbf16> to vector<196x27xbf16>
    %cst_85 = arith.constant dense<0.000000e+00> : vector<196x128xf32>
    %80 = tpu.matmul %79, %0, %cst_85 {dimension_numbers = #tpu.dot_dimension_numbers<[1], [0], [0], [1], [0, 0, 1, 1], [], []>} : vector<196x27xbf16>, vector<27x128xbf16>, vector<196x128xf32> -> vector<196x128xf32>
    %81 = arith.maximumf %77, %80 : vector<196x128xf32>
    %c3_86 = arith.constant 3 : index
    %c3_87 = arith.constant 3 : index
    %c0_88 = arith.constant 0 : index
    %c0_89 = arith.constant 0 : index
    %82 = vector.load %arg1[%c3_86, %c3_87, %c0_88, %c0_89] : memref<4x4x196x27xbf16, #tpu.memory_space<vmem>>, vector<1x1x196x27xbf16>
    %83 = vector.shape_cast %82 : vector<1x1x196x27xbf16> to vector<196x27xbf16>
    %cst_90 = arith.constant dense<0.000000e+00> : vector<196x128xf32>
    %84 = tpu.matmul %83, %0, %cst_90 {dimension_numbers = #tpu.dot_dimension_numbers<[1], [0], [0], [1], [0, 0, 1, 1], [], []>} : vector<196x27xbf16>, vector<27x128xbf16>, vector<196x128xf32> -> vector<196x128xf32>
    %85 = arith.maximumf %81, %84 : vector<196x128xf32>
    %86 = vector.broadcast %1 : vector<1x128xf32> to vector<196x128xf32>
    %87 = arith.addf %85, %86 : vector<196x128xf32>
    %cst_91 = arith.constant 0.000000e+00 : f32
    %88 = vector.broadcast %cst_91 : f32 to vector<196x128xf32>
    %89 = arith.maximumf %87, %88 : vector<196x128xf32>
    %90 = arith.truncf %89 : vector<196x128xf32> to vector<196x128xbf16>
    %c3_92 = arith.constant 3 : index
    %c0_93 = arith.constant 0 : index
    %c0_94 = arith.constant 0 : index
    %91 = vector.load %arg4[%c3_92, %c0_93, %c0_94] : memref<4x196x128xbf16, #tpu.memory_space<vmem>>, vector<1x196x128xbf16>
    %92 = vector.shape_cast %91 : vector<1x196x128xbf16> to vector<196x128xbf16>
    %93 = vector.shape_cast %90 : vector<196x128xbf16> to vector<1x196x128xbf16>
    tpu.vector_store %arg4[%c3_92, %c0_93, %c0_94], %93 {strides = array<i32>} : memref<4x196x128xbf16, #tpu.memory_space<vmem>>, vector<1x196x128xbf16>,
    return
  }
  func.func @transform_0(%arg0: i32) -> (i32, i32, i32, i32) {
    %c0_i32 = arith.constant 0 : i32
    %c0_i32_0 = arith.constant 0 : i32
    %c0_i32_1 = arith.constant 0 : i32
    %c0_i32_2 = arith.constant 0 : i32
    return %arg0, %c0_i32, %c0_i32_0, %c0_i32_1 : i32, i32, i32, i32
  }
  func.func @transform_1(%arg0: i32) -> (i32, i32) {
    %c0_i32 = arith.constant 0 : i32
    %c0_i32_0 = arith.constant 0 : i32
    %c0_i32_1 = arith.constant 0 : i32
    return %c0_i32, %c0_i32_0 : i32, i32
  }
  func.func @transform_2(%arg0: i32) -> (i32, i32) {
    %c0_i32 = arith.constant 0 : i32
    %c0_i32_0 = arith.constant 0 : i32
    %c0_i32_1 = arith.constant 0 : i32
    return %c0_i32, %c0_i32_0 : i32, i32
  }
  func.func @transform_3(%arg0: i32) -> (i32, i32, i32) {
    %c0_i32 = arith.constant 0 : i32
    %c0_i32_0 = arith.constant 0 : i32
    %c0_i32_1 = arith.constant 0 : i32
    return %arg0, %c0_i32, %c0_i32_0 : i32, i32, i32
  }
}

module attributes {stable_mosaic.version = 11 : i64} {
  func.func @conv_bn_relu_pool_kernel(%arg0: i32, %arg1: memref<4x4x49x72xbf16, #tpu.memory_space<vmem>>, %arg2: memref<72x128xbf16, #tpu.memory_space<vmem>>, %arg3: memref<1x128xf32, #tpu.memory_space<vmem>>, %arg4: memref<4x49x128xbf16, #tpu.memory_space<vmem>>) attributes {dimension_semantics = [#tpu.dimension_semantics<parallel>], iteration_bounds = array<i64: 2>, scalar_prefetch = 0 : i64, scratch_operands = 0 : i64, tpu.core_type = #tpu.core_type<tc>, window_params = [{transform_indices = @transform_0, window_bounds = array<i64: 4, 4, 49, 72>}, {pipeline_mode = #tpu.pipeline_mode<synchronous>, transform_indices = @transform_1, window_bounds = array<i64: 72, 128>}, {pipeline_mode = #tpu.pipeline_mode<synchronous>, transform_indices = @transform_2, window_bounds = array<i64: 1, 128>}, {transform_indices = @transform_3, window_bounds = array<i64: 4, 49, 128>}]} {
    %c0 = arith.constant 0 : index
    %c0_0 = arith.constant 0 : index
    %0 = vector.load %arg2[%c0, %c0_0] : memref<72x128xbf16, #tpu.memory_space<vmem>>, vector<72x128xbf16>
    %c0_1 = arith.constant 0 : index
    %c0_2 = arith.constant 0 : index
    %1 = vector.load %arg3[%c0_1, %c0_2] : memref<1x128xf32, #tpu.memory_space<vmem>>, vector<1x128xf32>
    %c0_3 = arith.constant 0 : index
    %c0_4 = arith.constant 0 : index
    %c0_5 = arith.constant 0 : index
    %c0_6 = arith.constant 0 : index
    %2 = vector.load %arg1[%c0_3, %c0_4, %c0_5, %c0_6] : memref<4x4x49x72xbf16, #tpu.memory_space<vmem>>, vector<1x1x49x72xbf16>
    %3 = vector.shape_cast %2 : vector<1x1x49x72xbf16> to vector<49x72xbf16>
    %cst = arith.constant dense<0.000000e+00> : vector<49x128xf32>
    %4 = tpu.matmul %3, %0, %cst {dimension_numbers = #tpu.dot_dimension_numbers<[1], [0], [0], [1], [0, 0, 1, 1], [], []>} : vector<49x72xbf16>, vector<72x128xbf16>, vector<49x128xf32> -> vector<49x128xf32>
    %c0_7 = arith.constant 0 : index
    %c1 = arith.constant 1 : index
    %c0_8 = arith.constant 0 : index
    %c0_9 = arith.constant 0 : index
    %5 = vector.load %arg1[%c0_7, %c1, %c0_8, %c0_9] : memref<4x4x49x72xbf16, #tpu.memory_space<vmem>>, vector<1x1x49x72xbf16>
    %6 = vector.shape_cast %5 : vector<1x1x49x72xbf16> to vector<49x72xbf16>
    %cst_10 = arith.constant dense<0.000000e+00> : vector<49x128xf32>
    %7 = tpu.matmul %6, %0, %cst_10 {dimension_numbers = #tpu.dot_dimension_numbers<[1], [0], [0], [1], [0, 0, 1, 1], [], []>} : vector<49x72xbf16>, vector<72x128xbf16>, vector<49x128xf32> -> vector<49x128xf32>
    %8 = arith.maximumf %4, %7 : vector<49x128xf32>
    %c0_11 = arith.constant 0 : index
    %c2 = arith.constant 2 : index
    %c0_12 = arith.constant 0 : index
    %c0_13 = arith.constant 0 : index
    %9 = vector.load %arg1[%c0_11, %c2, %c0_12, %c0_13] : memref<4x4x49x72xbf16, #tpu.memory_space<vmem>>, vector<1x1x49x72xbf16>
    %10 = vector.shape_cast %9 : vector<1x1x49x72xbf16> to vector<49x72xbf16>
    %cst_14 = arith.constant dense<0.000000e+00> : vector<49x128xf32>
    %11 = tpu.matmul %10, %0, %cst_14 {dimension_numbers = #tpu.dot_dimension_numbers<[1], [0], [0], [1], [0, 0, 1, 1], [], []>} : vector<49x72xbf16>, vector<72x128xbf16>, vector<49x128xf32> -> vector<49x128xf32>
    %12 = arith.maximumf %8, %11 : vector<49x128xf32>
    %c0_15 = arith.constant 0 : index
    %c3 = arith.constant 3 : index
    %c0_16 = arith.constant 0 : index
    %c0_17 = arith.constant 0 : index
    %13 = vector.load %arg1[%c0_15, %c3, %c0_16, %c0_17] : memref<4x4x49x72xbf16, #tpu.memory_space<vmem>>, vector<1x1x49x72xbf16>
    %14 = vector.shape_cast %13 : vector<1x1x49x72xbf16> to vector<49x72xbf16>
    %cst_18 = arith.constant dense<0.000000e+00> : vector<49x128xf32>
    %15 = tpu.matmul %14, %0, %cst_18 {dimension_numbers = #tpu.dot_dimension_numbers<[1], [0], [0], [1], [0, 0, 1, 1], [], []>} : vector<49x72xbf16>, vector<72x128xbf16>, vector<49x128xf32> -> vector<49x128xf32>
    %16 = arith.maximumf %12, %15 : vector<49x128xf32>
    %17 = vector.broadcast %1 : vector<1x128xf32> to vector<49x128xf32>
    %18 = arith.addf %16, %17 : vector<49x128xf32>
    %cst_19 = arith.constant 0.000000e+00 : f32
    %19 = vector.broadcast %cst_19 : f32 to vector<49x128xf32>
    %20 = arith.maximumf %18, %19 : vector<49x128xf32>
    %21 = arith.truncf %20 : vector<49x128xf32> to vector<49x128xbf16>
    %c0_20 = arith.constant 0 : index
    %c0_21 = arith.constant 0 : index
    %c0_22 = arith.constant 0 : index
    %22 = vector.load %arg4[%c0_20, %c0_21, %c0_22] : memref<4x49x128xbf16, #tpu.memory_space<vmem>>, vector<1x49x128xbf16>
    %23 = vector.shape_cast %22 : vector<1x49x128xbf16> to vector<49x128xbf16>
    %24 = vector.shape_cast %21 : vector<49x128xbf16> to vector<1x49x128xbf16>
    tpu.vector_store %arg4[%c0_20, %c0_21, %c0_22], %24 {strides = array<i32>} : memref<4x49x128xbf16, #tpu.memory_space<vmem>>, vector<1x49x128xbf16>,
    %c1_23 = arith.constant 1 : index
    %c0_24 = arith.constant 0 : index
    %c0_25 = arith.constant 0 : index
    %c0_26 = arith.constant 0 : index
    %25 = vector.load %arg1[%c1_23, %c0_24, %c0_25, %c0_26] : memref<4x4x49x72xbf16, #tpu.memory_space<vmem>>, vector<1x1x49x72xbf16>
    %26 = vector.shape_cast %25 : vector<1x1x49x72xbf16> to vector<49x72xbf16>
    %cst_27 = arith.constant dense<0.000000e+00> : vector<49x128xf32>
    %27 = tpu.matmul %26, %0, %cst_27 {dimension_numbers = #tpu.dot_dimension_numbers<[1], [0], [0], [1], [0, 0, 1, 1], [], []>} : vector<49x72xbf16>, vector<72x128xbf16>, vector<49x128xf32> -> vector<49x128xf32>
    %c1_28 = arith.constant 1 : index
    %c1_29 = arith.constant 1 : index
    %c0_30 = arith.constant 0 : index
    %c0_31 = arith.constant 0 : index
    %28 = vector.load %arg1[%c1_28, %c1_29, %c0_30, %c0_31] : memref<4x4x49x72xbf16, #tpu.memory_space<vmem>>, vector<1x1x49x72xbf16>
    %29 = vector.shape_cast %28 : vector<1x1x49x72xbf16> to vector<49x72xbf16>
    %cst_32 = arith.constant dense<0.000000e+00> : vector<49x128xf32>
    %30 = tpu.matmul %29, %0, %cst_32 {dimension_numbers = #tpu.dot_dimension_numbers<[1], [0], [0], [1], [0, 0, 1, 1], [], []>} : vector<49x72xbf16>, vector<72x128xbf16>, vector<49x128xf32> -> vector<49x128xf32>
    %31 = arith.maximumf %27, %30 : vector<49x128xf32>
    %c1_33 = arith.constant 1 : index
    %c2_34 = arith.constant 2 : index
    %c0_35 = arith.constant 0 : index
    %c0_36 = arith.constant 0 : index
    %32 = vector.load %arg1[%c1_33, %c2_34, %c0_35, %c0_36] : memref<4x4x49x72xbf16, #tpu.memory_space<vmem>>, vector<1x1x49x72xbf16>
    %33 = vector.shape_cast %32 : vector<1x1x49x72xbf16> to vector<49x72xbf16>
    %cst_37 = arith.constant dense<0.000000e+00> : vector<49x128xf32>
    %34 = tpu.matmul %33, %0, %cst_37 {dimension_numbers = #tpu.dot_dimension_numbers<[1], [0], [0], [1], [0, 0, 1, 1], [], []>} : vector<49x72xbf16>, vector<72x128xbf16>, vector<49x128xf32> -> vector<49x128xf32>
    %35 = arith.maximumf %31, %34 : vector<49x128xf32>
    %c1_38 = arith.constant 1 : index
    %c3_39 = arith.constant 3 : index
    %c0_40 = arith.constant 0 : index
    %c0_41 = arith.constant 0 : index
    %36 = vector.load %arg1[%c1_38, %c3_39, %c0_40, %c0_41] : memref<4x4x49x72xbf16, #tpu.memory_space<vmem>>, vector<1x1x49x72xbf16>
    %37 = vector.shape_cast %36 : vector<1x1x49x72xbf16> to vector<49x72xbf16>
    %cst_42 = arith.constant dense<0.000000e+00> : vector<49x128xf32>
    %38 = tpu.matmul %37, %0, %cst_42 {dimension_numbers = #tpu.dot_dimension_numbers<[1], [0], [0], [1], [0, 0, 1, 1], [], []>} : vector<49x72xbf16>, vector<72x128xbf16>, vector<49x128xf32> -> vector<49x128xf32>
    %39 = arith.maximumf %35, %38 : vector<49x128xf32>
    %40 = vector.broadcast %1 : vector<1x128xf32> to vector<49x128xf32>
    %41 = arith.addf %39, %40 : vector<49x128xf32>
    %cst_43 = arith.constant 0.000000e+00 : f32
    %42 = vector.broadcast %cst_43 : f32 to vector<49x128xf32>
    %43 = arith.maximumf %41, %42 : vector<49x128xf32>
    %44 = arith.truncf %43 : vector<49x128xf32> to vector<49x128xbf16>
    %c1_44 = arith.constant 1 : index
    %c0_45 = arith.constant 0 : index
    %c0_46 = arith.constant 0 : index
    %45 = vector.load %arg4[%c1_44, %c0_45, %c0_46] : memref<4x49x128xbf16, #tpu.memory_space<vmem>>, vector<1x49x128xbf16>
    %46 = vector.shape_cast %45 : vector<1x49x128xbf16> to vector<49x128xbf16>
    %47 = vector.shape_cast %44 : vector<49x128xbf16> to vector<1x49x128xbf16>
    tpu.vector_store %arg4[%c1_44, %c0_45, %c0_46], %47 {strides = array<i32>} : memref<4x49x128xbf16, #tpu.memory_space<vmem>>, vector<1x49x128xbf16>,
    %c2_47 = arith.constant 2 : index
    %c0_48 = arith.constant 0 : index
    %c0_49 = arith.constant 0 : index
    %c0_50 = arith.constant 0 : index
    %48 = vector.load %arg1[%c2_47, %c0_48, %c0_49, %c0_50] : memref<4x4x49x72xbf16, #tpu.memory_space<vmem>>, vector<1x1x49x72xbf16>
    %49 = vector.shape_cast %48 : vector<1x1x49x72xbf16> to vector<49x72xbf16>
    %cst_51 = arith.constant dense<0.000000e+00> : vector<49x128xf32>
    %50 = tpu.matmul %49, %0, %cst_51 {dimension_numbers = #tpu.dot_dimension_numbers<[1], [0], [0], [1], [0, 0, 1, 1], [], []>} : vector<49x72xbf16>, vector<72x128xbf16>, vector<49x128xf32> -> vector<49x128xf32>
    %c2_52 = arith.constant 2 : index
    %c1_53 = arith.constant 1 : index
    %c0_54 = arith.constant 0 : index
    %c0_55 = arith.constant 0 : index
    %51 = vector.load %arg1[%c2_52, %c1_53, %c0_54, %c0_55] : memref<4x4x49x72xbf16, #tpu.memory_space<vmem>>, vector<1x1x49x72xbf16>
    %52 = vector.shape_cast %51 : vector<1x1x49x72xbf16> to vector<49x72xbf16>
    %cst_56 = arith.constant dense<0.000000e+00> : vector<49x128xf32>
    %53 = tpu.matmul %52, %0, %cst_56 {dimension_numbers = #tpu.dot_dimension_numbers<[1], [0], [0], [1], [0, 0, 1, 1], [], []>} : vector<49x72xbf16>, vector<72x128xbf16>, vector<49x128xf32> -> vector<49x128xf32>
    %54 = arith.maximumf %50, %53 : vector<49x128xf32>
    %c2_57 = arith.constant 2 : index
    %c2_58 = arith.constant 2 : index
    %c0_59 = arith.constant 0 : index
    %c0_60 = arith.constant 0 : index
    %55 = vector.load %arg1[%c2_57, %c2_58, %c0_59, %c0_60] : memref<4x4x49x72xbf16, #tpu.memory_space<vmem>>, vector<1x1x49x72xbf16>
    %56 = vector.shape_cast %55 : vector<1x1x49x72xbf16> to vector<49x72xbf16>
    %cst_61 = arith.constant dense<0.000000e+00> : vector<49x128xf32>
    %57 = tpu.matmul %56, %0, %cst_61 {dimension_numbers = #tpu.dot_dimension_numbers<[1], [0], [0], [1], [0, 0, 1, 1], [], []>} : vector<49x72xbf16>, vector<72x128xbf16>, vector<49x128xf32> -> vector<49x128xf32>
    %58 = arith.maximumf %54, %57 : vector<49x128xf32>
    %c2_62 = arith.constant 2 : index
    %c3_63 = arith.constant 3 : index
    %c0_64 = arith.constant 0 : index
    %c0_65 = arith.constant 0 : index
    %59 = vector.load %arg1[%c2_62, %c3_63, %c0_64, %c0_65] : memref<4x4x49x72xbf16, #tpu.memory_space<vmem>>, vector<1x1x49x72xbf16>
    %60 = vector.shape_cast %59 : vector<1x1x49x72xbf16> to vector<49x72xbf16>
    %cst_66 = arith.constant dense<0.000000e+00> : vector<49x128xf32>
    %61 = tpu.matmul %60, %0, %cst_66 {dimension_numbers = #tpu.dot_dimension_numbers<[1], [0], [0], [1], [0, 0, 1, 1], [], []>} : vector<49x72xbf16>, vector<72x128xbf16>, vector<49x128xf32> -> vector<49x128xf32>
    %62 = arith.maximumf %58, %61 : vector<49x128xf32>
    %63 = vector.broadcast %1 : vector<1x128xf32> to vector<49x128xf32>
    %64 = arith.addf %62, %63 : vector<49x128xf32>
    %cst_67 = arith.constant 0.000000e+00 : f32
    %65 = vector.broadcast %cst_67 : f32 to vector<49x128xf32>
    %66 = arith.maximumf %64, %65 : vector<49x128xf32>
    %67 = arith.truncf %66 : vector<49x128xf32> to vector<49x128xbf16>
    %c2_68 = arith.constant 2 : index
    %c0_69 = arith.constant 0 : index
    %c0_70 = arith.constant 0 : index
    %68 = vector.load %arg4[%c2_68, %c0_69, %c0_70] : memref<4x49x128xbf16, #tpu.memory_space<vmem>>, vector<1x49x128xbf16>
    %69 = vector.shape_cast %68 : vector<1x49x128xbf16> to vector<49x128xbf16>
    %70 = vector.shape_cast %67 : vector<49x128xbf16> to vector<1x49x128xbf16>
    tpu.vector_store %arg4[%c2_68, %c0_69, %c0_70], %70 {strides = array<i32>} : memref<4x49x128xbf16, #tpu.memory_space<vmem>>, vector<1x49x128xbf16>,
    %c3_71 = arith.constant 3 : index
    %c0_72 = arith.constant 0 : index
    %c0_73 = arith.constant 0 : index
    %c0_74 = arith.constant 0 : index
    %71 = vector.load %arg1[%c3_71, %c0_72, %c0_73, %c0_74] : memref<4x4x49x72xbf16, #tpu.memory_space<vmem>>, vector<1x1x49x72xbf16>
    %72 = vector.shape_cast %71 : vector<1x1x49x72xbf16> to vector<49x72xbf16>
    %cst_75 = arith.constant dense<0.000000e+00> : vector<49x128xf32>
    %73 = tpu.matmul %72, %0, %cst_75 {dimension_numbers = #tpu.dot_dimension_numbers<[1], [0], [0], [1], [0, 0, 1, 1], [], []>} : vector<49x72xbf16>, vector<72x128xbf16>, vector<49x128xf32> -> vector<49x128xf32>
    %c3_76 = arith.constant 3 : index
    %c1_77 = arith.constant 1 : index
    %c0_78 = arith.constant 0 : index
    %c0_79 = arith.constant 0 : index
    %74 = vector.load %arg1[%c3_76, %c1_77, %c0_78, %c0_79] : memref<4x4x49x72xbf16, #tpu.memory_space<vmem>>, vector<1x1x49x72xbf16>
    %75 = vector.shape_cast %74 : vector<1x1x49x72xbf16> to vector<49x72xbf16>
    %cst_80 = arith.constant dense<0.000000e+00> : vector<49x128xf32>
    %76 = tpu.matmul %75, %0, %cst_80 {dimension_numbers = #tpu.dot_dimension_numbers<[1], [0], [0], [1], [0, 0, 1, 1], [], []>} : vector<49x72xbf16>, vector<72x128xbf16>, vector<49x128xf32> -> vector<49x128xf32>
    %77 = arith.maximumf %73, %76 : vector<49x128xf32>
    %c3_81 = arith.constant 3 : index
    %c2_82 = arith.constant 2 : index
    %c0_83 = arith.constant 0 : index
    %c0_84 = arith.constant 0 : index
    %78 = vector.load %arg1[%c3_81, %c2_82, %c0_83, %c0_84] : memref<4x4x49x72xbf16, #tpu.memory_space<vmem>>, vector<1x1x49x72xbf16>
    %79 = vector.shape_cast %78 : vector<1x1x49x72xbf16> to vector<49x72xbf16>
    %cst_85 = arith.constant dense<0.000000e+00> : vector<49x128xf32>
    %80 = tpu.matmul %79, %0, %cst_85 {dimension_numbers = #tpu.dot_dimension_numbers<[1], [0], [0], [1], [0, 0, 1, 1], [], []>} : vector<49x72xbf16>, vector<72x128xbf16>, vector<49x128xf32> -> vector<49x128xf32>
    %81 = arith.maximumf %77, %80 : vector<49x128xf32>
    %c3_86 = arith.constant 3 : index
    %c3_87 = arith.constant 3 : index
    %c0_88 = arith.constant 0 : index
    %c0_89 = arith.constant 0 : index
    %82 = vector.load %arg1[%c3_86, %c3_87, %c0_88, %c0_89] : memref<4x4x49x72xbf16, #tpu.memory_space<vmem>>, vector<1x1x49x72xbf16>
    %83 = vector.shape_cast %82 : vector<1x1x49x72xbf16> to vector<49x72xbf16>
    %cst_90 = arith.constant dense<0.000000e+00> : vector<49x128xf32>
    %84 = tpu.matmul %83, %0, %cst_90 {dimension_numbers = #tpu.dot_dimension_numbers<[1], [0], [0], [1], [0, 0, 1, 1], [], []>} : vector<49x72xbf16>, vector<72x128xbf16>, vector<49x128xf32> -> vector<49x128xf32>
    %85 = arith.maximumf %81, %84 : vector<49x128xf32>
    %86 = vector.broadcast %1 : vector<1x128xf32> to vector<49x128xf32>
    %87 = arith.addf %85, %86 : vector<49x128xf32>
    %cst_91 = arith.constant 0.000000e+00 : f32
    %88 = vector.broadcast %cst_91 : f32 to vector<49x128xf32>
    %89 = arith.maximumf %87, %88 : vector<49x128xf32>
    %90 = arith.truncf %89 : vector<49x128xf32> to vector<49x128xbf16>
    %c3_92 = arith.constant 3 : index
    %c0_93 = arith.constant 0 : index
    %c0_94 = arith.constant 0 : index
    %91 = vector.load %arg4[%c3_92, %c0_93, %c0_94] : memref<4x49x128xbf16, #tpu.memory_space<vmem>>, vector<1x49x128xbf16>
    %92 = vector.shape_cast %91 : vector<1x49x128xbf16> to vector<49x128xbf16>
    %93 = vector.shape_cast %90 : vector<49x128xbf16> to vector<1x49x128xbf16>
    tpu.vector_store %arg4[%c3_92, %c0_93, %c0_94], %93 {strides = array<i32>} : memref<4x49x128xbf16, #tpu.memory_space<vmem>>, vector<1x49x128xbf16>,
    return
  }
  func.func @transform_0(%arg0: i32) -> (i32, i32, i32, i32) {
    %c0_i32 = arith.constant 0 : i32
    %c0_i32_0 = arith.constant 0 : i32
    %c0_i32_1 = arith.constant 0 : i32
    %c0_i32_2 = arith.constant 0 : i32
    return %arg0, %c0_i32, %c0_i32_0, %c0_i32_1 : i32, i32, i32, i32
  }
  func.func @transform_1(%arg0: i32) -> (i32, i32) {
    %c0_i32 = arith.constant 0 : i32
    %c0_i32_0 = arith.constant 0 : i32
    %c0_i32_1 = arith.constant 0 : i32
    return %c0_i32, %c0_i32_0 : i32, i32
  }
  func.func @transform_2(%arg0: i32) -> (i32, i32) {
    %c0_i32 = arith.constant 0 : i32
    %c0_i32_0 = arith.constant 0 : i32
    %c0_i32_1 = arith.constant 0 : i32
    return %c0_i32, %c0_i32_0 : i32, i32
  }
  func.func @transform_3(%arg0: i32) -> (i32, i32, i32) {
    %c0_i32 = arith.constant 0 : i32
    %c0_i32_0 = arith.constant 0 : i32
    %c0_i32_1 = arith.constant 0 : i32
    return %arg0, %c0_i32, %c0_i32_0 : i32, i32, i32
  }
}

module attributes {stable_mosaic.version = 11 : i64} {
  func.func @proto_dist_kernel(%arg0: i32, %arg1: memref<8x784xbf16, #tpu.memory_space<vmem>>, %arg2: memref<8x1xf32, #tpu.memory_space<vmem>>, %arg3: memref<784x128xbf16, #tpu.memory_space<vmem>>, %arg4: memref<1x128xf32, #tpu.memory_space<vmem>>, %arg5: memref<8x128xf32, #tpu.memory_space<vmem>>) attributes {dimension_semantics = [#tpu.dimension_semantics<parallel>], iteration_bounds = array<i64: 1>, scalar_prefetch = 0 : i64, scratch_operands = 0 : i64, tpu.core_type = #tpu.core_type<tc>, window_params = [{transform_indices = @transform_0, window_bounds = array<i64: 8, 784>}, {transform_indices = @transform_1, window_bounds = array<i64: 8, 1>}, {pipeline_mode = #tpu.pipeline_mode<synchronous>, transform_indices = @transform_2, window_bounds = array<i64: 784, 128>}, {pipeline_mode = #tpu.pipeline_mode<synchronous>, transform_indices = @transform_3, window_bounds = array<i64: 1, 128>}, {transform_indices = @transform_4, window_bounds = array<i64: 8, 128>}]} {
    %c0 = arith.constant 0 : index
    %c0_0 = arith.constant 0 : index
    %0 = vector.load %arg1[%c0, %c0_0] : memref<8x784xbf16, #tpu.memory_space<vmem>>, vector<8x784xbf16>
    %c0_1 = arith.constant 0 : index
    %c0_2 = arith.constant 0 : index
    %1 = vector.load %arg3[%c0_1, %c0_2] : memref<784x128xbf16, #tpu.memory_space<vmem>>, vector<784x128xbf16>
    %cst = arith.constant dense<0.000000e+00> : vector<8x128xf32>
    %2 = tpu.matmul %0, %1, %cst {dimension_numbers = #tpu.dot_dimension_numbers<[1], [0], [0], [1], [0, 0, 1, 1], [], []>} : vector<8x784xbf16>, vector<784x128xbf16>, vector<8x128xf32> -> vector<8x128xf32>
    %c0_3 = arith.constant 0 : index
    %c0_4 = arith.constant 0 : index
    %3 = vector.load %arg2[%c0_3, %c0_4] : memref<8x1xf32, #tpu.memory_space<vmem>>, vector<8x1xf32>
    %c0_5 = arith.constant 0 : index
    %c0_6 = arith.constant 0 : index
    %4 = vector.load %arg4[%c0_5, %c0_6] : memref<1x128xf32, #tpu.memory_space<vmem>>, vector<1x128xf32>
    %5 = vector.broadcast %3 : vector<8x1xf32> to vector<8x128xf32>
    %6 = vector.broadcast %4 : vector<1x128xf32> to vector<8x128xf32>
    %7 = arith.addf %5, %6 : vector<8x128xf32>
    %cst_7 = arith.constant 2.000000e+00 : f32
    %8 = vector.broadcast %cst_7 : f32 to vector<8x128xf32>
    %9 = arith.mulf %8, %2 : vector<8x128xf32>
    %10 = arith.subf %7, %9 : vector<8x128xf32>
    %cst_8 = arith.constant 0.000000e+00 : f32
    %11 = vector.broadcast %cst_8 : f32 to vector<8x128xf32>
    %12 = arith.maximumf %10, %11 : vector<8x128xf32>
    %13 = math.sqrt %12 : vector<8x128xf32>
    %c0_9 = arith.constant 0 : index
    %c0_10 = arith.constant 0 : index
    %14 = vector.load %arg5[%c0_9, %c0_10] : memref<8x128xf32, #tpu.memory_space<vmem>>, vector<8x128xf32>
    tpu.vector_store %arg5[%c0_9, %c0_10], %13 {strides = array<i32>} : memref<8x128xf32, #tpu.memory_space<vmem>>, vector<8x128xf32>,
    return
  }
  func.func @transform_0(%arg0: i32) -> (i32, i32) {
    %c0_i32 = arith.constant 0 : i32
    %c0_i32_0 = arith.constant 0 : i32
    return %arg0, %c0_i32 : i32, i32
  }
  func.func @transform_1(%arg0: i32) -> (i32, i32) {
    %c0_i32 = arith.constant 0 : i32
    %c0_i32_0 = arith.constant 0 : i32
    return %arg0, %c0_i32 : i32, i32
  }
  func.func @transform_2(%arg0: i32) -> (i32, i32) {
    %c0_i32 = arith.constant 0 : i32
    %c0_i32_0 = arith.constant 0 : i32
    %c0_i32_1 = arith.constant 0 : i32
    return %c0_i32, %c0_i32_0 : i32, i32
  }
  func.func @transform_3(%arg0: i32) -> (i32, i32) {
    %c0_i32 = arith.constant 0 : i32
    %c0_i32_0 = arith.constant 0 : i32
    %c0_i32_1 = arith.constant 0 : i32
    return %c0_i32, %c0_i32_0 : i32, i32
  }
  func.func @transform_4(%arg0: i32) -> (i32, i32) {
    %c0_i32 = arith.constant 0 : i32
    %c0_i32_0 = arith.constant 0 : i32
    return %arg0, %c0_i32 : i32, i32
  }
}

</mosaic_0001>

<bundles_post_ra>
// kernel: prototypical_net_forward.3
= control target key start
LH: loop header
LB: loop body
LE: loop exit
PB: predicated region body
PF: predicated region fallthrough
CT: control target
= control target key end

     0   :  { %s8249_s12 = smov 0   ;;  %s10265_s0 = inlined_call_operand.vmem [shape: bf16[8,4,196,27], index: 0, kind: input, shape index: {}]   ;;  %s10266_s1 = inlined_call_operand.vmem [shape: bf16[27,128], index: 1, kind: input, shape index: {}]   ;;  %s10267_s2 = inlined_call_operand.vmem [shape: f32[1,128], index: 2, kind: input, shape index: {}]   ;;  %s10268_s3 = inlined_call_operand.vmem [shape: bf16[8,196,128], index: 3, kind: output, shape index: {}]  }
   0x1 LB: > { %s5498_s13 = sadd.s32 4294967295, %s8224_s12   ;;  %p5502_p0 = scmp.ge.s32.totalorder %s8224_s12, 1  ;;  %s8224_s12 = sphi %s8249_s12, %s13_s12  }
   0x2   : > { %p139_p1 = scmp.lt.s32.totalorder %s8224_s12, 3 }
   0x4   : > { %p140_p2 = pnand %p5502_p0, %p139_p1 }
   0x6   : > { %143 = sbr.rel (%p140_p2) target bundleno = 1069 (0x42d), region = 32 }
   0xd   : > { %v8260_v0 = vld [vmem:[%s10266_s1] sm:$0xff]   ;;  %v10271_v1 = vmov 0.0   ;;  %v8003_v2 = vld [vmem:[%s10266_s1 + $0x8] sm:$0x3f]   ;;  %vm324_vm0 = vcmask 1044480   ;;  %vm325_vm1 = vcmask 1045504  }
   0xe   : > { %7093 = vmatprep.subr.bf16.mxu0 %v10271_v1  ;;  %7149 = vmatprep.subr.bf16.mxu1 %v10271_v1  ;;  %s5503_s18 = sshll.u32 %s5498_s13, 2  ;;  %v8227_v3 = vmov 65535   ;;  %vm8228_vm2 = vmmov 0   ;;  %vm284_vm3 = vcmask 220160   ;;  %v8520_v61 = vld [vmem:[%s10266_s1] sm:$0xff]  }
   0xf   : > { %7094 = vmatpush3.bf16.msra.mxu0 %v8260_v0  ;;  %7150 = vmatpush3.bf16.msra.mxu1 %v8260_v0  ;;  %v326_v4 = vsel %vm324_vm0, 4294967295, %v8227_v3  ;;  %p166_p3 = scmp.lt.s32.totalorder %s5503_s18, 7 }
  0x10   : > { %7095 = vmatprep.subr.bf16.mxu0 %v10271_v1  ;;  %7151 = vmatprep.subr.bf16.mxu1 %v10271_v1  ;;  %v327_v5 = vsel %vm325_vm1, %v326_v4, 0 }
  0x11   : > { %7097 = vmatprep.mubr.msk.bf16.mxu0 %vm8228_vm2, %v10271_v1  ;;  %7153 = vmatprep.mubr.msk.bf16.mxu1 %vm8228_vm2, %v10271_v1  ;;  %v8275_v6 = vand.u32 %v8003_v2, %v327_v5  ;;  %s10393_s18 = smov (!%p166_p3, %s5503_s18), 7 }
  0x12   : > { %s7989_s19 = smul.u32 400, %s10393_s18 }
  0x13   : > { %7096 = vmatpush3.bf16.msra.mxu0 %v8275_v6  ;;  %7152 = vmatpush3.bf16.msra.mxu1 %v8275_v6  ;;  %s7990_s27 = smul.u32 100, %s10393_s18 }
  0x14   : > { %7205 = vmatprep.subr.bf16.mxu0 %v10271_v1  ;;  %7261 = vmatprep.subr.bf16.mxu1 %v10271_v1  ;;  %s8287_s22 = scalar_lea.vmem %s10265_s0, %s7989_s19 }
  0x15   : > { %v8004_v7 = vld [vmem:[%s8287_s22] sm:$0xff]   ;;  %v8006_v9 = vld [vmem:[%s8287_s22 + $0x8] sm:$0xff]   ;;  %v8008_v11 = vld [vmem:[%s8287_s22 + $0x10] sm:$0xff]   ;;  %s8825_s30 = scalar_lea.vmem %s10268_s3, %s7990_s27 }
  0x16   : > { %v8005_v8 = vld [vmem:[%s8287_s22 + $0x64] sm:$0xff]   ;;  %7098 = vmatmul.mubr.msk.bf16.vlgmr.msra.gmra.mrb[0].mxu0 %vm284_vm3, %v8004_v7  ;;  %v8007_v10 = vld [vmem:[%s8287_s22 + $0x6c] sm:$0xff]   ;;  %v8009_v12 = vld [vmem:[%s8287_s22 + $0x74] sm:$0xff]  }
  0x17   : > { %7154 = vmatmul.mubr.msk.bf16.vlgmr.msra.gmra.mrb[0].mxu1 %vm284_vm3, %v8005_v8  ;;  %7206 = vmatpush3.bf16.msra.mxu0 %v8260_v0  ;;  %v8010_v13 = vld [vmem:[%s8287_s22 + $0x18] sm:$0xff]   ;;  %v8012_v15 = vld [vmem:[%s8287_s22 + $0x20] sm:$0xff]   ;;  %v8014_v17 = vld [vmem:[%s8287_s22 + $0x28] sm:$0xff]  }
  0x18   : > { %7262 = vmatpush3.bf16.msra.mxu1 %v8260_v0  ;;  %7101 = vmatprep.mubr.msk.bf16.mxu0 %vm8228_vm2, %v10271_v1  ;;  %v8011_v14 = vld [vmem:[%s8287_s22 + $0x7c] sm:$0xff]   ;;  %v8013_v16 = vld [vmem:[%s8287_s22 + $0x84] sm:$0xff]   ;;  %v8015_v18 = vld [vmem:[%s8287_s22 + $0x8c] sm:$0xff]  }
  0x19   : > { %7157 = vmatprep.mubr.msk.bf16.mxu1 %vm8228_vm2, %v10271_v1  ;;  %7207 = vmatprep.subr.bf16.mxu0 %v10271_v1  ;;  %v8016_v19 = vld [vmem:[%s8287_s22 + $0x30] sm:$0xff]   ;;  %v8018_v21 = vld [vmem:[%s8287_s22 + $0x38] sm:$0xff]   ;;  %v8020_v23 = vld [vmem:[%s8287_s22 + $0x40] sm:$0xff]  }
  0x1a   : > { %7263 = vmatprep.subr.bf16.mxu1 %v10271_v1  ;;  %v8017_v20 = vld [vmem:[%s8287_s22 + $0x94] sm:$0xff]   ;;  %v8019_v22 = vld [vmem:[%s8287_s22 + $0x9c] sm:$0xff]   ;;  %v8021_v24 = vld [vmem:[%s8287_s22 + $0xa4] sm:$0xff]  }
  0x1b   : > { %7208 = vmatpush3.bf16.msra.mxu0 %v8275_v6  ;;  %v8022_v25 = vld [vmem:[%s8287_s22 + $0x48] sm:$0xff]   ;;  %v8024_v27 = vld [vmem:[%s8287_s22 + $0x50] sm:$0xff]   ;;  %v8026_v29 = vld [vmem:[%s8287_s22 + $0x58] sm:$0xff]  }
  0x1c   : > { %7264 = vmatpush3.bf16.msra.mxu1 %v8275_v6  ;;  %7317 = vmatprep.subr.bf16.mxu0 %v10271_v1  ;;  %v8023_v26 = vld [vmem:[%s8287_s22 + $0xac] sm:$0xff]   ;;  %v8025_v28 = vld [vmem:[%s8287_s22 + $0xb4] sm:$0xff]   ;;  %v8027_v30 = vld [vmem:[%s8287_s22 + $0xbc] sm:$0xff]  }
  0x1d   : > { %7373 = vmatprep.subr.bf16.mxu1 %v10271_v1  ;;  %v8028_v31 = vld [vmem:[%s8287_s22 + $0x60] ss:$0 sps:$4 sm:$0x33]   ;;  %v8029_v32 = vld [vmem:[%s8287_s22 + $0xc4] ss:$0 sps:$4 sm:$0x33]  }
  0x1e   : > { %7102 = vmatmul.mubr.msk.bf16.gmra.mrb[4].mxu0 %vm284_vm3, %v8006_v9  ;;  %v8030_v33 = vld [vmem:[%s8287_s22 + $0xc8] sm:$0xff]   ;;  %v8032_v35 = vld [vmem:[%s8287_s22 + $0xd0] sm:$0xff]   ;;  %v8034_v37 = vld [vmem:[%s8287_s22 + $0xd8] sm:$0xff]  }
  0x1f   : > { %7158 = vmatmul.mubr.msk.bf16.gmra.mrb[4].mxu1 %vm284_vm3, %v8007_v10  ;;  %7105 = vmatprep.mubr.msk.bf16.mxu0 %vm8228_vm2, %v10271_v1  ;;  %v8031_v34 = vld [vmem:[%s8287_s22 + $0x12c] sm:$0xff]   ;;  %v8033_v36 = vld [vmem:[%s8287_s22 + $0x134] sm:$0xff]   ;;  %v8035_v38 = vld [vmem:[%s8287_s22 + $0x13c] sm:$0xff]  }
  0x20   : > { %7161 = vmatprep.mubr.msk.bf16.mxu1 %vm8228_vm2, %v10271_v1  ;;  %v8036_v39 = vld [vmem:[%s8287_s22 + $0xe0] sm:$0xff]   ;;  %v8038_v41 = vld [vmem:[%s8287_s22 + $0xe8] sm:$0xff]   ;;  %v8040_v43 = vld [vmem:[%s8287_s22 + $0xf0] sm:$0xff]  }
  0x21   : > { %v8037_v40 = vld [vmem:[%s8287_s22 + $0x144] sm:$0xff]   ;;  %v8039_v42 = vld [vmem:[%s8287_s22 + $0x14c] sm:$0xff]   ;;  %v8041_v44 = vld [vmem:[%s8287_s22 + $0x154] sm:$0xff]  }
  0x22   : > { %v8042_v45 = vld [vmem:[%s8287_s22 + $0xf8] sm:$0xff]   ;;  %v8044_v47 = vld [vmem:[%s8287_s22 + $0x100] sm:$0xff]   ;;  %v8046_v49 = vld [vmem:[%s8287_s22 + $0x108] sm:$0xff]  }
  0x23   : > { %v8043_v46 = vld [vmem:[%s8287_s22 + $0x15c] sm:$0xff]   ;;  %v8045_v48 = vld [vmem:[%s8287_s22 + $0x164] sm:$0xff]   ;;  %v8047_v50 = vld [vmem:[%s8287_s22 + $0x16c] sm:$0xff]  }
  0x24   : > { %v8048_v51 = vld [vmem:[%s8287_s22 + $0x110] sm:$0xff]   ;;  %v8050_v53 = vld [vmem:[%s8287_s22 + $0x118] sm:$0xff]   ;;  %v8052_v55 = vld [vmem:[%s8287_s22 + $0x120] sm:$0xff]  }
  0x25   : > { %v8049_v52 = vld [vmem:[%s8287_s22 + $0x174] sm:$0xff]   ;;  %v8051_v54 = vld [vmem:[%s8287_s22 + $0x17c] sm:$0xff]   ;;  %v8053_v56 = vld [vmem:[%s8287_s22 + $0x184] sm:$0xff]  }
  0x26   : > { %7106 = vmatmul.mubr.msk.bf16.gmra.mrb[8].mxu0 %vm284_vm3, %v8008_v11  ;;  %v8054_v57 = vld [vmem:[%s8287_s22 + $0x128] ss:$0 sps:$4 sm:$0x33]   ;;  %v8055_v58 = vld [vmem:[%s8287_s22 + $0x18c] ss:$0 sps:$4 sm:$0x33]  }
  0x27   : > { %7162 = vmatmul.mubr.msk.bf16.gmra.mrb[8].mxu1 %vm284_vm3, %v8009_v12  ;;  %7109 = vmatprep.mubr.msk.bf16.mxu0 %vm8228_vm2, %v10271_v1  ;;  %v8056_v59 = vld [vmem:[%s8287_s22 + $0x190] sm:$0xff]   ;;  %v8058_v2 = vld [vmem:[%s8287_s22 + $0x198] sm:$0xff]  }
  0x28   : > { %7165 = vmatprep.mubr.msk.bf16.mxu1 %vm8228_vm2, %v10271_v1  ;;  %v8057_v60 = vld [vmem:[%s8287_s22 + $0x1f4] sm:$0xff]   ;;  %v8059_v7 = vld [vmem:[%s8287_s22 + $0x1fc] sm:$0xff]  }
  0x2e   : > { %7110 = vmatmul.mubr.msk.bf16.gmra.mrb[12].mxu0 %vm284_vm3, %v8010_v13 }
  0x2f   : > { %7166 = vmatmul.mubr.msk.bf16.gmra.mrb[12].mxu1 %vm284_vm3, %v8011_v14  ;;  %7113 = vmatprep.mubr.msk.bf16.mxu0 %vm8228_vm2, %v10271_v1 }
  0x30   : > { %7169 = vmatprep.mubr.msk.bf16.mxu1 %vm8228_vm2, %v10271_v1 }
  0x36   : > { %7114 = vmatmul.mubr.msk.bf16.gmra.mrb[16].mxu0 %vm284_vm3, %v8012_v15  ;;  %v8060_v15 = vld [vmem:[%s8287_s22 + $0x1a0] sm:$0xff]  }
  0x37   : > { %7170 = vmatmul.mubr.msk.bf16.gmra.mrb[16].mxu1 %vm284_vm3, %v8013_v16  ;;  %7117 = vmatprep.mubr.msk.bf16.mxu0 %vm8228_vm2, %v10271_v1 }
  0x38   : > { %7173 = vmatprep.mubr.msk.bf16.mxu1 %vm8228_vm2, %v10271_v1 }
  0x3e   : > { %7118 = vmatmul.mubr.msk.bf16.gmra.mrb[20].mxu0 %vm284_vm3, %v8014_v17 }
  0x3f   : > { %7174 = vmatmul.mubr.msk.bf16.gmra.mrb[20].mxu1 %vm284_vm3, %v8015_v18  ;;  %7121 = vmatprep.mubr.msk.bf16.mxu0 %vm8228_vm2, %v10271_v1 }
  0x40   : > { %7177 = vmatprep.mubr.msk.bf16.mxu1 %vm8228_vm2, %v10271_v1 }
  0x46   : > { %7122 = vmatmul.mubr.msk.bf16.gmra.mrb[24].mxu0 %vm284_vm3, %v8016_v19  ;;  %v8061_v19 = vld [vmem:[%s8287_s22 + $0x204] sm:$0xff]  }
  0x47   : > { %7178 = vmatmul.mubr.msk.bf16.gmra.mrb[24].mxu1 %vm284_vm3, %v8017_v20  ;;  %7125 = vmatprep.mubr.msk.bf16.mxu0 %vm8228_vm2, %v10271_v1 }
  0x48   : > { %7181 = vmatprep.mubr.msk.bf16.mxu1 %vm8228_vm2, %v10271_v1 }
  0x4e   : > { %7126 = vmatmul.mubr.msk.bf16.gmra.mrb[28].mxu0 %vm284_vm3, %v8018_v21 }
  0x4f   : > { %7182 = vmatmul.mubr.msk.bf16.gmra.mrb[28].mxu1 %vm284_vm3, %v8019_v22  ;;  %7129 = vmatprep.mubr.msk.bf16.mxu0 %vm8228_vm2, %v10271_v1 }
  0x50   : > { %7185 = vmatprep.mubr.msk.bf16.mxu1 %vm8228_vm2, %v10271_v1 }
  0x56   : > { %7130 = vmatmul.mubr.msk.bf16.gmra.mrb[32].mxu0 %vm284_vm3, %v8020_v23 }
  0x57   : > { %7186 = vmatmul.mubr.msk.bf16.gmra.mrb[32].mxu1 %vm284_vm3, %v8021_v24  ;;  %7133 = vmatprep.mubr.msk.bf16.mxu0 %vm8228_vm2, %v10271_v1 }
  0x58   : > { %7189 = vmatprep.mubr.msk.bf16.mxu1 %vm8228_vm2, %v10271_v1 }
  0x5e   : > { %7134 = vmatmul.mubr.msk.bf16.gmra.mrb[36].mxu0 %vm284_vm3, %v8022_v25 }
  0x5f   : > { %7190 = vmatmul.mubr.msk.bf16.gmra.mrb[36].mxu1 %vm284_vm3, %v8023_v26  ;;  %7137 = vmatprep.mubr.msk.bf16.mxu0 %vm8228_vm2, %v10271_v1 }
  0x60   : > { %7193 = vmatprep.mubr.msk.bf16.mxu1 %vm8228_vm2, %v10271_v1 }
  0x66   : > { %7138 = vmatmul.mubr.msk.bf16.gmra.mrb[40].mxu0 %vm284_vm3, %v8024_v27  ;;  %v8062_v27 = vld [vmem:[%s8287_s22 + $0x1a8] sm:$0xff]  }
  0x67   : > { %7194 = vmatmul.mubr.msk.bf16.gmra.mrb[40].mxu1 %vm284_vm3, %v8025_v28  ;;  %7141 = vmatprep.mubr.msk.bf16.mxu0 %vm8228_vm2, %v10271_v1 }
  0x68   : > { %7197 = vmatprep.mubr.msk.bf16.mxu1 %vm8228_vm2, %v10271_v1 }
  0x6e   : > { %7142 = vmatmul.mubr.msk.bf16.gmra.mrb[44].mxu0 %vm284_vm3, %v8026_v29 }
  0x6f   : > { %7198 = vmatmul.mubr.msk.bf16.gmra.mrb[44].mxu1 %vm284_vm3, %v8027_v30  ;;  %7145 = vmatprep.mubr.msk.bf16.mxu0 %vm8228_vm2, %v10271_v1 }
  0x70   : > { %7201 = vmatprep.mubr.msk.bf16.mxu1 %vm8228_vm2, %v10271_v1 }
  0x76   : > { %7146 = vmatmul.mubr.msk.bf16.gmra.mrb[48].mxu0 %vm284_vm3, %v8028_v31  ;;  %v8063_v31 = vld [vmem:[%s8287_s22 + $0x20c] sm:$0xff]  }
  0x77   : > { %7202 = vmatmul.mubr.msk.bf16.gmra.mrb[48].mxu1 %vm284_vm3, %v8029_v32  ;;  %7209 = vmatprep.mubr.msk.bf16.mxu0 %vm8228_vm2, %v10271_v1 }
  0x78   : > { %7265 = vmatprep.mubr.msk.bf16.mxu1 %vm8228_vm2, %v10271_v1 }
  0x7e   : > { %7210 = vmatmul.mubr.msk.bf16.vlgmr.msra.gmra.mrb[52].mxu0 %vm284_vm3, %v8030_v33 }
  0x7f   : > { %7266 = vmatmul.mubr.msk.bf16.vlgmr.msra.gmra.mrb[52].mxu1 %vm284_vm3, %v8031_v34  ;;  %7318 = vmatpush3.bf16.msra.mxu0 %v8260_v0 }
  0x80   : > { %7374 = vmatpush3.bf16.msra.mxu1 %v8260_v0  ;;  %7213 = vmatprep.mubr.msk.bf16.mxu0 %vm8228_vm2, %v10271_v1 }
  0x81   : > { %7269 = vmatprep.mubr.msk.bf16.mxu1 %vm8228_vm2, %v10271_v1  ;;  %7319 = vmatprep.subr.bf16.mxu0 %v10271_v1 }
  0x82   : > { %7375 = vmatprep.subr.bf16.mxu1 %v10271_v1 }
  0x83   : > { %7320 = vmatpush3.bf16.msra.mxu0 %v8275_v6 }
  0x84   : > { %7376 = vmatpush3.bf16.msra.mxu1 %v8275_v6  ;;  %7429 = vmatprep.subr.bf16.mxu0 %v10271_v1 }
  0x85   : > { %7485 = vmatprep.subr.bf16.mxu1 %v10271_v1 }
  0x86   : > { %7214 = vmatmul.mubr.msk.bf16.gmra.mrb[56].mxu0 %vm284_vm3, %v8032_v35 }
  0x87   : > { %7270 = vmatmul.mubr.msk.bf16.gmra.mrb[56].mxu1 %vm284_vm3, %v8033_v36  ;;  %7217 = vmatprep.mubr.msk.bf16.mxu0 %vm8228_vm2, %v10271_v1 }
  0x88   : > { %7273 = vmatprep.mubr.msk.bf16.mxu1 %vm8228_vm2, %v10271_v1 }
  0x8e   : > { %7218 = vmatmul.mubr.msk.bf16.gmra.mrb[60].mxu0 %vm284_vm3, %v8034_v37 }
  0x8f   : > { %7274 = vmatmul.mubr.msk.bf16.gmra.mrb[60].mxu1 %vm284_vm3, %v8035_v38  ;;  %7221 = vmatprep.mubr.msk.bf16.mxu0 %vm8228_vm2, %v10271_v1 }
  0x90   : > { %7277 = vmatprep.mubr.msk.bf16.mxu1 %vm8228_vm2, %v10271_v1 }
  0x96   : > { %7222 = vmatmul.mubr.msk.bf16.gmra.mrb[64].mxu0 %vm284_vm3, %v8036_v39  ;;  %v8064_v39 = vld [vmem:[%s8287_s22 + $0x1b0] sm:$0xff]  }
  0x97   : > { %7278 = vmatmul.mubr.msk.bf16.gmra.mrb[64].mxu1 %vm284_vm3, %v8037_v40  ;;  %7225 = vmatprep.mubr.msk.bf16.mxu0 %vm8228_vm2, %v10271_v1 }
  0x98   : > { %7281 = vmatprep.mubr.msk.bf16.mxu1 %vm8228_vm2, %v10271_v1 }
  0x9e   : > { %7226 = vmatmul.mubr.msk.bf16.gmra.mrb[68].mxu0 %vm284_vm3, %v8038_v41 }
  0x9f   : > { %7282 = vmatmul.mubr.msk.bf16.gmra.mrb[68].mxu1 %vm284_vm3, %v8039_v42  ;;  %7229 = vmatprep.mubr.msk.bf16.mxu0 %vm8228_vm2, %v10271_v1 }
  0xa0   : > { %7285 = vmatprep.mubr.msk.bf16.mxu1 %vm8228_vm2, %v10271_v1 }
  0xa6   : > { %7230 = vmatmul.mubr.msk.bf16.gmra.mrb[72].mxu0 %vm284_vm3, %v8040_v43  ;;  %v8065_v43 = vld [vmem:[%s8287_s22 + $0x214] sm:$0xff]  }
  0xa7   : > { %7286 = vmatmul.mubr.msk.bf16.gmra.mrb[72].mxu1 %vm284_vm3, %v8041_v44  ;;  %7233 = vmatprep.mubr.msk.bf16.mxu0 %vm8228_vm2, %v10271_v1 }
  0xa8   : > { %7289 = vmatprep.mubr.msk.bf16.mxu1 %vm8228_vm2, %v10271_v1 }
  0xae   : > { %7234 = vmatmul.mubr.msk.bf16.gmra.mrb[76].mxu0 %vm284_vm3, %v8042_v45 }
  0xaf   : > { %7290 = vmatmul.mubr.msk.bf16.gmra.mrb[76].mxu1 %vm284_vm3, %v8043_v46  ;;  %7237 = vmatprep.mubr.msk.bf16.mxu0 %vm8228_vm2, %v10271_v1 }
  0xb0   : > { %7293 = vmatprep.mubr.msk.bf16.mxu1 %vm8228_vm2, %v10271_v1 }
  0xb6   : > { %7238 = vmatmul.mubr.msk.bf16.gmra.mrb[80].mxu0 %vm284_vm3, %v8044_v47 }
  0xb7   : > { %7294 = vmatmul.mubr.msk.bf16.gmra.mrb[80].mxu1 %vm284_vm3, %v8045_v48  ;;  %7241 = vmatprep.mubr.msk.bf16.mxu0 %vm8228_vm2, %v10271_v1 }
  0xb8   : > { %7297 = vmatprep.mubr.msk.bf16.mxu1 %vm8228_vm2, %v10271_v1 }
  0xbe   : > { %7242 = vmatmul.mubr.msk.bf16.gmra.mrb[84].mxu0 %vm284_vm3, %v8046_v49 }
  0xbf   : > { %7298 = vmatmul.mubr.msk.bf16.gmra.mrb[84].mxu1 %vm284_vm3, %v8047_v50  ;;  %7245 = vmatprep.mubr.msk.bf16.mxu0 %vm8228_vm2, %v10271_v1 }
  0xc0   : > { %7301 = vmatprep.mubr.msk.bf16.mxu1 %vm8228_vm2, %v10271_v1 }
  0xc6   : > { %7246 = vmatmul.mubr.msk.bf16.gmra.mrb[88].mxu0 %vm284_vm3, %v8048_v51  ;;  %v8066_v51 = vld [vmem:[%s8287_s22 + $0x1b8] sm:$0xff]  }
  0xc7   : > { %7302 = vmatmul.mubr.msk.bf16.gmra.mrb[88].mxu1 %vm284_vm3, %v8049_v52  ;;  %7249 = vmatprep.mubr.msk.bf16.mxu0 %vm8228_vm2, %v10271_v1 }
  0xc8   : > { %7305 = vmatprep.mubr.msk.bf16.mxu1 %vm8228_vm2, %v10271_v1 }
  0xce   : > { %7250 = vmatmul.mubr.msk.bf16.gmra.mrb[92].mxu0 %vm284_vm3, %v8050_v53 }
  0xcf   : > { %7306 = vmatmul.mubr.msk.bf16.gmra.mrb[92].mxu1 %vm284_vm3, %v8051_v54  ;;  %7253 = vmatprep.mubr.msk.bf16.mxu0 %vm8228_vm2, %v10271_v1 }
  0xd0   : > { %7309 = vmatprep.mubr.msk.bf16.mxu1 %vm8228_vm2, %v10271_v1 }
  0xd6   : > { %7254 = vmatmul.mubr.msk.bf16.gmra.mrb[96].mxu0 %vm284_vm3, %v8052_v55  ;;  %v8067_v55 = vld [vmem:[%s8287_s22 + $0x21c] sm:$0xff]  }
  0xd7   : > { %7310 = vmatmul.mubr.msk.bf16.gmra.mrb[96].mxu1 %vm284_vm3, %v8053_v56  ;;  %7257 = vmatprep.mubr.msk.bf16.mxu0 %vm8228_vm2, %v10271_v1 }
  0xd8   : > { %7313 = vmatprep.mubr.msk.bf16.mxu1 %vm8228_vm2, %v10271_v1 }
  0xde   : > { %7258 = vmatmul.mubr.msk.bf16.gmra.mrb[100].mxu0 %vm284_vm3, %v8054_v57 }
  0xdf   : > { %7314 = vmatmul.mubr.msk.bf16.gmra.mrb[100].mxu1 %vm284_vm3, %v8055_v58  ;;  %7321 = vmatprep.mubr.msk.bf16.mxu0 %vm8228_vm2, %v10271_v1 }
  0xe0   : > { %7377 = vmatprep.mubr.msk.bf16.mxu1 %vm8228_vm2, %v10271_v1 }
  0xe6   : > { %7322 = vmatmul.mubr.msk.bf16.vlgmr.msra.gmra.mrb[104].mxu0 %vm284_vm3, %v8056_v59 }
  0xe7   : > { %7378 = vmatmul.mubr.msk.bf16.vlgmr.msra.gmra.mrb[104].mxu1 %vm284_vm3, %v8057_v60  ;;  %7430 = vmatpush3.bf16.msra.mxu0 %v8520_v61 }
  0xe8   : > { %7486 = vmatpush3.bf16.msra.mxu1 %v8520_v61  ;;  %7325 = vmatprep.mubr.msk.bf16.mxu0 %vm8228_vm2, %v10271_v1 }
  0xe9   : > { %v8526_v62 = vpop.f32.mrb[0].mxu0  ;;  %7381 = vmatprep.mubr.msk.bf16.mxu1 %vm8228_vm2, %v10271_v1  ;;  %7431 = vmatprep.subr.bf16.mxu0 %v10271_v1 }
  0xea   : > { %v8531_v63 = vpop.f32.mrb[0].mxu1  ;;  %v7099_v0 = vpop.f32.mrb[1].mxu0  ;;  %7487 = vmatprep.subr.bf16.mxu1 %v10271_v1 }
  0xeb   : > { %v731_v3 = vmax.f32 %v8526_v62, %v8531_v63  ;;  %v7155_v4 = vpop.f32.mrb[1].mxu1  ;;  %v8537_v5 = vpop.f32.mrb[2].mxu0  ;;  %7432 = vmatpush3.bf16.msra.mxu0 %v8275_v6 }
  0xec   : > { %v8541_v8 = vpop.f32.mrb[2].mxu1  ;;  %v7100_v9 = vpop.f32.mrb[3].mxu0  ;;  %7488 = vmatpush3.bf16.msra.mxu1 %v8275_v6  ;;  %7541 = vmatprep.subr.bf16.mxu0 %v10271_v1  ;;  %v8068_v4 = vld [vmem:[%s8287_s22 + $0x1c0] sm:$0xff]  }
  0xed   : > { %v732_v10 = vmax.f32 %v8537_v5, %v8541_v8  ;;  %v7156_v11 = vpop.f32.mrb[3].mxu1  ;;  %7597 = vmatprep.subr.bf16.mxu1 %v10271_v1 }
  0xee   : > { %7326 = vmatmul.mubr.msk.bf16.gmra.mrb[108].mxu0 %vm284_vm3, %v8058_v2 }
  0xef   : > { %7382 = vmatmul.mubr.msk.bf16.gmra.mrb[108].mxu1 %vm284_vm3, %v8059_v7  ;;  %7329 = vmatprep.mubr.msk.bf16.mxu0 %vm8228_vm2, %v10271_v1 }
  0xf0   : > { %7385 = vmatprep.mubr.msk.bf16.mxu1 %vm8228_vm2, %v10271_v1 }
  0xf1   : > { %v8554_v12 = vpop.f32.mrb[4].mxu0 }
  0xf2   : > { %v8556_v13 = vpop.f32.mrb[4].mxu1  ;;  %v7103_v14 = vpop.f32.mrb[5].mxu0 }
  0xf3   : > { %v7159_v17 = vpop.f32.mrb[5].mxu1  ;;  %v8561_v18 = vpop.f32.mrb[6].mxu0  ;;  %v8069_v14 = vld [vmem:[%s8287_s22 + $0x224] sm:$0xff]  }
  0xf4   : > { %v8564_v20 = vpop.f32.mrb[6].mxu1  ;;  %v7104_v21 = vpop.f32.mrb[7].mxu0 }
  0xf5   : > { %v7160_v23 = vpop.f32.mrb[7].mxu1 }
  0xf6   : > { %7330 = vmatmul.mubr.msk.bf16.gmra.mrb[112].mxu0 %vm284_vm3, %v8060_v15 }
  0xf7   : > { %7386 = vmatmul.mubr.msk.bf16.gmra.mrb[112].mxu1 %vm284_vm3, %v8061_v19  ;;  %7333 = vmatprep.mubr.msk.bf16.mxu0 %vm8228_vm2, %v10271_v1 }
  0xf8   : > { %7389 = vmatprep.mubr.msk.bf16.mxu1 %vm8228_vm2, %v10271_v1 }
  0xf9   : > { %v8574_v24 = vpop.f32.mrb[8].mxu0 }
  0xfa   : > { %v8576_v25 = vpop.f32.mrb[8].mxu1  ;;  %v7107_v26 = vpop.f32.mrb[9].mxu0 }
  0xfb   : > { %v7163_v29 = vpop.f32.mrb[9].mxu1  ;;  %v8581_v30 = vpop.f32.mrb[10].mxu0 }
  0xfc   : > { %v8584_v32 = vpop.f32.mrb[10].mxu1  ;;  %v7108_v33 = vpop.f32.mrb[11].mxu0  ;;  %v8070_v29 = vld [vmem:[%s8287_s22 + $0x1c8] sm:$0xff]  }
  0xfd   : > { %v7164_v35 = vpop.f32.mrb[11].mxu1 }
  0xfe   : > { %7334 = vmatmul.mubr.msk.bf16.gmra.mrb[116].mxu0 %vm284_vm3, %v8062_v27 }
  0xff   : > { %7390 = vmatmul.mubr.msk.bf16.gmra.mrb[116].mxu1 %vm284_vm3, %v8063_v31  ;;  %7337 = vmatprep.mubr.msk.bf16.mxu0 %vm8228_vm2, %v10271_v1 }
 0x100   : > { %7393 = vmatprep.mubr.msk.bf16.mxu1 %vm8228_vm2, %v10271_v1 }
 0x101   : > { %v8594_v36 = vpop.f32.mrb[12].mxu0 }
 0x102   : > { %v8596_v37 = vpop.f32.mrb[12].mxu1  ;;  %v7111_v38 = vpop.f32.mrb[13].mxu0 }
 0x103   : > { %v7167_v41 = vpop.f32.mrb[13].mxu1  ;;  %v8601_v42 = vpop.f32.mrb[14].mxu0  ;;  %v8071_v38 = vld [vmem:[%s8287_s22 + $0x22c] sm:$0xff]  }
 0x104   : > { %v8604_v44 = vpop.f32.mrb[14].mxu1  ;;  %v7112_v45 = vpop.f32.mrb[15].mxu0 }
 0x105   : > { %v7168_v47 = vpop.f32.mrb[15].mxu1 }
 0x106   : > { %7338 = vmatmul.mubr.msk.bf16.gmra.mrb[120].mxu0 %vm284_vm3, %v8064_v39 }
 0x107   : > { %7394 = vmatmul.mubr.msk.bf16.gmra.mrb[120].mxu1 %vm284_vm3, %v8065_v43  ;;  %7341 = vmatprep.mubr.msk.bf16.mxu0 %vm8228_vm2, %v10271_v1 }
 0x108   : > { %7397 = vmatprep.mubr.msk.bf16.mxu1 %vm8228_vm2, %v10271_v1 }
 0x109   : > { %v8614_v48 = vpop.f32.mrb[16].mxu0 }
 0x10a   : > { %v8616_v49 = vpop.f32.mrb[16].mxu1  ;;  %v7115_v50 = vpop.f32.mrb[17].mxu0 }
 0x10b   : > { %v7171_v53 = vpop.f32.mrb[17].mxu1  ;;  %v8621_v54 = vpop.f32.mrb[18].mxu0 }
 0x10c   : > { %v8624_v56 = vpop.f32.mrb[18].mxu1  ;;  %v7116_v57 = vpop.f32.mrb[19].mxu0  ;;  %v8072_v53 = vld [vmem:[%s8287_s22 + $0x1d0] sm:$0xff]  }
 0x10d   : > { %v7172_v59 = vpop.f32.mrb[19].mxu1 }
 0x10e   : > { %7342 = vmatmul.mubr.msk.bf16.gmra.mrb[124].mxu0 %vm284_vm3, %v8066_v51 }
 0x10f   : > { %7398 = vmatmul.mubr.msk.bf16.gmra.mrb[124].mxu1 %vm284_vm3, %v8067_v55  ;;  %7345 = vmatprep.mubr.msk.bf16.mxu0 %vm8228_vm2, %v10271_v1 }
 0x110   : > { %7401 = vmatprep.mubr.msk.bf16.mxu1 %vm8228_vm2, %v10271_v1 }
 0x111   : > { %v8634_v60 = vpop.f32.mrb[20].mxu0 }
 0x112   : > { %v8636_v0 = vpop.f32.mrb[20].mxu1  ;;  %v7119_v2 = vpop.f32.mrb[21].mxu0 }
 0x113   : > { %v7175_v9 = vpop.f32.mrb[21].mxu1  ;;  %v8641_v11 = vpop.f32.mrb[22].mxu0  ;;  %v8073_v2 = vld [vmem:[%s8287_s22 + $0x234] sm:$0xff]  }
 0x114   : > { %v8644_v15 = vpop.f32.mrb[22].mxu1  ;;  %v7120_v17 = vpop.f32.mrb[23].mxu0 }
 0x115   : > { %v7176_v21 = vpop.f32.mrb[23].mxu1 }
 0x116   : > { %7346 = vmatmul.mubr.msk.bf16.gmra.mrb[128].mxu0 %vm284_vm3, %v8068_v4 }
 0x117   : > { %7402 = vmatmul.mubr.msk.bf16.gmra.mrb[128].mxu1 %vm284_vm3, %v8069_v14  ;;  %7349 = vmatprep.mubr.msk.bf16.mxu0 %vm8228_vm2, %v10271_v1 }
 0x118   : > { %7405 = vmatprep.mubr.msk.bf16.mxu1 %vm8228_vm2, %v10271_v1 }
 0x119   : > { %v8654_v23 = vpop.f32.mrb[24].mxu0 }
 0x11a   : > { %v8656_v26 = vpop.f32.mrb[24].mxu1  ;;  %v7123_v27 = vpop.f32.mrb[25].mxu0 }
 0x11b   : > { %v7179_v33 = vpop.f32.mrb[25].mxu1  ;;  %v8661_v35 = vpop.f32.mrb[26].mxu0 }
 0x11c   : > { %v8664_v39 = vpop.f32.mrb[26].mxu1  ;;  %v7124_v41 = vpop.f32.mrb[27].mxu0  ;;  %v8074_v33 = vld [vmem:[%s8287_s22 + $0x1d8] sm:$0xff]  }
 0x11d   : > { %v7180_v45 = vpop.f32.mrb[27].mxu1 }
 0x11e   : > { %7350 = vmatmul.mubr.msk.bf16.gmra.mrb[132].mxu0 %vm284_vm3, %v8070_v29 }
 0x11f   : > { %7406 = vmatmul.mubr.msk.bf16.gmra.mrb[132].mxu1 %vm284_vm3, %v8071_v38  ;;  %7353 = vmatprep.mubr.msk.bf16.mxu0 %vm8228_vm2, %v10271_v1 }
 0x120   : > { %7409 = vmatprep.mubr.msk.bf16.mxu1 %vm8228_vm2, %v10271_v1 }
 0x121   : > { %v8674_v47 = vpop.f32.mrb[28].mxu0 }
 0x122   : > { %v8676_v50 = vpop.f32.mrb[28].mxu1  ;;  %v7127_v51 = vpop.f32.mrb[29].mxu0 }
 0x123   : > { %v7183_v57 = vpop.f32.mrb[29].mxu1  ;;  %v8681_v59 = vpop.f32.mrb[30].mxu0  ;;  %v8075_v51 = vld [vmem:[%s8287_s22 + $0x23c] sm:$0xff]  }
 0x124   : > { %v8684_v4 = vpop.f32.mrb[30].mxu1  ;;  %v7128_v9 = vpop.f32.mrb[31].mxu0 }
 0x125   : > { %v7184_v17 = vpop.f32.mrb[31].mxu1 }
 0x126   : > { %7354 = vmatmul.mubr.msk.bf16.gmra.mrb[136].mxu0 %vm284_vm3, %v8072_v53 }
 0x127   : > { %7410 = vmatmul.mubr.msk.bf16.gmra.mrb[136].mxu1 %vm284_vm3, %v8073_v2  ;;  %7357 = vmatprep.mubr.msk.bf16.mxu0 %vm8228_vm2, %v10271_v1 }
 0x128   : > { %7413 = vmatprep.mubr.msk.bf16.mxu1 %vm8228_vm2, %v10271_v1 }
 0x129   : > { %v8694_v21 = vpop.f32.mrb[32].mxu0 }
 0x12a   : > { %v8696_v27 = vpop.f32.mrb[32].mxu1  ;;  %v7131_v29 = vpop.f32.mrb[33].mxu0 }
 0x12b   : > { %v7187_v41 = vpop.f32.mrb[33].mxu1  ;;  %v8701_v45 = vpop.f32.mrb[34].mxu0 }
 0x12c   : > { %v8704_v53 = vpop.f32.mrb[34].mxu1  ;;  %v7132_v57 = vpop.f32.mrb[35].mxu0 }
 0x12d   : > { %v7188_v9 = vpop.f32.mrb[35].mxu1  ;;  %v8076_v57 = vld [vmem:[%s8287_s22 + $0x1e0] sm:$0xff]  }
 0x12e   : > { %7358 = vmatmul.mubr.msk.bf16.gmra.mrb[140].mxu0 %vm284_vm3, %v8074_v33 }
 0x12f   : > { %7414 = vmatmul.mubr.msk.bf16.gmra.mrb[140].mxu1 %vm284_vm3, %v8075_v51  ;;  %7361 = vmatprep.mubr.msk.bf16.mxu0 %vm8228_vm2, %v10271_v1  ;;  %v8077_v51 = vld [vmem:[%s8287_s22 + $0x244] sm:$0xff]  }
 0x130   : > { %7417 = vmatprep.mubr.msk.bf16.mxu1 %vm8228_vm2, %v10271_v1 }
 0x131   : > { %v8714_v17 = vpop.f32.mrb[36].mxu0 }
 0x132   : > { %v8716_v29 = vpop.f32.mrb[36].mxu1  ;;  %v7135_v41 = vpop.f32.mrb[37].mxu0 }
 0x133   : > { %v7191_v2 = vpop.f32.mrb[37].mxu1  ;;  %v8721_v33 = vpop.f32.mrb[38].mxu0 }
 0x134   : > { %v8724_v38 = vpop.f32.mrb[38].mxu1  ;;  %v7136_v14 = vpop.f32.mrb[39].mxu0 }
 0x135   : > { %v7192_v43 = vpop.f32.mrb[39].mxu1  ;;  %v8078_v14 = vld [vmem:[%s8287_s22 + $0x1e8] sm:$0xff]  }
 0x136   : > { %7362 = vmatmul.mubr.msk.bf16.gmra.mrb[144].mxu0 %vm284_vm3, %v8076_v57 }
 0x137   : > { %7418 = vmatmul.mubr.msk.bf16.gmra.mrb[144].mxu1 %vm284_vm3, %v8077_v51  ;;  %7365 = vmatprep.mubr.msk.bf16.mxu0 %vm8228_vm2, %v10271_v1  ;;  %v8079_v51 = vld [vmem:[%s8287_s22 + $0x24c] sm:$0xff]  }
 0x138   : > { %7421 = vmatprep.mubr.msk.bf16.mxu1 %vm8228_vm2, %v10271_v1 }
 0x139   : > { %v8734_v2 = vpop.f32.mrb[40].mxu0 }
 0x13a   : > { %v8736_v41 = vpop.f32.mrb[40].mxu1  ;;  %v7139_v9 = vpop.f32.mrb[41].mxu0 }
 0x13b   : > { %v7195_v55 = vpop.f32.mrb[41].mxu1  ;;  %v8741_v57 = vpop.f32.mrb[42].mxu0 }
 0x13c   : > { %v8744_v31 = vpop.f32.mrb[42].mxu1  ;;  %v7140_v19 = vpop.f32.mrb[43].mxu0 }
 0x13d   : > { %v7196_v58 = vpop.f32.mrb[43].mxu1  ;;  %v8080_v19 = vld [vmem:[%s8287_s22 + $0x1f0] ss:$0 sps:$4 sm:$0x33]  }
 0x13e   : > { %7366 = vmatmul.mubr.msk.bf16.gmra.mrb[148].mxu0 %vm284_vm3, %v8078_v14 }
 0x13f   : > { %7422 = vmatmul.mubr.msk.bf16.gmra.mrb[148].mxu1 %vm284_vm3, %v8079_v51  ;;  %7369 = vmatprep.mubr.msk.bf16.mxu0 %vm8228_vm2, %v10271_v1  ;;  %v8081_v51 = vld [vmem:[%s8287_s22 + $0x254] ss:$0 sps:$4 sm:$0x33]  }
 0x140   : > { %7425 = vmatprep.mubr.msk.bf16.mxu1 %vm8228_vm2, %v10271_v1 }
 0x141   : > { %v8754_v55 = vpop.f32.mrb[44].mxu0 }
 0x142   : > { %v8756_v9 = vpop.f32.mrb[44].mxu1  ;;  %v7143_v43 = vpop.f32.mrb[45].mxu0 }
 0x143   : > { %v7199_v7 = vpop.f32.mrb[45].mxu1  ;;  %v8761_v14 = vpop.f32.mrb[46].mxu0 }
 0x144   : > { %v8764_v52 = vpop.f32.mrb[46].mxu1  ;;  %v7144_v46 = vpop.f32.mrb[47].mxu0 }
 0x145   : > { %v7200_v34 = vpop.f32.mrb[47].mxu1  ;;  %v8082_v46 = vld [vmem:[%s8287_s22 + $0x258] sm:$0xff]  }
 0x146   : > { %7370 = vmatmul.mubr.msk.bf16.gmra.mrb[152].mxu0 %vm284_vm3, %v8080_v19  ;;  %v8083_v19 = vld [vmem:[%s8287_s22 + $0x2bc] sm:$0xff]  }
 0x147   : > { %7426 = vmatmul.mubr.msk.bf16.gmra.mrb[152].mxu1 %vm284_vm3, %v8081_v51  ;;  %7433 = vmatprep.mubr.msk.bf16.mxu0 %vm8228_vm2, %v10271_v1 }
 0x148   : > { %7489 = vmatprep.mubr.msk.bf16.mxu1 %vm8228_vm2, %v10271_v1 }
 0x149   : > { %v8774_v7 = vpop.f32.mrb[48].mxu0 }
 0x14a   : > { %v8776_v43 = vpop.f32.mrb[48].mxu1  ;;  %v7147_v58 = vpop.f32.mrb[49].mxu0 }
 0x14b   : > { %v7203_v34 = vpop.f32.mrb[49].mxu1  ;;  %v464_v28 = vpop.f32.mrb[50].mxu0 }
 0x14c   : > { %v728_v51 = vpop.f32.mrb[50].mxu1  ;;  %v7148_v22 = vpop.f32.mrb[51].mxu0 }
 0x14d   : > { %v7204_v16 = vpop.f32.mrb[51].mxu1  ;;  %v8085_v51 = vld [vmem:[%s8287_s22 + $0x2c4] sm:$0xff]  }
 0x14e   : > { %7434 = vmatmul.mubr.msk.bf16.vlgmr.msra.gmra.mrb[156].mxu0 %vm284_vm3, %v8082_v46  ;;  %v8084_v46 = vld [vmem:[%s8287_s22 + $0x260] sm:$0xff]  }
 0x14f   : > { %7490 = vmatmul.mubr.msk.bf16.vlgmr.msra.gmra.mrb[156].mxu1 %vm284_vm3, %v8083_v19  ;;  %7542 = vmatpush3.bf16.msra.mxu0 %v8520_v61 }
 0x150   : > { %7598 = vmatpush3.bf16.msra.mxu1 %v8520_v61  ;;  %7437 = vmatprep.mubr.msk.bf16.mxu0 %vm8228_vm2, %v10271_v1  ;;  %v8799_v61 = vld [vmem:[%s10267_s2] ss:$0 sm:$0xff] }
 0x151   : > { %v918_v58 = vpop.f32.mrb[52].mxu0  ;;  %7493 = vmatprep.mubr.msk.bf16.mxu1 %vm8228_vm2, %v10271_v1  ;;  %7543 = vmatprep.subr.bf16.mxu0 %v10271_v1 }
 0x152   : > { %v1020_v16 = vmax.f32 %v731_v3, %v918_v58  ;;  %v1207_v22 = vpop.f32.mrb[52].mxu1  ;;  %v7211_v28 = vpop.f32.mrb[53].mxu0  ;;  %7599 = vmatprep.subr.bf16.mxu1 %v10271_v1 }
 0x153   : > { %v7267_v34 = vpop.f32.mrb[53].mxu1  ;;  %v921_v19 = vpop.f32.mrb[54].mxu0  ;;  %7544 = vmatpush3.bf16.msra.mxu0 %v8275_v6 }
 0x154   : > { %v1309_v40 = vmax.f32 %v1020_v16, %v1207_v22  ;;  %v1021_v62 = vmax.f32 %v732_v10, %v921_v19  ;;  %v1210_v63 = vpop.f32.mrb[54].mxu1  ;;  %v7212_v3 = vpop.f32.mrb[55].mxu0  ;;  %7600 = vmatpush3.bf16.msra.mxu1 %v8275_v6  ;;  %7653 = vmatprep.subr.bf16.mxu0 %v10271_v1 }
 0x155   : > { %v7268_v58 = vpop.f32.mrb[55].mxu1  ;;  %7709 = vmatprep.subr.bf16.mxu1 %v10271_v1  ;;  %v8087_v3 = vld [vmem:[%s8287_s22 + $0x2cc] sm:$0xff]  }
 0x156   : > { %v1340_v28 = vadd.f32 %v8799_v61, %v1309_v40  ;;  %v1310_v34 = vmax.f32 %v1021_v62, %v1210_v63  ;;  %7438 = vmatmul.mubr.msk.bf16.gmra.mrb[160].mxu0 %vm284_vm3, %v8084_v46  ;;  %v10280_v40 = vmax.f32 %v8554_v12, %v8556_v13  ;;  %v8086_v62 = vld [vmem:[%s8287_s22 + $0x268] sm:$0xff]  }
 0x157   : > { %7494 = vmatmul.mubr.msk.bf16.gmra.mrb[160].mxu1 %vm284_vm3, %v8085_v51  ;;  %7441 = vmatprep.mubr.msk.bf16.mxu0 %vm8228_vm2, %v10271_v1 }
 0x158   : > { %v1341_v5 = vadd.f32 %v8799_v61, %v1310_v34  ;;  %7497 = vmatprep.mubr.msk.bf16.mxu1 %vm8228_vm2, %v10271_v1  ;;  %v1365_v10 = vmax.f32 %v1340_v28, 0.0  ;;  %v10281_v28 = vmax.f32 %v8561_v18, %v8564_v20 }
 0x159   : > { %v926_v8 = vpop.f32.mrb[56].mxu0 }
 0x15a   : > { %v1366_v16 = vmax.f32 %v1341_v5, 0.0  ;;  %v1022_v22 = vmax.f32 %v10280_v40, %v926_v8  ;;  %v1215_v46 = vpop.f32.mrb[56].mxu1  ;;  %v7215_v19 = vpop.f32.mrb[57].mxu0 }
 0x15b   : > { %v7271_v51 = vpop.f32.mrb[57].mxu1  ;;  %v929_v63 = vpop.f32.mrb[58].mxu0 }
 0x15c   : > { %v6581_v58 = vpack.c.bf16 %v1366_v16, %v1365_v10  ;;  %v1311_v34 = vmax.f32 %v1022_v22, %v1215_v46  ;;  %v1023_v5 = vmax.f32 %v10281_v28, %v929_v63  ;;  %v1218_v12 = vpop.f32.mrb[58].mxu1  ;;  %v7216_v13 = vpop.f32.mrb[59].mxu0  ;;  %v10282_v22 = vmax.f32 %v8574_v24, %v8576_v25  ;;  %v8088_v63 = vld [vmem:[%s8287_s22 + $0x270] sm:$0xff]  }
 0x15d   : > { %v7272_v8 = vpop.f32.mrb[59].mxu1 }
 0x15e   : > { %6582 = vst [vmem:[%s8825_s30] sm:$0xff] %v6581_v58   ;;  %v1342_v40 = vadd.f32 %v8799_v61, %v1311_v34  ;;  %v1312_v19 = vmax.f32 %v1023_v5, %v1218_v12  ;;  %7442 = vmatmul.mubr.msk.bf16.gmra.mrb[164].mxu0 %vm284_vm3, %v8086_v62  ;;  %v8089_v34 = vld [vmem:[%s8287_s22 + $0x2d4] sm:$0xff]   ;;  %v10283_v12 = vmax.f32 %v8581_v30, %v8584_v32 }
 0x15f   : > { %7498 = vmatmul.mubr.msk.bf16.gmra.mrb[164].mxu1 %vm284_vm3, %v8087_v3  ;;  %7445 = vmatprep.mubr.msk.bf16.mxu0 %vm8228_vm2, %v10271_v1 }
 0x160   : > { %v1343_v10 = vadd.f32 %v8799_v61, %v1312_v19  ;;  %7501 = vmatprep.mubr.msk.bf16.mxu1 %vm8228_vm2, %v10271_v1  ;;  %v1367_v20 = vmax.f32 %v1342_v40, 0.0 }
 0x161   : > { %v934_v18 = vpop.f32.mrb[60].mxu0 }
 0x162   : > { %v1368_v16 = vmax.f32 %v1343_v10, 0.0  ;;  %v1024_v46 = vmax.f32 %v10282_v22, %v934_v18  ;;  %v1223_v51 = vpop.f32.mrb[60].mxu1  ;;  %v7219_v62 = vpop.f32.mrb[61].mxu0 }
 0x163   : > { %v7275_v3 = vpop.f32.mrb[61].mxu1  ;;  %v937_v58 = vpop.f32.mrb[62].mxu0 }
 0x164   : > { %v6586_v28 = vpack.c.bf16 %v1368_v16, %v1367_v20  ;;  %v1313_v5 = vmax.f32 %v1024_v46, %v1223_v51  ;;  %v1025_v13 = vmax.f32 %v10283_v12, %v937_v58  ;;  %v1226_v8 = vpop.f32.mrb[62].mxu1  ;;  %v7220_v19 = vpop.f32.mrb[63].mxu0  ;;  %v10284_v20 = vmax.f32 %v8594_v36, %v8596_v37  ;;  %v8090_v51 = vld [vmem:[%s8287_s22 + $0x278] sm:$0xff]  }
 0x165   : > { %v7276_v40 = vpop.f32.mrb[63].mxu1  ;;  %v8091_v3 = vld [vmem:[%s8287_s22 + $0x2dc] sm:$0xff]  }
 0x166   : > { %6808 = vst [vmem:[%s8825_s30 + $0x8] sm:$0xff] %v6586_v28   ;;  %v1344_v24 = vadd.f32 %v8799_v61, %v1313_v5  ;;  %v1314_v25 = vmax.f32 %v1025_v13, %v1226_v8  ;;  %7446 = vmatmul.mubr.msk.bf16.gmra.mrb[168].mxu0 %vm284_vm3, %v8088_v63  ;;  %v10285_v28 = vmax.f32 %v8601_v42, %v8604_v44 }
 0x167   : > { %7502 = vmatmul.mubr.msk.bf16.gmra.mrb[168].mxu1 %vm284_vm3, %v8089_v34  ;;  %7449 = vmatprep.mubr.msk.bf16.mxu0 %vm8228_vm2, %v10271_v1 }
 0x168   : > { %v1345_v10 = vadd.f32 %v8799_v61, %v1314_v25  ;;  %7505 = vmatprep.mubr.msk.bf16.mxu1 %vm8228_vm2, %v10271_v1  ;;  %v1369_v32 = vmax.f32 %v1344_v24, 0.0  ;;  %v10286_v24 = vmax.f32 %v8614_v48, %v8616_v49 }
 0x169   : > { %v942_v30 = vpop.f32.mrb[64].mxu0 }
 0x16a   : > { %v1370_v18 = vmax.f32 %v1345_v10, 0.0  ;;  %v1026_v16 = vmax.f32 %v10284_v20, %v942_v30  ;;  %v1231_v22 = vpop.f32.mrb[64].mxu1  ;;  %v7223_v46 = vpop.f32.mrb[65].mxu0 }
 0x16b   : > { %v7279_v62 = vpop.f32.mrb[65].mxu1  ;;  %v945_v63 = vpop.f32.mrb[66].mxu0 }
 0x16c   : > { %v6591_v58 = vpack.c.bf16 %v1370_v18, %v1369_v32  ;;  %v1315_v34 = vmax.f32 %v1026_v16, %v1231_v22  ;;  %v1027_v5 = vmax.f32 %v10285_v28, %v945_v63  ;;  %v1234_v12 = vpop.f32.mrb[66].mxu1  ;;  %v7224_v13 = vpop.f32.mrb[67].mxu0  ;;  %v8092_v32 = vld [vmem:[%s8287_s22 + $0x280] sm:$0xff]  }
 0x16d   : > { %v7280_v8 = vpop.f32.mrb[67].mxu1  ;;  %v8093_v16 = vld [vmem:[%s8287_s22 + $0x2e4] sm:$0xff]  }
 0x16e   : > { %6809 = vst [vmem:[%s8825_s30 + $0x10] sm:$0xff] %v6591_v58   ;;  %v1346_v36 = vadd.f32 %v8799_v61, %v1315_v34  ;;  %v1316_v37 = vmax.f32 %v1027_v5, %v1234_v12  ;;  %7450 = vmatmul.mubr.msk.bf16.gmra.mrb[172].mxu0 %vm284_vm3, %v8090_v51  ;;  %v10287_v51 = vmax.f32 %v8621_v54, %v8624_v56 }
 0x16f   : > { %7506 = vmatmul.mubr.msk.bf16.gmra.mrb[172].mxu1 %vm284_vm3, %v8091_v3  ;;  %7453 = vmatprep.mubr.msk.bf16.mxu0 %vm8228_vm2, %v10271_v1  ;;  %v10288_v5 = vmax.f32 %v8634_v60, %v8636_v0 }
 0x170   : > { %v1347_v19 = vadd.f32 %v8799_v61, %v1316_v37  ;;  %7509 = vmatprep.mubr.msk.bf16.mxu1 %vm8228_vm2, %v10271_v1  ;;  %v1371_v44 = vmax.f32 %v1346_v36, 0.0  ;;  %v8094_v36 = vld [vmem:[%s8287_s22 + $0x288] sm:$0xff]  }
 0x171   : > { %v950_v42 = vpop.f32.mrb[68].mxu0 }
 0x172   : > { %v1372_v40 = vmax.f32 %v1347_v19, 0.0  ;;  %v1028_v25 = vmax.f32 %v10286_v24, %v950_v42  ;;  %v1239_v10 = vpop.f32.mrb[68].mxu1  ;;  %v7227_v30 = vpop.f32.mrb[69].mxu0  ;;  %v8095_v42 = vld [vmem:[%s8287_s22 + $0x2ec] sm:$0xff]   ;;  %v10289_v24 = vmax.f32 %v8641_v11, %v8644_v15 }
 0x173   : > { %v7283_v18 = vpop.f32.mrb[69].mxu1  ;;  %v953_v20 = vpop.f32.mrb[70].mxu0 }
 0x174   : > { %v6596_v22 = vpack.c.bf16 %v1372_v40, %v1371_v44  ;;  %v1317_v46 = vmax.f32 %v1028_v25, %v1239_v10  ;;  %v1029_v62 = vmax.f32 %v10287_v51, %v953_v20  ;;  %v1242_v63 = vpop.f32.mrb[70].mxu1  ;;  %v7228_v3 = vpop.f32.mrb[71].mxu0 }
 0x175   : > { %v7284_v58 = vpop.f32.mrb[71].mxu1 }
 0x176   : > { %6810 = vst [vmem:[%s8825_s30 + $0x18] sm:$0xff] %v6596_v22   ;;  %v1348_v48 = vadd.f32 %v8799_v61, %v1317_v46  ;;  %v1318_v49 = vmax.f32 %v1029_v62, %v1242_v63  ;;  %7454 = vmatmul.mubr.msk.bf16.gmra.mrb[176].mxu0 %vm284_vm3, %v8092_v32  ;;  %v8096_v62 = vld [vmem:[%s8287_s22 + $0x290] sm:$0xff]  }
 0x177   : > { %7510 = vmatmul.mubr.msk.bf16.gmra.mrb[176].mxu1 %vm284_vm3, %v8093_v16  ;;  %7457 = vmatprep.mubr.msk.bf16.mxu0 %vm8228_vm2, %v10271_v1  ;;  %v10290_v16 = vmax.f32 %v8654_v23, %v8656_v26  ;;  %v8097_v58 = vld [vmem:[%s8287_s22 + $0x2f4] sm:$0xff]  }
 0x178   : > { %v1349_v34 = vadd.f32 %v8799_v61, %v1318_v49  ;;  %7513 = vmatprep.mubr.msk.bf16.mxu1 %vm8228_vm2, %v10271_v1  ;;  %v1373_v56 = vmax.f32 %v1348_v48, 0.0 }
 0x179   : > { %v958_v54 = vpop.f32.mrb[72].mxu0 }
 0x17a   : > { %v1374_v28 = vmax.f32 %v1349_v34, 0.0  ;;  %v1030_v12 = vmax.f32 %v10288_v5, %v958_v54  ;;  %v1247_v13 = vpop.f32.mrb[72].mxu1  ;;  %v7231_v8 = vpop.f32.mrb[73].mxu0  ;;  %v10291_v34 = vmax.f32 %v8661_v35, %v8664_v39 }
 0x17b   : > { %v7287_v37 = vpop.f32.mrb[73].mxu1  ;;  %v961_v19 = vpop.f32.mrb[74].mxu0  ;;  %v10292_v8 = vmax.f32 %v8674_v47, %v8676_v50 }
 0x17c   : > { %v6601_v44 = vpack.c.bf16 %v1374_v28, %v1373_v56  ;;  %v1319_v40 = vmax.f32 %v1030_v12, %v1247_v13  ;;  %v1031_v25 = vmax.f32 %v10289_v24, %v961_v19  ;;  %v1250_v10 = vpop.f32.mrb[74].mxu1  ;;  %v7232_v30 = vpop.f32.mrb[75].mxu0  ;;  %v8099_v24 = vld [vmem:[%s8287_s22 + $0x2fc] sm:$0xff]  }
 0x17d   : > { %v7288_v32 = vpop.f32.mrb[75].mxu1  ;;  %v10293_v30 = vmax.f32 %v8681_v59, %v8684_v4 }
 0x17e   : > { %6811 = vst [vmem:[%s8825_s30 + $0x20] sm:$0xff] %v6601_v44   ;;  %v1350_v60 = vadd.f32 %v8799_v61, %v1319_v40  ;;  %v1320_v0 = vmax.f32 %v1031_v25, %v1250_v10  ;;  %7458 = vmatmul.mubr.msk.bf16.gmra.mrb[180].mxu0 %vm284_vm3, %v8094_v36 }
 0x17f   : > { %7514 = vmatmul.mubr.msk.bf16.gmra.mrb[180].mxu1 %vm284_vm3, %v8095_v42  ;;  %7461 = vmatprep.mubr.msk.bf16.mxu0 %vm8228_vm2, %v10271_v1  ;;  %v8098_v42 = vld [vmem:[%s8287_s22 + $0x298] sm:$0xff]  }
 0x180   : > { %v1351_v18 = vadd.f32 %v8799_v61, %v1320_v0  ;;  %7517 = vmatprep.mubr.msk.bf16.mxu1 %vm8228_vm2, %v10271_v1  ;;  %v1375_v15 = vmax.f32 %v1350_v60, 0.0 }
 0x181   : > { %v966_v11 = vpop.f32.mrb[76].mxu0 }
 0x182   : > { %v1376_v20 = vmax.f32 %v1351_v18, 0.0  ;;  %v1032_v22 = vmax.f32 %v10290_v16, %v966_v11  ;;  %v1255_v46 = vpop.f32.mrb[76].mxu1  ;;  %v7235_v51 = vpop.f32.mrb[77].mxu0 }
 0x183   : > { %v7291_v63 = vpop.f32.mrb[77].mxu1  ;;  %v969_v3 = vpop.f32.mrb[78].mxu0  ;;  %v8100_v51 = vld [vmem:[%s8287_s22 + $0x2a0] sm:$0xff]  }
 0x184   : > { %v6606_v48 = vpack.c.bf16 %v1376_v20, %v1375_v15  ;;  %v1321_v49 = vmax.f32 %v1032_v22, %v1255_v46  ;;  %v1033_v54 = vmax.f32 %v10291_v34, %v969_v3  ;;  %v1258_v56 = vpop.f32.mrb[78].mxu1  ;;  %v7236_v28 = vpop.f32.mrb[79].mxu0  ;;  %v10294_v20 = vmax.f32 %v8694_v21, %v8696_v27  ;;  %v8101_v3 = vld [vmem:[%s8287_s22 + $0x304] sm:$0xff]  }
 0x185   : > { %v7292_v5 = vpop.f32.mrb[79].mxu1 }
 0x186   : > { %6812 = vst [vmem:[%s8825_s30 + $0x28] sm:$0xff] %v6606_v48   ;;  %v1352_v23 = vadd.f32 %v8799_v61, %v1321_v49  ;;  %v1322_v26 = vmax.f32 %v1033_v54, %v1258_v56  ;;  %7462 = vmatmul.mubr.msk.bf16.gmra.mrb[184].mxu0 %vm284_vm3, %v8096_v62  ;;  %v10295_v49 = vmax.f32 %v8701_v45, %v8704_v53 }
 0x187   : > { %7518 = vmatmul.mubr.msk.bf16.gmra.mrb[184].mxu1 %vm284_vm3, %v8097_v58  ;;  %7465 = vmatprep.mubr.msk.bf16.mxu0 %vm8228_vm2, %v10271_v1 }
 0x188   : > { %v1353_v12 = vadd.f32 %v8799_v61, %v1322_v26  ;;  %7521 = vmatprep.mubr.msk.bf16.mxu1 %vm8228_vm2, %v10271_v1  ;;  %v1377_v39 = vmax.f32 %v1352_v23, 0.0  ;;  %v10296_v26 = vmax.f32 %v8714_v17, %v8716_v29 }
 0x189   : > { %v974_v35 = vpop.f32.mrb[80].mxu0 }
 0x18a   : > { %v1378_v13 = vmax.f32 %v1353_v12, 0.0  ;;  %v1034_v36 = vmax.f32 %v10292_v8, %v974_v35  ;;  %v1263_v37 = vpop.f32.mrb[80].mxu1  ;;  %v7239_v19 = vpop.f32.mrb[81].mxu0 }
 0x18b   : > { %v7295_v44 = vpop.f32.mrb[81].mxu1  ;;  %v977_v40 = vpop.f32.mrb[82].mxu0 }
 0x18c   : > { %v6611_v25 = vpack.c.bf16 %v1378_v13, %v1377_v39  ;;  %v1323_v10 = vmax.f32 %v1034_v36, %v1263_v37  ;;  %v1035_v32 = vmax.f32 %v10293_v30, %v977_v40  ;;  %v1266_v60 = vpop.f32.mrb[82].mxu1  ;;  %v7240_v0 = vpop.f32.mrb[83].mxu0  ;;  %v8102_v13 = vld [vmem:[%s8287_s22 + $0x2a8] sm:$0xff]   ;;  %v10297_v44 = vmax.f32 %v8721_v33, %v8724_v38 }
 0x18d   : > { %v7296_v18 = vpop.f32.mrb[83].mxu1  ;;  %v8103_v37 = vld [vmem:[%s8287_s22 + $0x30c] sm:$0xff]  }
 0x18e   : > { %6813 = vst [vmem:[%s8825_s30 + $0x30] sm:$0xff] %v6611_v25   ;;  %v1354_v47 = vadd.f32 %v8799_v61, %v1323_v10  ;;  %v1324_v50 = vmax.f32 %v1035_v32, %v1266_v60  ;;  %7466 = vmatmul.mubr.msk.bf16.gmra.mrb[188].mxu0 %vm284_vm3, %v8098_v42  ;;  %v10298_v60 = vmax.f32 %v8734_v2, %v8736_v41 }
 0x18f   : > { %7522 = vmatmul.mubr.msk.bf16.gmra.mrb[188].mxu1 %vm284_vm3, %v8099_v24  ;;  %7469 = vmatprep.mubr.msk.bf16.mxu0 %vm8228_vm2, %v10271_v1 }
 0x190   : > { %v1355_v11 = vadd.f32 %v8799_v61, %v1324_v50  ;;  %7525 = vmatprep.mubr.msk.bf16.mxu1 %vm8228_vm2, %v10271_v1  ;;  %v1379_v4 = vmax.f32 %v1354_v47, 0.0  ;;  %v8104_v50 = vld [vmem:[%s8287_s22 + $0x2b0] sm:$0xff]  }
 0x191   : > { %v982_v59 = vpop.f32.mrb[84].mxu0 }
 0x192   : > { %v1380_v15 = vmax.f32 %v1355_v11, 0.0  ;;  %v1036_v16 = vmax.f32 %v10294_v20, %v982_v59  ;;  %v1271_v22 = vpop.f32.mrb[84].mxu1  ;;  %v7243_v46 = vpop.f32.mrb[85].mxu0 }
 0x193   : > { %v7299_v62 = vpop.f32.mrb[85].mxu1  ;;  %v985_v63 = vpop.f32.mrb[86].mxu0 }
 0x194   : > { %v6616_v58 = vpack.c.bf16 %v1380_v15, %v1379_v4  ;;  %v1325_v48 = vmax.f32 %v1036_v16, %v1271_v22  ;;  %v1037_v34 = vmax.f32 %v10295_v49, %v985_v63  ;;  %v1274_v54 = vpop.f32.mrb[86].mxu1  ;;  %v7244_v56 = vpop.f32.mrb[87].mxu0  ;;  %v8105_v4 = vld [vmem:[%s8287_s22 + $0x314] sm:$0xff]   ;;  %v10299_v16 = vmax.f32 %v8741_v57, %v8744_v31 }
 0x195   : > { %v7300_v28 = vpop.f32.mrb[87].mxu1  ;;  %v8106_v57 = vld [vmem:[%s8287_s22 + $0x2b8] ss:$0 sps:$4 sm:$0x33]  }
 0x196   : > { %6814 = vst [vmem:[%s8825_s30 + $0x38] sm:$0xff] %v6616_v58   ;;  %v1356_v21 = vadd.f32 %v8799_v61, %v1325_v48  ;;  %v1326_v27 = vmax.f32 %v1037_v34, %v1274_v54  ;;  %7470 = vmatmul.mubr.msk.bf16.gmra.mrb[192].mxu0 %vm284_vm3, %v8100_v51  ;;  %v10300_v48 = vmax.f32 %v8754_v55, %v8756_v9 }
 0x197   : > { %7526 = vmatmul.mubr.msk.bf16.gmra.mrb[192].mxu1 %vm284_vm3, %v8101_v3  ;;  %7473 = vmatprep.mubr.msk.bf16.mxu0 %vm8228_vm2, %v10271_v1 }
 0x198   : > { %v1357_v5 = vadd.f32 %v8799_v61, %v1326_v27  ;;  %7529 = vmatprep.mubr.msk.bf16.mxu1 %vm8228_vm2, %v10271_v1  ;;  %v1381_v53 = vmax.f32 %v1356_v21, 0.0  ;;  %v8107_v21 = vld [vmem:[%s8287_s22 + $0x31c] ss:$0 sps:$4 sm:$0x33]  }
 0x199   : > { %v990_v45 = vpop.f32.mrb[88].mxu0 }
 0x19a   : > { %v1382_v23 = vmax.f32 %v1357_v5, 0.0  ;;  %v1038_v12 = vmax.f32 %v10296_v26, %v990_v45  ;;  %v1279_v35 = vpop.f32.mrb[88].mxu1  ;;  %v7247_v39 = vpop.f32.mrb[89].mxu0  ;;  %v10301_v45 = vmax.f32 %v8761_v14, %v8764_v52 }
 0x19b   : > { %v7303_v8 = vpop.f32.mrb[89].mxu1  ;;  %v993_v36 = vpop.f32.mrb[90].mxu0 }
 0x19c   : > { %v6621_v19 = vpack.c.bf16 %v1382_v23, %v1381_v53  ;;  %v1327_v42 = vmax.f32 %v1038_v12, %v1279_v35  ;;  %v1039_v40 = vmax.f32 %v10297_v44, %v993_v36  ;;  %v1282_v24 = vpop.f32.mrb[90].mxu1  ;;  %v7248_v25 = vpop.f32.mrb[91].mxu0 }
 0x19d   : > { %v7304_v10 = vpop.f32.mrb[91].mxu1 }
 0x19e   : > { %6815 = vst [vmem:[%s8825_s30 + $0x40] sm:$0xff] %v6621_v19   ;;  %v1358_v17 = vadd.f32 %v8799_v61, %v1327_v42  ;;  %v1328_v29 = vmax.f32 %v1039_v40, %v1282_v24  ;;  %7474 = vmatmul.mubr.msk.bf16.gmra.mrb[196].mxu0 %vm284_vm3, %v8102_v13  ;;  %v10302_v13 = vmax.f32 %v8774_v7, %v8776_v43  ;;  %v8108_v19 = vld [vmem:[%s8287_s22 + $0x320] sm:$0xff]  }
 0x19f   : > { %7530 = vmatmul.mubr.msk.bf16.gmra.mrb[196].mxu1 %vm284_vm3, %v8103_v37  ;;  %7477 = vmatprep.mubr.msk.bf16.mxu0 %vm8228_vm2, %v10271_v1  ;;  %v8109_v40 = vld [vmem:[%s8287_s22 + $0x384] sm:$0xff]  }
 0x1a0   : > { %v1359_v30 = vadd.f32 %v8799_v61, %v1328_v29  ;;  %7533 = vmatprep.mubr.msk.bf16.mxu1 %vm8228_vm2, %v10271_v1  ;;  %v1383_v33 = vmax.f32 %v1358_v17, 0.0  ;;  %v9022_v7 = vld [vmem:[%s10266_s1] sm:$0xff]  }
 0x1a1   : > { %v998_v38 = vpop.f32.mrb[92].mxu0 }
 0x1a2   : > { %v1384_v32 = vmax.f32 %v1359_v30, 0.0  ;;  %v1040_v0 = vmax.f32 %v10298_v60, %v998_v38  ;;  %v1287_v18 = vpop.f32.mrb[92].mxu1  ;;  %v7251_v47 = vpop.f32.mrb[93].mxu0  ;;  %v8110_v60 = vld [vmem:[%s8287_s22 + $0x328] sm:$0xff]  }
 0x1a3   : > { %v7307_v11 = vpop.f32.mrb[93].mxu1  ;;  %v1001_v59 = vpop.f32.mrb[94].mxu0 }
 0x1a4   : > { %v6626_v15 = vpack.c.bf16 %v1384_v32, %v1383_v33  ;;  %v1329_v20 = vmax.f32 %v1040_v0, %v1287_v18  ;;  %v1041_v22 = vmax.f32 %v10299_v16, %v1001_v59  ;;  %v1290_v46 = vpop.f32.mrb[94].mxu1  ;;  %v7252_v51 = vpop.f32.mrb[95].mxu0 }
 0x1a5   : > { %v7308_v62 = vpop.f32.mrb[95].mxu1 }
 0x1a6   : > { %6816 = vst [vmem:[%s8825_s30 + $0x48] sm:$0xff] %v6626_v15   ;;  %v1360_v2 = vadd.f32 %v8799_v61, %v1329_v20  ;;  %v1330_v41 = vmax.f32 %v1041_v22, %v1290_v46  ;;  %7478 = vmatmul.mubr.msk.bf16.gmra.mrb[200].mxu0 %vm284_vm3, %v8104_v50  ;;  %v8111_v50 = vld [vmem:[%s8287_s22 + $0x38c] sm:$0xff]  }
 0x1a7   : > { %7534 = vmatmul.mubr.msk.bf16.gmra.mrb[200].mxu1 %vm284_vm3, %v8105_v4  ;;  %7481 = vmatprep.mubr.msk.bf16.mxu0 %vm8228_vm2, %v10271_v1  ;;  %v8112_v46 = vld [vmem:[%s8287_s22 + $0x330] sm:$0xff]  }
 0x1a8   : > { %v1361_v63 = vadd.f32 %v8799_v61, %v1330_v41  ;;  %7537 = vmatprep.mubr.msk.bf16.mxu1 %vm8228_vm2, %v10271_v1  ;;  %v1385_v3 = vmax.f32 %v1360_v2, 0.0  ;;  %v8113_v2 = vld [vmem:[%s8287_s22 + $0x394] sm:$0xff]  }
 0x1a9   : > { %v1006_v31 = vpop.f32.mrb[96].mxu0 }
 0x1aa   : > { %v1386_v58 = vmax.f32 %v1361_v63, 0.0  ;;  %v1042_v49 = vmax.f32 %v10300_v48, %v1006_v31  ;;  %v1295_v34 = vpop.f32.mrb[96].mxu1  ;;  %v7255_v54 = vpop.f32.mrb[97].mxu0 }
 0x1ab   : > { %v7311_v56 = vpop.f32.mrb[97].mxu1  ;;  %v1009_v28 = vpop.f32.mrb[98].mxu0 }
 0x1ac   : > { %v6631_v27 = vpack.c.bf16 %v1386_v58, %v1385_v3  ;;  %v1331_v5 = vmax.f32 %v1042_v49, %v1295_v34  ;;  %v1043_v53 = vmax.f32 %v10301_v45, %v1009_v28  ;;  %v1298_v23 = vpop.f32.mrb[98].mxu1  ;;  %v7256_v26 = vpop.f32.mrb[99].mxu0  ;;  %v8114_v34 = vld [vmem:[%s8287_s22 + $0x338] sm:$0xff]   ;;  %v8135_v3 = vld [vmem:[%s8287_s22 + $0x44c] sm:$0xff]  }
 0x1ad   : > { %v7312_v12 = vpop.f32.mrb[99].mxu1  ;;  %v8115_v28 = vld [vmem:[%s8287_s22 + $0x39c] sm:$0xff]  }
 0x1ae   : > { %6817 = vst [vmem:[%s8825_s30 + $0x50] sm:$0xff] %v6631_v27   ;;  %v1362_v35 = vadd.f32 %v8799_v61, %v1331_v5  ;;  %v1332_v55 = vmax.f32 %v1043_v53, %v1298_v23  ;;  %7482 = vmatmul.mubr.msk.bf16.gmra.mrb[204].mxu0 %vm284_vm3, %v8106_v57 }
 0x1af   : > { %7538 = vmatmul.mubr.msk.bf16.gmra.mrb[204].mxu1 %vm284_vm3, %v8107_v21  ;;  %7545 = vmatprep.mubr.msk.bf16.mxu0 %vm8228_vm2, %v10271_v1 }
 0x1b0   : > { %v1363_v9 = vadd.f32 %v8799_v61, %v1332_v55  ;;  %7601 = vmatprep.mubr.msk.bf16.mxu1 %vm8228_vm2, %v10271_v1  ;;  %v1387_v14 = vmax.f32 %v1362_v35, 0.0  ;;  %v8116_v35 = vld [vmem:[%s8287_s22 + $0x340] sm:$0xff]  }
 0x1b1   : > { %v1014_v52 = vpop.f32.mrb[100].mxu0 }
 0x1b2   : > { %v1388_v39 = vmax.f32 %v1363_v9, 0.0  ;;  %v1044_v8 = vmax.f32 %v10302_v13, %v1014_v52  ;;  %v1303_v36 = vpop.f32.mrb[100].mxu1  ;;  %v7259_v37 = vpop.f32.mrb[101].mxu0  ;;  %v8117_v52 = vld [vmem:[%s8287_s22 + $0x3a4] sm:$0xff]  }
 0x1b3   : > { %v7315_v42 = vpop.f32.mrb[101].mxu1  ;;  %v1017_v44 = vpop.f32.mrb[102].mxu0 }
 0x1b4   : > { %v6636_v24 = vpack.c.bf16 %v1388_v39, %v1387_v14  ;;  %v1333_v25 = vmax.f32 %v1044_v8, %v1303_v36  ;;  %v1306_v10 = vpop.f32.mrb[102].mxu1  ;;  %v7260_v17 = vpop.f32.mrb[103].mxu0  ;;  %v8118_v44 = vld [vmem:[%s8287_s22 + $0x348] sm:$0xff]  }
 0x1b5   : > { %v7316_v29 = vpop.f32.mrb[103].mxu1 }
 0x1b6   : > { %6818 = vst [vmem:[%s8825_s30 + $0x58] sm:$0xff] %v6636_v24   ;;  %v1364_v30 = vadd.f32 %v8799_v61, %v1333_v25  ;;  %7546 = vmatmul.mubr.msk.bf16.vlgmr.msra.gmra.mrb[208].mxu0 %vm284_vm3, %v8108_v19  ;;  %v8119_v25 = vld [vmem:[%s8287_s22 + $0x3ac] sm:$0xff]  }
 0x1b7   : > { %7602 = vmatmul.mubr.msk.bf16.vlgmr.msra.gmra.mrb[208].mxu1 %vm284_vm3, %v8109_v40  ;;  %7654 = vmatpush3.bf16.msra.mxu0 %v9022_v7 }
 0x1b8   : > { %v1389_v43 = vmax.f32 %v1364_v30, 0.0  ;;  %7710 = vmatpush3.bf16.msra.mxu1 %v9022_v7  ;;  %7549 = vmatprep.mubr.msk.bf16.mxu0 %vm8228_vm2, %v10271_v1 }
 0x1b9   : > { %v9028_v61 = vpop.f32.mrb[104].mxu0  ;;  %7605 = vmatprep.mubr.msk.bf16.mxu1 %vm8228_vm2, %v10271_v1  ;;  %7655 = vmatprep.subr.bf16.mxu0 %v10271_v1 }
 0x1ba   : > { %v6502_v38 = vpack.c.bf16 %v1389_v43, %v1389_v43  ;;  %v9033_v33 = vpop.f32.mrb[104].mxu1  ;;  %v7323_v32 = vpop.f32.mrb[105].mxu0  ;;  %7711 = vmatprep.subr.bf16.mxu1 %v10271_v1  ;;  %v8133_v43 = vld [vmem:[%s8287_s22 + $0x3e4] ss:$0 sps:$4 sm:$0x33]  }
 0x1bb   : > { %v2044_v0 = vmax.f32 %v9028_v61, %v9033_v33  ;;  %v7379_v18 = vpop.f32.mrb[105].mxu1  ;;  %v9039_v47 = vpop.f32.mrb[106].mxu0  ;;  %7656 = vmatpush3.bf16.msra.mxu0 %v8275_v6  ;;  %v9310_v33 = vld [vmem:[%s10267_s2] ss:$0 sm:$0xff] }
 0x1bc   : > { %1515 = vst [vmem:[%s8825_s30 + $0x60] sm:$0x3] %v6502_v38  ;;  %v9044_v11 = vpop.f32.mrb[106].mxu1  ;;  %v7324_v59 = vpop.f32.mrb[107].mxu0  ;;  %7712 = vmatpush3.bf16.msra.mxu1 %v8275_v6  ;;  %7765 = vmatprep.subr.bf16.mxu0 %v10271_v1  ;;  %v8120_v18 = vld [vmem:[%s8287_s22 + $0x350] sm:$0xff]  }
 0x1bd   : > { %v2045_v4 = vmax.f32 %v9039_v47, %v9044_v11  ;;  %v7380_v15 = vpop.f32.mrb[107].mxu1  ;;  %7821 = vmatprep.subr.bf16.mxu1 %v10271_v1 }
 0x1be   : > { %7550 = vmatmul.mubr.msk.bf16.gmra.mrb[212].mxu0 %vm284_vm3, %v8110_v60  ;;  %v8121_v15 = vld [vmem:[%s8287_s22 + $0x3b4] sm:$0xff]  }
 0x1bf   : > { %7606 = vmatmul.mubr.msk.bf16.gmra.mrb[212].mxu1 %vm284_vm3, %v8111_v50  ;;  %7553 = vmatprep.mubr.msk.bf16.mxu0 %vm8228_vm2, %v10271_v1 }
 0x1c0   : > { %7609 = vmatprep.mubr.msk.bf16.mxu1 %vm8228_vm2, %v10271_v1 }
 0x1c1   : > { %v9057_v20 = vpop.f32.mrb[108].mxu0 }
 0x1c2   : > { %v9059_v16 = vpop.f32.mrb[108].mxu1  ;;  %v7327_v22 = vpop.f32.mrb[109].mxu0 }
 0x1c3   : > { %v7383_v51 = vpop.f32.mrb[109].mxu1  ;;  %v9062_v62 = vpop.f32.mrb[110].mxu0 }
 0x1c4   : > { %v9067_v63 = vpop.f32.mrb[110].mxu1  ;;  %v7328_v31 = vpop.f32.mrb[111].mxu0 }
 0x1c5   : > { %v7384_v57 = vpop.f32.mrb[111].mxu1 }
 0x1c6   : > { %7554 = vmatmul.mubr.msk.bf16.gmra.mrb[216].mxu0 %vm284_vm3, %v8112_v46 }
 0x1c7   : > { %7610 = vmatmul.mubr.msk.bf16.gmra.mrb[216].mxu1 %vm284_vm3, %v8113_v2  ;;  %7557 = vmatprep.mubr.msk.bf16.mxu0 %vm8228_vm2, %v10271_v1 }
 0x1c8   : > { %7613 = vmatprep.mubr.msk.bf16.mxu1 %vm8228_vm2, %v10271_v1 }
 0x1c9   : > { %v9077_v58 = vpop.f32.mrb[112].mxu0 }
 0x1ca   : > { %v9079_v48 = vpop.f32.mrb[112].mxu1  ;;  %v7331_v49 = vpop.f32.mrb[113].mxu0 }
 0x1cb   : > { %v7387_v54 = vpop.f32.mrb[113].mxu1  ;;  %v9082_v56 = vpop.f32.mrb[114].mxu0 }
 0x1cc   : > { %v9087_v27 = vpop.f32.mrb[114].mxu1  ;;  %v7332_v5 = vpop.f32.mrb[115].mxu0  ;;  %v8122_v54 = vld [vmem:[%s8287_s22 + $0x358] sm:$0xff]  }
 0x1cd   : > { %v7388_v45 = vpop.f32.mrb[115].mxu1 }
 0x1ce   : > { %7558 = vmatmul.mubr.msk.bf16.gmra.mrb[220].mxu0 %vm284_vm3, %v8114_v34  ;;  %v8123_v45 = vld [vmem:[%s8287_s22 + $0x3bc] sm:$0xff]  }
 0x1cf   : > { %7614 = vmatmul.mubr.msk.bf16.gmra.mrb[220].mxu1 %vm284_vm3, %v8115_v28  ;;  %7561 = vmatprep.mubr.msk.bf16.mxu0 %vm8228_vm2, %v10271_v1 }
 0x1d0   : > { %7617 = vmatprep.mubr.msk.bf16.mxu1 %vm8228_vm2, %v10271_v1 }
 0x1d1   : > { %v9097_v23 = vpop.f32.mrb[116].mxu0 }
 0x1d2   : > { %v9099_v26 = vpop.f32.mrb[116].mxu1  ;;  %v7335_v12 = vpop.f32.mrb[117].mxu0 }
 0x1d3   : > { %v7391_v55 = vpop.f32.mrb[117].mxu1  ;;  %v9102_v9 = vpop.f32.mrb[118].mxu0 }
 0x1d4   : > { %v9107_v39 = vpop.f32.mrb[118].mxu1  ;;  %v7336_v13 = vpop.f32.mrb[119].mxu0 }
 0x1d5   : > { %v7392_v8 = vpop.f32.mrb[119].mxu1  ;;  %v8131_v13 = vld [vmem:[%s8287_s22 + $0x3dc] sm:$0xff]  }
 0x1d6   : > { %7562 = vmatmul.mubr.msk.bf16.gmra.mrb[224].mxu0 %vm284_vm3, %v8116_v35 }
 0x1d7   : > { %7618 = vmatmul.mubr.msk.bf16.gmra.mrb[224].mxu1 %vm284_vm3, %v8117_v52  ;;  %7565 = vmatprep.mubr.msk.bf16.mxu0 %vm8228_vm2, %v10271_v1 }
 0x1d8   : > { %7621 = vmatprep.mubr.msk.bf16.mxu1 %vm8228_vm2, %v10271_v1 }
 0x1d9   : > { %v9117_v37 = vpop.f32.mrb[120].mxu0 }
 0x1da   : > { %v9119_v19 = vpop.f32.mrb[120].mxu1  ;;  %v7339_v42 = vpop.f32.mrb[121].mxu0 }
 0x1db   : > { %v7395_v40 = vpop.f32.mrb[121].mxu1  ;;  %v9122_v24 = vpop.f32.mrb[122].mxu0 }
 0x1dc   : > { %v9127_v17 = vpop.f32.mrb[122].mxu1  ;;  %v7340_v29 = vpop.f32.mrb[123].mxu0  ;;  %v8124_v40 = vld [vmem:[%s8287_s22 + $0x360] sm:$0xff]  }
 0x1dd   : > { %v7396_v30 = vpop.f32.mrb[123].mxu1 }
 0x1de   : > { %7566 = vmatmul.mubr.msk.bf16.gmra.mrb[228].mxu0 %vm284_vm3, %v8118_v44  ;;  %v8125_v30 = vld [vmem:[%s8287_s22 + $0x3c4] sm:$0xff]  }
 0x1df   : > { %7622 = vmatmul.mubr.msk.bf16.gmra.mrb[228].mxu1 %vm284_vm3, %v8119_v25  ;;  %7569 = vmatprep.mubr.msk.bf16.mxu0 %vm8228_vm2, %v10271_v1 }
 0x1e0   : > { %7625 = vmatprep.mubr.msk.bf16.mxu1 %vm8228_vm2, %v10271_v1 }
 0x1e1   : > { %v9137_v38 = vpop.f32.mrb[124].mxu0 }
 0x1e2   : > { %v9139_v32 = vpop.f32.mrb[124].mxu1  ;;  %v7343_v60 = vpop.f32.mrb[125].mxu0 }
 0x1e3   : > { %v7399_v50 = vpop.f32.mrb[125].mxu1  ;;  %v9142_v59 = vpop.f32.mrb[126].mxu0 }
 0x1e4   : > { %v9147_v46 = vpop.f32.mrb[126].mxu1  ;;  %v7344_v51 = vpop.f32.mrb[127].mxu0 }
 0x1e5   : > { %v7400_v2 = vpop.f32.mrb[127].mxu1 }
 0x1e6   : > { %7570 = vmatmul.mubr.msk.bf16.gmra.mrb[232].mxu0 %vm284_vm3, %v8120_v18 }
 0x1e7   : > { %7626 = vmatmul.mubr.msk.bf16.gmra.mrb[232].mxu1 %vm284_vm3, %v8121_v15  ;;  %7573 = vmatprep.mubr.msk.bf16.mxu0 %vm8228_vm2, %v10271_v1 }
 0x1e8   : > { %7629 = vmatprep.mubr.msk.bf16.mxu1 %vm8228_vm2, %v10271_v1 }
 0x1e9   : > { %v9157_v57 = vpop.f32.mrb[128].mxu0 }
 0x1ea   : > { %v9159_v49 = vpop.f32.mrb[128].mxu1  ;;  %v7347_v34 = vpop.f32.mrb[129].mxu0 }
 0x1eb   : > { %v7403_v28 = vpop.f32.mrb[129].mxu1  ;;  %v9162_v5 = vpop.f32.mrb[130].mxu0 }
 0x1ec   : > { %v9167_v35 = vpop.f32.mrb[130].mxu1  ;;  %v7348_v55 = vpop.f32.mrb[131].mxu0  ;;  %v8126_v28 = vld [vmem:[%s8287_s22 + $0x368] sm:$0xff]  }
 0x1ed   : > { %v7404_v52 = vpop.f32.mrb[131].mxu1 }
 0x1ee   : > { %7574 = vmatmul.mubr.msk.bf16.gmra.mrb[236].mxu0 %vm284_vm3, %v8122_v54  ;;  %v8127_v52 = vld [vmem:[%s8287_s22 + $0x3cc] sm:$0xff]  }
 0x1ef   : > { %7630 = vmatmul.mubr.msk.bf16.gmra.mrb[236].mxu1 %vm284_vm3, %v8123_v45  ;;  %7577 = vmatprep.mubr.msk.bf16.mxu0 %vm8228_vm2, %v10271_v1 }
 0x1f0   : > { %7633 = vmatprep.mubr.msk.bf16.mxu1 %vm8228_vm2, %v10271_v1 }
 0x1f1   : > { %v9177_v8 = vpop.f32.mrb[132].mxu0 }
 0x1f2   : > { %v9179_v42 = vpop.f32.mrb[132].mxu1  ;;  %v7351_v44 = vpop.f32.mrb[133].mxu0 }
 0x1f3   : > { %v7407_v25 = vpop.f32.mrb[133].mxu1  ;;  %v9182_v29 = vpop.f32.mrb[134].mxu0 }
 0x1f4   : > { %v9187_v18 = vpop.f32.mrb[134].mxu1  ;;  %v7352_v50 = vpop.f32.mrb[135].mxu0 }
 0x1f5   : > { %v7408_v15 = vpop.f32.mrb[135].mxu1  ;;  %v8129_v50 = vld [vmem:[%s8287_s22 + $0x3d4] sm:$0xff]  }
 0x1f6   : > { %7578 = vmatmul.mubr.msk.bf16.gmra.mrb[240].mxu0 %vm284_vm3, %v8124_v40 }
 0x1f7   : > { %7634 = vmatmul.mubr.msk.bf16.gmra.mrb[240].mxu1 %vm284_vm3, %v8125_v30  ;;  %7581 = vmatprep.mubr.msk.bf16.mxu0 %vm8228_vm2, %v10271_v1 }
 0x1f8   : > { %7637 = vmatprep.mubr.msk.bf16.mxu1 %vm8228_vm2, %v10271_v1 }
 0x1f9   : > { %v9197_v2 = vpop.f32.mrb[136].mxu0 }
 0x1fa   : > { %v9199_v34 = vpop.f32.mrb[136].mxu1  ;;  %v7355_v54 = vpop.f32.mrb[137].mxu0 }
 0x1fb   : > { %v7411_v45 = vpop.f32.mrb[137].mxu1  ;;  %v9202_v55 = vpop.f32.mrb[138].mxu0 }
 0x1fc   : > { %v9207_v40 = vpop.f32.mrb[138].mxu1  ;;  %v7356_v25 = vpop.f32.mrb[139].mxu0 }
 0x1fd   : > { %v7412_v30 = vpop.f32.mrb[139].mxu1  ;;  %v8128_v25 = vld [vmem:[%s8287_s22 + $0x370] sm:$0xff]  }
 0x1fe   : > { %7582 = vmatmul.mubr.msk.bf16.gmra.mrb[244].mxu0 %vm284_vm3, %v8126_v28 }
 0x1ff   : > { %7638 = vmatmul.mubr.msk.bf16.gmra.mrb[244].mxu1 %vm284_vm3, %v8127_v52  ;;  %7585 = vmatprep.mubr.msk.bf16.mxu0 %vm8228_vm2, %v10271_v1 }
 0x200   : > { %7641 = vmatprep.mubr.msk.bf16.mxu1 %vm8228_vm2, %v10271_v1 }
 0x201   : > { %v9217_v15 = vpop.f32.mrb[140].mxu0 }
 0x202   : > { %v9219_v54 = vpop.f32.mrb[140].mxu1  ;;  %v7359_v45 = vpop.f32.mrb[141].mxu0 }
 0x203   : > { %v7415_v30 = vpop.f32.mrb[141].mxu1  ;;  %v9222_v44 = vpop.f32.mrb[142].mxu0 }
 0x204   : > { %v9227_v52 = vpop.f32.mrb[142].mxu1  ;;  %v7360_v51 = vpop.f32.mrb[143].mxu0 }
 0x205   : > { %v7416_v60 = vpop.f32.mrb[143].mxu1  ;;  %v8130_v51 = vld [vmem:[%s8287_s22 + $0x378] sm:$0xff]  }
 0x206   : > { %7586 = vmatmul.mubr.msk.bf16.gmra.mrb[248].mxu0 %vm284_vm3, %v8128_v25 }
 0x207   : > { %7642 = vmatmul.mubr.msk.bf16.gmra.mrb[248].mxu1 %vm284_vm3, %v8129_v50  ;;  %7589 = vmatprep.mubr.msk.bf16.mxu0 %vm8228_vm2, %v10271_v1 }
 0x208   : > { %7645 = vmatprep.mubr.msk.bf16.mxu1 %vm8228_vm2, %v10271_v1 }
 0x209   : > { %v9237_v45 = vpop.f32.mrb[144].mxu0 }
 0x20a   : > { %v9239_v30 = vpop.f32.mrb[144].mxu1  ;;  %v7363_v28 = vpop.f32.mrb[145].mxu0 }
 0x20b   : > { %v7419_v60 = vpop.f32.mrb[145].mxu1  ;;  %v9242_v12 = vpop.f32.mrb[146].mxu0 }
 0x20c   : > { %v9247_v25 = vpop.f32.mrb[146].mxu1  ;;  %v7364_v31 = vpop.f32.mrb[147].mxu0 }
 0x20d   : > { %v7420_v22 = vpop.f32.mrb[147].mxu1  ;;  %v8132_v31 = vld [vmem:[%s8287_s22 + $0x380] ss:$0 sps:$4 sm:$0x33]  }
 0x20e   : > { %7590 = vmatmul.mubr.msk.bf16.gmra.mrb[252].mxu0 %vm284_vm3, %v8130_v51 }
 0x20f   : > { %7646 = vmatmul.mubr.msk.bf16.gmra.mrb[252].mxu1 %vm284_vm3, %v8131_v13  ;;  %7593 = vmatprep.mubr.msk.bf16.mxu0 %vm8228_vm2, %v10271_v1 }
 0x210   : > { %7649 = vmatprep.mubr.msk.bf16.mxu1 %vm8228_vm2, %v10271_v1 }
 0x211   : > { %v9257_v28 = vpop.f32.mrb[148].mxu0 }
 0x212   : > { %v9259_v60 = vpop.f32.mrb[148].mxu1  ;;  %v7367_v50 = vpop.f32.mrb[149].mxu0 }
 0x213   : > { %v7423_v22 = vpop.f32.mrb[149].mxu1  ;;  %v9262_v10 = vpop.f32.mrb[150].mxu0 }
 0x214   : > { %v9267_v51 = vpop.f32.mrb[150].mxu1  ;;  %v7368_v36 = vpop.f32.mrb[151].mxu0 }
 0x215   : > { %v7424_v14 = vpop.f32.mrb[151].mxu1  ;;  %v8134_v36 = vld [vmem:[%s8287_s22 + $0x3e8] sm:$0xff]  }
 0x216   : > { %7594 = vmatmul.mubr.msk.bf16.gmra.mrb[0].mxu0 %vm284_vm3, %v8132_v31 }
 0x217   : > { %7650 = vmatmul.mubr.msk.bf16.gmra.mrb[0].mxu1 %vm284_vm3, %v8133_v43  ;;  %7657 = vmatprep.mubr.msk.bf16.mxu0 %vm8228_vm2, %v10271_v1 }
 0x218   : > { %7713 = vmatprep.mubr.msk.bf16.mxu1 %vm8228_vm2, %v10271_v1 }
 0x219   : > { %v9277_v50 = vpop.f32.mrb[152].mxu0 }
 0x21a   : > { %10303 = vst [vmem:[#allocation2_spill] sm:$0xff] %v9277_v50  ;;  %v9279_v22 = vpop.f32.mrb[152].mxu1  ;;  %v7371_v13 = vpop.f32.mrb[153].mxu0 }
 0x21b   : > { %10304 = vst [vmem:[#allocation3_spill] sm:$0xff] %v9279_v22  ;;  %v7427_v14 = vpop.f32.mrb[153].mxu1  ;;  %v1777_v21 = vpop.f32.mrb[154].mxu0 }
 0x21c   : > { %v2041_v43 = vpop.f32.mrb[154].mxu1  ;;  %v7372_v53 = vpop.f32.mrb[155].mxu0  ;;  %v8137_v14 = vld [vmem:[%s8287_s22 + $0x454] sm:$0xff]  }
 0x21d   : > { %v7428_v41 = vpop.f32.mrb[155].mxu1 }
 0x21e   : > { %7658 = vmatmul.mubr.msk.bf16.vlgmr.msra.gmra.mrb[4].mxu0 %vm284_vm3, %v8134_v36 }
 0x21f   : > { %7714 = vmatmul.mubr.msk.bf16.vlgmr.msra.gmra.mrb[4].mxu1 %vm284_vm3, %v8135_v3  ;;  %7766 = vmatpush3.bf16.msra.mxu0 %v9022_v7  ;;  %v8136_v3 = vld [vmem:[%s8287_s22 + $0x3f0] sm:$0xff]  }
 0x220   : > { %7822 = vmatpush3.bf16.msra.mxu1 %v9022_v7  ;;  %7661 = vmatprep.mubr.msk.bf16.mxu0 %vm8228_vm2, %v10271_v1 }
 0x221   : > { %v2231_v21 = vpop.f32.mrb[156].mxu0  ;;  %7717 = vmatprep.mubr.msk.bf16.mxu1 %vm8228_vm2, %v10271_v1  ;;  %7767 = vmatprep.subr.bf16.mxu0 %v10271_v1 }
 0x222   : > { %v2333_v41 = vmax.f32 %v2044_v0, %v2231_v21  ;;  %v2520_v53 = vpop.f32.mrb[156].mxu1  ;;  %v7435_v13 = vpop.f32.mrb[157].mxu0  ;;  %7823 = vmatprep.subr.bf16.mxu1 %v10271_v1  ;;  %v10305_v21 = vmax.f32 %v9057_v20, %v9059_v16 }
 0x223   : > { %v7491_v36 = vpop.f32.mrb[157].mxu1  ;;  %v2234_v7 = vpop.f32.mrb[158].mxu0  ;;  %7768 = vmatpush3.bf16.msra.mxu0 %v8275_v6 }
 0x224   : > { %v2622_v43 = vmax.f32 %v2333_v41, %v2520_v53  ;;  %v2334_v31 = vmax.f32 %v2045_v4, %v2234_v7  ;;  %v2523_v22 = vpop.f32.mrb[158].mxu1  ;;  %v7436_v50 = vpop.f32.mrb[159].mxu0  ;;  %7824 = vmatpush3.bf16.msra.mxu1 %v8275_v6  ;;  %7877 = vmatprep.subr.bf16.mxu0 %v10271_v1  ;;  %v8139_v36 = vld [vmem:[%s8287_s22 + $0x45c] sm:$0xff]  }
 0x225   : > { %v7492_v61 = vpop.f32.mrb[159].mxu1  ;;  %7933 = vmatprep.subr.bf16.mxu1 %v10271_v1 }
 0x226   : > { %v2647_v0 = vadd.f32 %v9310_v33, %v2622_v43  ;;  %v2623_v47 = vmax.f32 %v2334_v31, %v2523_v22  ;;  %7662 = vmatmul.mubr.msk.bf16.gmra.mrb[8].mxu0 %vm284_vm3, %v8136_v3  ;;  %v8138_v22 = vld [vmem:[%s8287_s22 + $0x3f8] sm:$0xff]   ;;  %v10306_v43 = vmax.f32 %v9062_v62, %v9067_v63 }
 0x227   : > { %7718 = vmatmul.mubr.msk.bf16.gmra.mrb[8].mxu1 %vm284_vm3, %v8137_v14  ;;  %7665 = vmatprep.mubr.msk.bf16.mxu0 %vm8228_vm2, %v10271_v1 }
 0x228   : > { %v2672_v11 = vmax.f32 %v2647_v0, 0.0  ;;  %7721 = vmatprep.mubr.msk.bf16.mxu1 %vm8228_vm2, %v10271_v1  ;;  %v2648_v7 = vadd.f32 %v9310_v33, %v2623_v47 }
 0x229   : > { %v2239_v4 = vpop.f32.mrb[160].mxu0 }
 0x22a   : > { %v6503_v50 = vpack.c.bf16 %v2672_v11, %v2672_v11  ;;  %v2335_v41 = vmax.f32 %v10305_v21, %v2239_v4  ;;  %v2528_v53 = vpop.f32.mrb[160].mxu1  ;;  %v7439_v13 = vpop.f32.mrb[161].mxu0  ;;  %v10307_v4 = vmov 0.0   ;;  %v2673_v47 = vmax.f32 %v2648_v7, 0.0 }
 0x22b   : > { %v7495_v31 = vpop.f32.mrb[161].mxu1  ;;  %v2242_v3 = vpop.f32.mrb[162].mxu0  ;;  %v8140_v13 = vld [vmem:[%s8287_s22 + $0x400] sm:$0xff]  }
 0x22c   : > { %5943 = vst [vmem:[%s8825_s30 + $0x64] sm:$0xf] %v6503_v50  ;;  %v2624_v14 = vmax.f32 %v2335_v41, %v2528_v53  ;;  %v2336_v61 = vmax.f32 %v10306_v43, %v2242_v3  ;;  %v2531_v0 = vpop.f32.mrb[162].mxu1  ;;  %v7440_v11 = vpop.f32.mrb[163].mxu0  ;;  %v8141_v3 = vld [vmem:[%s8287_s22 + $0x464] sm:$0xff]  }
 0x22d   : > { %v7496_v1 = vpop.f32.mrb[163].mxu1 }
 0x22e   : > { %v2649_v20 = vadd.f32 %v9310_v33, %v2624_v14  ;;  %v2625_v16 = vmax.f32 %v2336_v61, %v2531_v0  ;;  %7666 = vmatmul.mubr.msk.bf16.gmra.mrb[12].mxu0 %vm284_vm3, %v8138_v22  ;;  %v10308_v1 = vmax.f32 %v9077_v58, %v9079_v48  ;;  %v10309_v14 = vmax.f32 %v9082_v56, %v9087_v27 }
 0x22f   : > { %7722 = vmatmul.mubr.msk.bf16.gmra.mrb[12].mxu1 %vm284_vm3, %v8139_v36  ;;  %7669 = vmatprep.mubr.msk.bf16.mxu0 %vm8228_vm2, %v10307_v4 }
 0x230   : > { %v2674_v50 = vmax.f32 %v2649_v20, 0.0  ;;  %7725 = vmatprep.mubr.msk.bf16.mxu1 %vm8228_vm2, %v10307_v4  ;;  %v2650_v36 = vadd.f32 %v9310_v33, %v2625_v16 }
 0x231   : > { %v2247_v62 = vpop.f32.mrb[164].mxu0 }
 0x232   : > { %v6641_v63 = vpack.c.bf16 %v2674_v50, %v2673_v47  ;;  %v2337_v21 = vmax.f32 %v10308_v1, %v2247_v62  ;;  %v2536_v41 = vpop.f32.mrb[164].mxu1  ;;  %v7443_v53 = vpop.f32.mrb[165].mxu0  ;;  %v2675_v20 = vmax.f32 %v2650_v36, 0.0  ;;  %v10310_v47 = vmax.f32 %v9097_v23, %v9099_v26  ;;  %v8142_v1 = vld [vmem:[%s8287_s22 + $0x408] sm:$0xff]  }
 0x233   : > { %v7499_v22 = vpop.f32.mrb[165].mxu1  ;;  %v2250_v31 = vpop.f32.mrb[166].mxu0  ;;  %v8143_v53 = vld [vmem:[%s8287_s22 + $0x46c] sm:$0xff]  }
 0x234   : > { %6819 = vst [vmem:[%s8825_s30 + $0x68] sm:$0xff] %v6641_v63   ;;  %v2626_v7 = vmax.f32 %v2337_v21, %v2536_v41  ;;  %v2338_v43 = vmax.f32 %v10309_v14, %v2250_v31  ;;  %v2539_v61 = vpop.f32.mrb[166].mxu1  ;;  %v7444_v0 = vpop.f32.mrb[167].mxu0  ;;  %v10311_v31 = vmax.f32 %v9102_v9, %v9107_v39 }
 0x235   : > { %v7500_v11 = vpop.f32.mrb[167].mxu1  ;;  %v10312_v0 = vmax.f32 %v9117_v37, %v9119_v19 }
 0x236   : > { %v2651_v58 = vadd.f32 %v9310_v33, %v2626_v7  ;;  %v2627_v48 = vmax.f32 %v2338_v43, %v2539_v61  ;;  %7670 = vmatmul.mubr.msk.bf16.gmra.mrb[16].mxu0 %vm284_vm3, %v8140_v13 }
 0x237   : > { %7726 = vmatmul.mubr.msk.bf16.gmra.mrb[16].mxu1 %vm284_vm3, %v8141_v3  ;;  %7673 = vmatprep.mubr.msk.bf16.mxu0 %vm8228_vm2, %v10307_v4 }
 0x238   : > { %v2676_v16 = vmax.f32 %v2651_v58, 0.0  ;;  %7729 = vmatprep.mubr.msk.bf16.mxu1 %vm8228_vm2, %v10307_v4  ;;  %v2652_v13 = vadd.f32 %v9310_v33, %v2627_v48 }
 0x239   : > { %v2255_v56 = vpop.f32.mrb[168].mxu0 }
 0x23a   : > { %v6646_v27 = vpack.c.bf16 %v2676_v16, %v2675_v20  ;;  %v2339_v50 = vmax.f32 %v10310_v47, %v2255_v56  ;;  %v2544_v62 = vpop.f32.mrb[168].mxu1  ;;  %v7447_v63 = vpop.f32.mrb[169].mxu0  ;;  %v2677_v43 = vmax.f32 %v2652_v13, 0.0  ;;  %v8144_v20 = vld [vmem:[%s8287_s22 + $0x410] sm:$0xff]  }
 0x23b   : > { %v7503_v21 = vpop.f32.mrb[169].mxu1  ;;  %v2258_v41 = vpop.f32.mrb[170].mxu0 }
 0x23c   : > { %6820 = vst [vmem:[%s8825_s30 + $0x70] sm:$0xff] %v6646_v27   ;;  %v2628_v22 = vmax.f32 %v2339_v50, %v2544_v62  ;;  %v2340_v3 = vmax.f32 %v10311_v31, %v2258_v41  ;;  %v2547_v36 = vpop.f32.mrb[170].mxu1  ;;  %v7448_v7 = vpop.f32.mrb[171].mxu0  ;;  %v8145_v27 = vld [vmem:[%s8287_s22 + $0x474] sm:$0xff]   ;;  %v10313_v62 = vmax.f32 %v9122_v24, %v9127_v17 }
 0x23d   : > { %v7504_v14 = vpop.f32.mrb[171].mxu1  ;;  %v8146_v7 = vld [vmem:[%s8287_s22 + $0x418] sm:$0xff]  }
 0x23e   : > { %v2653_v23 = vadd.f32 %v9310_v33, %v2628_v22  ;;  %v2629_v26 = vmax.f32 %v2340_v3, %v2547_v36  ;;  %7674 = vmatmul.mubr.msk.bf16.gmra.mrb[20].mxu0 %vm284_vm3, %v8142_v1  ;;  %v10314_v22 = vmax.f32 %v9137_v38, %v9139_v32 }
 0x23f   : > { %7730 = vmatmul.mubr.msk.bf16.gmra.mrb[20].mxu1 %vm284_vm3, %v8143_v53  ;;  %7677 = vmatprep.mubr.msk.bf16.mxu0 %vm8228_vm2, %v10307_v4 }
 0x240   : > { %v2678_v61 = vmax.f32 %v2653_v23, 0.0  ;;  %7733 = vmatprep.mubr.msk.bf16.mxu1 %vm8228_vm2, %v10307_v4  ;;  %v2654_v47 = vadd.f32 %v9310_v33, %v2629_v26  ;;  %v8147_v26 = vld [vmem:[%s8287_s22 + $0x47c] sm:$0xff]  }
 0x241   : > { %v2263_v9 = vpop.f32.mrb[172].mxu0 }
 0x242   : > { %v6651_v39 = vpack.c.bf16 %v2678_v61, %v2677_v43  ;;  %v2341_v11 = vmax.f32 %v10312_v0, %v2263_v9  ;;  %v2552_v58 = vpop.f32.mrb[172].mxu1  ;;  %v7451_v48 = vpop.f32.mrb[173].mxu0  ;;  %v2679_v53 = vmax.f32 %v2654_v47, 0.0  ;;  %v10315_v9 = vmax.f32 %v9142_v59, %v9147_v46 }
 0x243   : > { %v7507_v16 = vpop.f32.mrb[173].mxu1  ;;  %v2266_v56 = vpop.f32.mrb[174].mxu0 }
 0x244   : > { %6821 = vst [vmem:[%s8825_s30 + $0x78] sm:$0xff] %v6651_v39   ;;  %v2630_v50 = vmax.f32 %v2341_v11, %v2552_v58  ;;  %v2342_v63 = vmax.f32 %v10313_v62, %v2266_v56  ;;  %v2555_v1 = vpop.f32.mrb[174].mxu1  ;;  %v7452_v21 = vpop.f32.mrb[175].mxu0  ;;  %v10316_v16 = vmax.f32 %v9157_v57, %v9159_v49 }
 0x245   : > { %v7508_v41 = vpop.f32.mrb[175].mxu1 }
 0x246   : > { %v2655_v37 = vadd.f32 %v9310_v33, %v2630_v50  ;;  %v2631_v19 = vmax.f32 %v2342_v63, %v2555_v1  ;;  %7678 = vmatmul.mubr.msk.bf16.gmra.mrb[24].mxu0 %vm284_vm3, %v8144_v20  ;;  %v8148_v50 = vld [vmem:[%s8287_s22 + $0x420] sm:$0xff]  }
 0x247   : > { %7734 = vmatmul.mubr.msk.bf16.gmra.mrb[24].mxu1 %vm284_vm3, %v8145_v27  ;;  %7681 = vmatprep.mubr.msk.bf16.mxu0 %vm8228_vm2, %v10307_v4  ;;  %v8149_v1 = vld [vmem:[%s8287_s22 + $0x484] sm:$0xff]  }
 0x248   : > { %v2680_v13 = vmax.f32 %v2655_v37, 0.0  ;;  %7737 = vmatprep.mubr.msk.bf16.mxu1 %vm8228_vm2, %v10307_v4  ;;  %v2656_v43 = vadd.f32 %v9310_v33, %v2631_v19  ;;  %v10317_v37 = vmax.f32 %v9162_v5, %v9167_v35 }
 0x249   : > { %v2271_v24 = vpop.f32.mrb[176].mxu0 }
 0x24a   : > { %v6656_v17 = vpack.c.bf16 %v2680_v13, %v2679_v53  ;;  %v2343_v31 = vmax.f32 %v10314_v22, %v2271_v24  ;;  %v2560_v3 = vpop.f32.mrb[176].mxu1  ;;  %v7455_v36 = vpop.f32.mrb[177].mxu0  ;;  %v2681_v48 = vmax.f32 %v2656_v43, 0.0  ;;  %v8151_v43 = vld [vmem:[%s8287_s22 + $0x48c] sm:$0xff]  }
 0x24b   : > { %v7511_v14 = vpop.f32.mrb[177].mxu1  ;;  %v2274_v23 = vpop.f32.mrb[178].mxu0 }
 0x24c   : > { %6822 = vst [vmem:[%s8825_s30 + $0x80] sm:$0xff] %v6656_v17   ;;  %v2632_v61 = vmax.f32 %v2343_v31, %v2560_v3  ;;  %v2344_v39 = vmax.f32 %v10315_v9, %v2274_v23  ;;  %v2563_v0 = vpop.f32.mrb[178].mxu1  ;;  %v7456_v11 = vpop.f32.mrb[179].mxu0  ;;  %v10318_v31 = vmax.f32 %v9177_v8, %v9179_v42  ;;  %v8150_v14 = vld [vmem:[%s8287_s22 + $0x428] sm:$0xff]  }
 0x24d   : > { %v7512_v58 = vpop.f32.mrb[179].mxu1 }
 0x24e   : > { %v2657_v38 = vadd.f32 %v9310_v33, %v2632_v61  ;;  %v2633_v32 = vmax.f32 %v2344_v39, %v2563_v0  ;;  %7682 = vmatmul.mubr.msk.bf16.gmra.mrb[28].mxu0 %vm284_vm3, %v8146_v7  ;;  %v10319_v39 = vmax.f32 %v9182_v29, %v9187_v18 }
 0x24f   : > { %7738 = vmatmul.mubr.msk.bf16.gmra.mrb[28].mxu1 %vm284_vm3, %v8147_v26  ;;  %7685 = vmatprep.mubr.msk.bf16.mxu0 %vm8228_vm2, %v10307_v4 }
 0x250   : > { %v2682_v20 = vmax.f32 %v2657_v38, 0.0  ;;  %7741 = vmatprep.mubr.msk.bf16.mxu1 %vm8228_vm2, %v10307_v4  ;;  %v2658_v21 = vadd.f32 %v9310_v33, %v2633_v32 }
 0x251   : > { %v2279_v59 = vpop.f32.mrb[180].mxu0 }
 0x252   : > { %v6661_v46 = vpack.c.bf16 %v2682_v20, %v2681_v48  ;;  %v2345_v56 = vmax.f32 %v10316_v16, %v2279_v59  ;;  %v2568_v27 = vpop.f32.mrb[180].mxu1  ;;  %v7459_v47 = vpop.f32.mrb[181].mxu0  ;;  %v2683_v17 = vmax.f32 %v2658_v21, 0.0  ;;  %v10320_v20 = vmax.f32 %v9197_v2, %v9199_v34 }
 0x253   : > { %v7515_v62 = vpop.f32.mrb[181].mxu1  ;;  %v2282_v63 = vpop.f32.mrb[182].mxu0 }
 0x254   : > { %6823 = vst [vmem:[%s8825_s30 + $0x88] sm:$0xff] %v6661_v46   ;;  %v2634_v41 = vmax.f32 %v2345_v56, %v2568_v27  ;;  %v2346_v19 = vmax.f32 %v10317_v37, %v2282_v63  ;;  %v2571_v53 = vpop.f32.mrb[182].mxu1  ;;  %v7460_v13 = vpop.f32.mrb[183].mxu0  ;;  %v8152_v56 = vld [vmem:[%s8287_s22 + $0x430] sm:$0xff]  }
 0x255   : > { %v7516_v24 = vpop.f32.mrb[183].mxu1 }
 0x256   : > { %v2659_v57 = vadd.f32 %v9310_v33, %v2634_v41  ;;  %v2635_v49 = vmax.f32 %v2346_v19, %v2571_v53  ;;  %7686 = vmatmul.mubr.msk.bf16.gmra.mrb[32].mxu0 %vm284_vm3, %v8148_v50  ;;  %v8153_v50 = vld [vmem:[%s8287_s22 + $0x494] sm:$0xff]   ;;  %v10322_v24 = vmax.f32 %v9217_v15, %v9219_v54 }
 0x257   : > { %7742 = vmatmul.mubr.msk.bf16.gmra.mrb[32].mxu1 %vm284_vm3, %v8149_v1  ;;  %7689 = vmatprep.mubr.msk.bf16.mxu0 %vm8228_vm2, %v10307_v4  ;;  %v10321_v1 = vmax.f32 %v9202_v55, %v9207_v40 }
 0x258   : > { %v2684_v22 = vmax.f32 %v2659_v57, 0.0  ;;  %7745 = vmatprep.mubr.msk.bf16.mxu1 %vm8228_vm2, %v10307_v4  ;;  %v2660_v61 = vadd.f32 %v9310_v33, %v2635_v49 }
 0x259   : > { %v2287_v5 = vpop.f32.mrb[184].mxu0 }
 0x25a   : > { %v6666_v35 = vpack.c.bf16 %v2684_v22, %v2683_v17  ;;  %v2347_v3 = vmax.f32 %v10318_v31, %v2287_v5  ;;  %v2576_v36 = vpop.f32.mrb[184].mxu1  ;;  %v7463_v7 = vpop.f32.mrb[185].mxu0  ;;  %v2685_v32 = vmax.f32 %v2660_v61, 0.0  ;;  %v8154_v22 = vld [vmem:[%s8287_s22 + $0x438] sm:$0xff]  }
 0x25b   : > { %v7519_v23 = vpop.f32.mrb[185].mxu1  ;;  %v2290_v26 = vpop.f32.mrb[186].mxu0  ;;  %v8155_v31 = vld [vmem:[%s8287_s22 + $0x49c] sm:$0xff]   ;;  %v10323_v7 = vmax.f32 %v9222_v44, %v9227_v52 }
 0x25c   : > { %6824 = vst [vmem:[%s8825_s30 + $0x90] sm:$0xff] %v6666_v35   ;;  %v2636_v9 = vmax.f32 %v2347_v3, %v2576_v36  ;;  %v2348_v0 = vmax.f32 %v10319_v39, %v2290_v26  ;;  %v2579_v11 = vpop.f32.mrb[186].mxu1  ;;  %v7464_v58 = vpop.f32.mrb[187].mxu0  ;;  %v10324_v39 = vmax.f32 %v9237_v45, %v9239_v30 }
 0x25d   : > { %v7520_v38 = vpop.f32.mrb[187].mxu1 }
 0x25e   : > { %v2661_v8 = vadd.f32 %v9310_v33, %v2636_v9  ;;  %v2637_v42 = vmax.f32 %v2348_v0, %v2579_v11  ;;  %7690 = vmatmul.mubr.msk.bf16.gmra.mrb[36].mxu0 %vm284_vm3, %v8150_v14  ;;  %v8156_v38 = vld [vmem:[%s8287_s22 + $0x440] sm:$0xff]  }
 0x25f   : > { %7746 = vmatmul.mubr.msk.bf16.gmra.mrb[36].mxu1 %vm284_vm3, %v8151_v43  ;;  %7693 = vmatprep.mubr.msk.bf16.mxu0 %vm8228_vm2, %v10307_v4 }
 0x260   : > { %v2686_v48 = vmax.f32 %v2661_v8, 0.0  ;;  %7749 = vmatprep.mubr.msk.bf16.mxu1 %vm8228_vm2, %v10307_v4  ;;  %v2662_v62 = vadd.f32 %v9310_v33, %v2637_v42 }
 0x261   : > { %v2295_v29 = vpop.f32.mrb[188].mxu0 }
 0x262   : > { %v6671_v18 = vpack.c.bf16 %v2686_v48, %v2685_v32  ;;  %v2349_v59 = vmax.f32 %v10320_v20, %v2295_v29  ;;  %v2584_v46 = vpop.f32.mrb[188].mxu1  ;;  %v7467_v16 = vpop.f32.mrb[189].mxu0  ;;  %v2687_v53 = vmax.f32 %v2662_v62, 0.0  ;;  %v8157_v32 = vld [vmem:[%s8287_s22 + $0x4a4] sm:$0xff]  }
 0x263   : > { %v7523_v27 = vpop.f32.mrb[189].mxu1  ;;  %v2298_v47 = vpop.f32.mrb[190].mxu0 }
 0x264   : > { %6825 = vst [vmem:[%s8825_s30 + $0x98] sm:$0xff] %v6671_v18   ;;  %v2638_v63 = vmax.f32 %v2349_v59, %v2584_v46  ;;  %v2350_v21 = vmax.f32 %v10321_v1, %v2298_v47  ;;  %v2587_v41 = vpop.f32.mrb[190].mxu1  ;;  %v7468_v37 = vpop.f32.mrb[191].mxu0  ;;  %v10325_v18 = vmax.f32 %v9242_v12, %v9247_v25  ;;  %v10326_v47 = vmax.f32 %v9257_v28, %v9259_v60  ;;  %v8158_v1 = vld [vmem:[%s8287_s22 + $0x448] ss:$0 sps:$4 sm:$0x33]  }
 0x265   : > { %v7524_v19 = vpop.f32.mrb[191].mxu1  ;;  %v8159_v37 = vld [vmem:[%s8287_s22 + $0x4ac] ss:$0 sps:$4 sm:$0x33]  }
 0x266   : > { %v2663_v2 = vadd.f32 %v9310_v33, %v2638_v63  ;;  %v2639_v34 = vmax.f32 %v2350_v21, %v2587_v41  ;;  %7694 = vmatmul.mubr.msk.bf16.gmra.mrb[40].mxu0 %vm284_vm3, %v8152_v56 }
 0x267   : > { %7750 = vmatmul.mubr.msk.bf16.gmra.mrb[40].mxu1 %vm284_vm3, %v8153_v50  ;;  %7697 = vmatprep.mubr.msk.bf16.mxu0 %vm8228_vm2, %v10307_v4 }
 0x268   : > { %v2688_v13 = vmax.f32 %v2663_v2, 0.0  ;;  %7753 = vmatprep.mubr.msk.bf16.mxu1 %vm8228_vm2, %v10307_v4  ;;  %v2664_v3 = vadd.f32 %v9310_v33, %v2639_v34  ;;  %v10327_v34 = vmax.f32 %v9262_v10, %v9267_v51 }
 0x269   : > { %v2303_v55 = vpop.f32.mrb[192].mxu0 }
 0x26a   : > { %v6676_v40 = vpack.c.bf16 %v2688_v13, %v2687_v53  ;;  %v2351_v57 = vmax.f32 %v10322_v24, %v2303_v55  ;;  %v2592_v49 = vpop.f32.mrb[192].mxu1  ;;  %v7471_v17 = vpop.f32.mrb[193].mxu0  ;;  %v2689_v61 = vmax.f32 %v2664_v3, 0.0 }
 0x26b   : > { %v7527_v5 = vpop.f32.mrb[193].mxu1  ;;  %v2306_v35 = vpop.f32.mrb[194].mxu0 }
 0x26c   : > { %6826 = vst [vmem:[%s8825_s30 + $0xa0] sm:$0xff] %v6676_v40   ;;  %v2640_v36 = vmax.f32 %v2351_v57, %v2592_v49  ;;  %v2352_v14 = vmax.f32 %v10323_v7, %v2306_v35  ;;  %v2595_v23 = vpop.f32.mrb[194].mxu1  ;;  %v7472_v26 = vpop.f32.mrb[195].mxu0  ;;  %v10329_v5 = vld [vmem:[#allocation3_spill] sm:$0xff]  ;;  %v8160_v7 = vld [vmem:[%s8287_s22 + $0x4b0] sm:$0xff]  }
 0x26d   : > { %v7528_v43 = vpop.f32.mrb[195].mxu1  ;;  %v8161_v26 = vld [vmem:[%s8287_s22 + $0x514] sm:$0xff]  }
 0x26e   : > { %v2665_v15 = vadd.f32 %v9310_v33, %v2640_v36  ;;  %v2641_v54 = vmax.f32 %v2352_v14, %v2595_v23  ;;  %7698 = vmatmul.mubr.msk.bf16.gmra.mrb[44].mxu0 %vm284_vm3, %v8154_v22  ;;  %v10328_v22 = vld [vmem:[#allocation2_spill] sm:$0xff] }
 0x26f   : > { %7754 = vmatmul.mubr.msk.bf16.gmra.mrb[44].mxu1 %vm284_vm3, %v8155_v31  ;;  %7701 = vmatprep.mubr.msk.bf16.mxu0 %vm8228_vm2, %v10307_v4  ;;  %v10330_v35 = vmax.f32 %v10328_v22, %v10329_v5 }
 0x270   : > { %v2690_v9 = vmax.f32 %v2665_v15, 0.0  ;;  %7757 = vmatprep.mubr.msk.bf16.mxu1 %vm8228_vm2, %v10307_v4  ;;  %v2666_v48 = vadd.f32 %v9310_v33, %v2641_v54 }
 0x271   : > { %v2311_v44 = vpop.f32.mrb[196].mxu0 }
 0x272   : > { %v6681_v52 = vpack.c.bf16 %v2690_v9, %v2689_v61  ;;  %v2353_v0 = vmax.f32 %v10324_v39, %v2311_v44  ;;  %v2600_v11 = vpop.f32.mrb[196].mxu1  ;;  %v7475_v58 = vpop.f32.mrb[197].mxu0  ;;  %v2691_v56 = vmax.f32 %v2666_v48, 0.0  ;;  %v8163_v48 = vld [vmem:[%s8287_s22 + $0x51c] sm:$0xff]  }
 0x273   : > { %v7531_v8 = vpop.f32.mrb[197].mxu1  ;;  %v2314_v42 = vpop.f32.mrb[198].mxu0 }
 0x274   : > { %6827 = vst [vmem:[%s8825_s30 + $0xa8] sm:$0xff] %v6681_v52   ;;  %v2642_v29 = vmax.f32 %v2353_v0, %v2600_v11  ;;  %v2354_v20 = vmax.f32 %v10325_v18, %v2314_v42  ;;  %v2603_v59 = vpop.f32.mrb[198].mxu1  ;;  %v7476_v46 = vpop.f32.mrb[199].mxu0  ;;  %v8215_v52 = vld [vmem:[%s10266_s1] sm:$0xff]  }
 0x275   : > { %v7532_v16 = vpop.f32.mrb[199].mxu1 }
 0x276   : > { %v2667_v45 = vadd.f32 %v9310_v33, %v2642_v29  ;;  %v2643_v30 = vmax.f32 %v2354_v20, %v2603_v59  ;;  %7702 = vmatmul.mubr.msk.bf16.gmra.mrb[48].mxu0 %vm284_vm3, %v8156_v38  ;;  %v8162_v38 = vld [vmem:[%s8287_s22 + $0x4b8] sm:$0xff]  }
 0x277   : > { %7758 = vmatmul.mubr.msk.bf16.gmra.mrb[48].mxu1 %vm284_vm3, %v8157_v32  ;;  %7705 = vmatprep.mubr.msk.bf16.mxu0 %vm8228_vm2, %v10307_v4 }
 0x278   : > { %v2692_v27 = vmax.f32 %v2667_v45, 0.0  ;;  %7761 = vmatprep.mubr.msk.bf16.mxu1 %vm8228_vm2, %v10307_v4  ;;  %v2668_v19 = vadd.f32 %v9310_v33, %v2643_v30 }
 0x279   : > { %v2319_v12 = vpop.f32.mrb[200].mxu0 }
 0x27a   : > { %v6686_v25 = vpack.c.bf16 %v2692_v27, %v2691_v56  ;;  %v2355_v50 = vmax.f32 %v10326_v47, %v2319_v12  ;;  %v2608_v62 = vpop.f32.mrb[200].mxu1  ;;  %v7479_v63 = vpop.f32.mrb[201].mxu0  ;;  %v2693_v24 = vmax.f32 %v2668_v19, 0.0  ;;  %v8165_v12 = vld [vmem:[%s8287_s22 + $0x524] sm:$0xff]  }
 0x27b   : > { %v7535_v21 = vpop.f32.mrb[201].mxu1  ;;  %v2322_v41 = vpop.f32.mrb[202].mxu0 }
 0x27c   : > { %6828 = vst [vmem:[%s8825_s30 + $0xb0] sm:$0xff] %v6686_v25   ;;  %v2644_v2 = vmax.f32 %v2355_v50, %v2608_v62  ;;  %v2356_v53 = vmax.f32 %v10327_v34, %v2322_v41  ;;  %v2611_v13 = vpop.f32.mrb[202].mxu1  ;;  %v7480_v55 = vpop.f32.mrb[203].mxu0  ;;  %v8166_v41 = vld [vmem:[%s8287_s22 + $0x4c8] sm:$0xff]  }
 0x27d   : > { %v7536_v40 = vpop.f32.mrb[203].mxu1  ;;  %v8167_v34 = vld [vmem:[%s8287_s22 + $0x52c] sm:$0xff]   ;;  %v8189_v50 = vld [vmem:[%s8287_s22 + $0x5e4] sm:$0xff]  }
 0x27e   : > { %v2669_v28 = vadd.f32 %v9310_v33, %v2644_v2  ;;  %v2645_v60 = vmax.f32 %v2356_v53, %v2611_v13  ;;  %7706 = vmatmul.mubr.msk.bf16.gmra.mrb[52].mxu0 %vm284_vm3, %v8158_v1 }
 0x27f   : > { %7762 = vmatmul.mubr.msk.bf16.gmra.mrb[52].mxu1 %vm284_vm3, %v8159_v37  ;;  %7769 = vmatprep.mubr.msk.bf16.mxu0 %vm8228_vm2, %v10307_v4 }
 0x280   : > { %v2694_v57 = vmax.f32 %v2669_v28, 0.0  ;;  %v2670_v10 = vadd.f32 %v9310_v33, %v2645_v60  ;;  %7825 = vmatprep.mubr.msk.bf16.mxu1 %vm8228_vm2, %v10307_v4 }
 0x281   : > { %v2327_v51 = vpop.f32.mrb[204].mxu0 }
 0x282   : > { %v6691_v49 = vpack.c.bf16 %v2694_v57, %v2693_v24  ;;  %v2695_v17 = vmax.f32 %v2670_v10, 0.0  ;;  %v2357_v31 = vmax.f32 %v10330_v35, %v2327_v51  ;;  %v2616_v3 = vpop.f32.mrb[204].mxu1  ;;  %v7483_v36 = vpop.f32.mrb[205].mxu0  ;;  %v8168_v57 = vld [vmem:[%s8287_s22 + $0x4d0] sm:$0xff]  }
 0x283   : > { %v7539_v14 = vpop.f32.mrb[205].mxu1  ;;  %v2330_v23 = vpop.f32.mrb[206].mxu0 }
 0x284   : > { %6829 = vst [vmem:[%s8825_s30 + $0xb8] sm:$0xff] %v6691_v49   ;;  %v6526_v43 = vpack.c.bf16 %v2695_v17, %v2695_v17  ;;  %v2646_v15 = vmax.f32 %v2357_v31, %v2616_v3  ;;  %v2619_v54 = vpop.f32.mrb[206].mxu1  ;;  %v7484_v61 = vpop.f32.mrb[207].mxu0  ;;  %v8169_v17 = vld [vmem:[%s8287_s22 + $0x534] sm:$0xff]  }
 0x285   : > { %v7540_v9 = vpop.f32.mrb[207].mxu1  ;;  %v8170_v14 = vld [vmem:[%s8287_s22 + $0x4d8] sm:$0xff]  }
 0x286   : > { %5966 = vst [vmem:[%s8825_s30 + $0xc0] sm:$0xf] %v6526_v43  ;;  %v2671_v44 = vadd.f32 %v9310_v33, %v2646_v15  ;;  %7770 = vmatmul.mubr.msk.bf16.vlgmr.msra.gmra.mrb[56].mxu0 %vm284_vm3, %v8160_v7  ;;  %v8171_v15 = vld [vmem:[%s8287_s22 + $0x53c] sm:$0xff]  }
 0x287   : > { %7826 = vmatmul.mubr.msk.bf16.vlgmr.msra.gmra.mrb[56].mxu1 %vm284_vm3, %v8161_v26  ;;  %7878 = vmatpush3.bf16.msra.mxu0 %v8215_v52 }
 0x288   : > { %v2696_v39 = vmax.f32 %v2671_v44, 0.0  ;;  %7934 = vmatpush3.bf16.msra.mxu1 %v8215_v52  ;;  %7773 = vmatprep.mubr.msk.bf16.mxu0 %vm8228_vm2, %v10307_v4 }
 0x289   : > { %v9522_v0 = vpop.f32.mrb[208].mxu0  ;;  %7829 = vmatprep.mubr.msk.bf16.mxu1 %vm8228_vm2, %v10307_v4  ;;  %7879 = vmatprep.subr.bf16.mxu0 %v10307_v4 }
 0x28a   : > { %v6527_v33 = vpack.c.bf16 %v2696_v39, %v2696_v39  ;;  %v9527_v11 = vpop.f32.mrb[208].mxu1  ;;  %v7547_v58 = vpop.f32.mrb[209].mxu0  ;;  %7935 = vmatprep.subr.bf16.mxu1 %v10307_v4 }
 0x28b   : > { %v3352_v8 = vmax.f32 %v9522_v0, %v9527_v11  ;;  %v7603_v42 = vpop.f32.mrb[209].mxu1  ;;  %v9533_v32 = vpop.f32.mrb[210].mxu0  ;;  %7880 = vmatpush3.bf16.msra.mxu0 %v8275_v6  ;;  %v8172_v58 = vld [vmem:[%s8287_s22 + $0x4e0] sm:$0xff]  }
 0x28c   : > { %5967 = vst [vmem:[%s8825_s30 + $0xc4] sm:$0x3] %v6527_v33  ;;  %v9538_v29 = vpop.f32.mrb[210].mxu1  ;;  %v7548_v18 = vpop.f32.mrb[211].mxu0  ;;  %7936 = vmatpush3.bf16.msra.mxu1 %v8275_v6  ;;  %v8164_v6 = vld [vmem:[%s8287_s22 + $0x4c0] sm:$0xff]  }
 0x28d   : > { %v3353_v20 = vmax.f32 %v9533_v32, %v9538_v29  ;;  %v7604_v59 = vpop.f32.mrb[211].mxu1  ;;  %v8173_v18 = vld [vmem:[%s8287_s22 + $0x544] sm:$0xff]   ;;  %v9794_v0 = vld [vmem:[%s10267_s2] ss:$0 sm:$0xff] }
 0x28e   : > { %7774 = vmatmul.mubr.msk.bf16.gmra.mrb[60].mxu0 %vm284_vm3, %v8162_v38 }
 0x28f   : > { %7830 = vmatmul.mubr.msk.bf16.gmra.mrb[60].mxu1 %vm284_vm3, %v8163_v48  ;;  %7777 = vmatprep.mubr.msk.bf16.mxu0 %vm8228_vm2, %v10307_v4 }
 0x290   : > { %7833 = vmatprep.mubr.msk.bf16.mxu1 %vm8228_vm2, %v10307_v4 }
 0x291   : > { %v9549_v46 = vpop.f32.mrb[212].mxu0 }
 0x292   : > { %v9551_v16 = vpop.f32.mrb[212].mxu1  ;;  %v7551_v45 = vpop.f32.mrb[213].mxu0 }
 0x293   : > { %v7607_v56 = vpop.f32.mrb[213].mxu1  ;;  %v9556_v27 = vpop.f32.mrb[214].mxu0 }
 0x294   : > { %v9559_v25 = vpop.f32.mrb[214].mxu1  ;;  %v7552_v47 = vpop.f32.mrb[215].mxu0 }
 0x295   : > { %v7608_v62 = vpop.f32.mrb[215].mxu1 }
 0x296   : > { %7778 = vmatmul.mubr.msk.bf16.gmra.mrb[64].mxu0 %vm284_vm3, %v8164_v6 }
 0x297   : > { %7834 = vmatmul.mubr.msk.bf16.gmra.mrb[64].mxu1 %vm284_vm3, %v8165_v12  ;;  %7781 = vmatprep.mubr.msk.bf16.mxu0 %vm8228_vm2, %v10307_v4 }
 0x298   : > { %7837 = vmatprep.mubr.msk.bf16.mxu1 %vm8228_vm2, %v10307_v4 }
 0x299   : > { %v9569_v63 = vpop.f32.mrb[216].mxu0 }
 0x29a   : > { %v9571_v1 = vpop.f32.mrb[216].mxu1  ;;  %v7555_v21 = vpop.f32.mrb[217].mxu0 }
 0x29b   : > { %v7611_v19 = vpop.f32.mrb[217].mxu1  ;;  %v9576_v2 = vpop.f32.mrb[218].mxu0  ;;  %v8174_v21 = vld [vmem:[%s8287_s22 + $0x4e8] sm:$0xff]  }
 0x29c   : > { %v9579_v53 = vpop.f32.mrb[218].mxu1  ;;  %v7556_v13 = vpop.f32.mrb[219].mxu0 }
 0x29d   : > { %v7612_v40 = vpop.f32.mrb[219].mxu1  ;;  %v8175_v13 = vld [vmem:[%s8287_s22 + $0x54c] sm:$0xff]  }
 0x29e   : > { %7782 = vmatmul.mubr.msk.bf16.gmra.mrb[68].mxu0 %vm284_vm3, %v8166_v41 }
 0x29f   : > { %7838 = vmatmul.mubr.msk.bf16.gmra.mrb[68].mxu1 %vm284_vm3, %v8167_v34  ;;  %7785 = vmatprep.mubr.msk.bf16.mxu0 %vm8228_vm2, %v10307_v4 }
 0x2a0   : > { %7841 = vmatprep.mubr.msk.bf16.mxu1 %vm8228_vm2, %v10307_v4 }
 0x2a1   : > { %v9589_v28 = vpop.f32.mrb[220].mxu0 }
 0x2a2   : > { %v9591_v60 = vpop.f32.mrb[220].mxu1  ;;  %v7559_v24 = vpop.f32.mrb[221].mxu0 }
 0x2a3   : > { %v7615_v51 = vpop.f32.mrb[221].mxu1  ;;  %v9596_v49 = vpop.f32.mrb[222].mxu0 }
 0x2a4   : > { %v9599_v22 = vpop.f32.mrb[222].mxu1  ;;  %v7560_v5 = vpop.f32.mrb[223].mxu0 }
 0x2a5   : > { %v7616_v31 = vpop.f32.mrb[223].mxu1 }
 0x2a6   : > { %7786 = vmatmul.mubr.msk.bf16.gmra.mrb[72].mxu0 %vm284_vm3, %v8168_v57 }
 0x2a7   : > { %7842 = vmatmul.mubr.msk.bf16.gmra.mrb[72].mxu1 %vm284_vm3, %v8169_v17  ;;  %7789 = vmatprep.mubr.msk.bf16.mxu0 %vm8228_vm2, %v10307_v4 }
 0x2a8   : > { %7845 = vmatprep.mubr.msk.bf16.mxu1 %vm8228_vm2, %v10307_v4 }
 0x2a9   : > { %v9609_v3 = vpop.f32.mrb[224].mxu0 }
 0x2aa   : > { %v9611_v36 = vpop.f32.mrb[224].mxu1  ;;  %v7563_v7 = vpop.f32.mrb[225].mxu0 }
 0x2ab   : > { %v7619_v26 = vpop.f32.mrb[225].mxu1  ;;  %v9616_v43 = vpop.f32.mrb[226].mxu0  ;;  %v8176_v7 = vld [vmem:[%s8287_s22 + $0x4f0] sm:$0xff]  }
 0x2ac   : > { %v9619_v54 = vpop.f32.mrb[226].mxu1  ;;  %v7564_v61 = vpop.f32.mrb[227].mxu0 }
 0x2ad   : > { %v7620_v44 = vpop.f32.mrb[227].mxu1  ;;  %v8177_v61 = vld [vmem:[%s8287_s22 + $0x554] sm:$0xff]  }
 0x2ae   : > { %7790 = vmatmul.mubr.msk.bf16.gmra.mrb[76].mxu0 %vm284_vm3, %v8170_v14 }
 0x2af   : > { %7846 = vmatmul.mubr.msk.bf16.gmra.mrb[76].mxu1 %vm284_vm3, %v8171_v15  ;;  %7793 = vmatprep.mubr.msk.bf16.mxu0 %vm8228_vm2, %v10307_v4 }
 0x2b0   : > { %7849 = vmatprep.mubr.msk.bf16.mxu1 %vm8228_vm2, %v10307_v4 }
 0x2b1   : > { %v9629_v52 = vpop.f32.mrb[228].mxu0 }
 0x2b2   : > { %v9631_v39 = vpop.f32.mrb[228].mxu1  ;;  %v7567_v33 = vpop.f32.mrb[229].mxu0 }
 0x2b3   : > { %v7623_v42 = vpop.f32.mrb[229].mxu1  ;;  %v9636_v48 = vpop.f32.mrb[230].mxu0 }
 0x2b4   : > { %v9639_v59 = vpop.f32.mrb[230].mxu1  ;;  %v7568_v45 = vpop.f32.mrb[231].mxu0 }
 0x2b5   : > { %v7624_v56 = vpop.f32.mrb[231].mxu1 }
 0x2b6   : > { %7794 = vmatmul.mubr.msk.bf16.gmra.mrb[80].mxu0 %vm284_vm3, %v8172_v58 }
 0x2b7   : > { %7850 = vmatmul.mubr.msk.bf16.gmra.mrb[80].mxu1 %vm284_vm3, %v8173_v18  ;;  %7797 = vmatprep.mubr.msk.bf16.mxu0 %vm8228_vm2, %v10307_v4 }
 0x2b8   : > { %7853 = vmatprep.mubr.msk.bf16.mxu1 %vm8228_vm2, %v10307_v4 }
 0x2b9   : > { %v9649_v12 = vpop.f32.mrb[232].mxu0 }
 0x2ba   : > { %v9651_v47 = vpop.f32.mrb[232].mxu1  ;;  %v7571_v62 = vpop.f32.mrb[233].mxu0 }
 0x2bb   : > { %v7627_v19 = vpop.f32.mrb[233].mxu1  ;;  %v9656_v34 = vpop.f32.mrb[234].mxu0  ;;  %v8178_v62 = vld [vmem:[%s8287_s22 + $0x4f8] sm:$0xff]  }
 0x2bc   : > { %v9659_v40 = vpop.f32.mrb[234].mxu1  ;;  %v7572_v24 = vpop.f32.mrb[235].mxu0 }
 0x2bd   : > { %v7628_v51 = vpop.f32.mrb[235].mxu1  ;;  %v8179_v24 = vld [vmem:[%s8287_s22 + $0x55c] sm:$0xff]  }
 0x2be   : > { %7798 = vmatmul.mubr.msk.bf16.gmra.mrb[84].mxu0 %vm284_vm3, %v8174_v21 }
 0x2bf   : > { %7854 = vmatmul.mubr.msk.bf16.gmra.mrb[84].mxu1 %vm284_vm3, %v8175_v13  ;;  %7801 = vmatprep.mubr.msk.bf16.mxu0 %vm8228_vm2, %v10307_v4 }
 0x2c0   : > { %7857 = vmatprep.mubr.msk.bf16.mxu1 %vm8228_vm2, %v10307_v4 }
 0x2c1   : > { %v9669_v17 = vpop.f32.mrb[236].mxu0 }
 0x2c2   : > { %v9671_v5 = vpop.f32.mrb[236].mxu1  ;;  %v7575_v31 = vpop.f32.mrb[237].mxu0 }
 0x2c3   : > { %v7631_v26 = vpop.f32.mrb[237].mxu1  ;;  %v9676_v15 = vpop.f32.mrb[238].mxu0 }
 0x2c4   : > { %v9679_v44 = vpop.f32.mrb[238].mxu1  ;;  %v7576_v33 = vpop.f32.mrb[239].mxu0 }
 0x2c5   : > { %v7632_v42 = vpop.f32.mrb[239].mxu1 }
 0x2c6   : > { %7802 = vmatmul.mubr.msk.bf16.gmra.mrb[88].mxu0 %vm284_vm3, %v8176_v7 }
 0x2c7   : > { %7858 = vmatmul.mubr.msk.bf16.gmra.mrb[88].mxu1 %vm284_vm3, %v8177_v61  ;;  %7805 = vmatprep.mubr.msk.bf16.mxu0 %vm8228_vm2, %v10307_v4 }
 0x2c8   : > { %7861 = vmatprep.mubr.msk.bf16.mxu1 %vm8228_vm2, %v10307_v4 }
 0x2c9   : > { %v9689_v18 = vpop.f32.mrb[240].mxu0 }
 0x2ca   : > { %v9691_v45 = vpop.f32.mrb[240].mxu1  ;;  %v7579_v56 = vpop.f32.mrb[241].mxu0 }
 0x2cb   : > { %v7635_v19 = vpop.f32.mrb[241].mxu1  ;;  %v9696_v13 = vpop.f32.mrb[242].mxu0  ;;  %v8180_v56 = vld [vmem:[%s8287_s22 + $0x500] sm:$0xff]  }
 0x2cc   : > { %v9699_v51 = vpop.f32.mrb[242].mxu1  ;;  %v7580_v31 = vpop.f32.mrb[243].mxu0 }
 0x2cd   : > { %v7636_v26 = vpop.f32.mrb[243].mxu1 }
 0x2ce   : > { %7806 = vmatmul.mubr.msk.bf16.gmra.mrb[92].mxu0 %vm284_vm3, %v8178_v62 }
 0x2cf   : > { %7862 = vmatmul.mubr.msk.bf16.gmra.mrb[92].mxu1 %vm284_vm3, %v8179_v24  ;;  %7809 = vmatprep.mubr.msk.bf16.mxu0 %vm8228_vm2, %v10307_v4  ;;  %v8181_v24 = vld [vmem:[%s8287_s22 + $0x564] sm:$0xff]  }
 0x2d0   : > { %7865 = vmatprep.mubr.msk.bf16.mxu1 %vm8228_vm2, %v10307_v4 }
 0x2d1   : > { %v9709_v61 = vpop.f32.mrb[244].mxu0 }
 0x2d2   : > { %v9711_v33 = vpop.f32.mrb[244].mxu1  ;;  %v7583_v42 = vpop.f32.mrb[245].mxu0 }
 0x2d3   : > { %v7639_v31 = vpop.f32.mrb[245].mxu1  ;;  %v9716_v62 = vpop.f32.mrb[246].mxu0 }
 0x2d4   : > { %v9719_v26 = vpop.f32.mrb[246].mxu1  ;;  %v7584_v7 = vpop.f32.mrb[247].mxu0 }
 0x2d5   : > { %v7640_v58 = vpop.f32.mrb[247].mxu1  ;;  %v8182_v7 = vld [vmem:[%s8287_s22 + $0x508] sm:$0xff]  }
 0x2d6   : > { %7810 = vmatmul.mubr.msk.bf16.gmra.mrb[96].mxu0 %vm284_vm3, %v8180_v56 }
 0x2d7   : > { %7866 = vmatmul.mubr.msk.bf16.gmra.mrb[96].mxu1 %vm284_vm3, %v8181_v24  ;;  %7813 = vmatprep.mubr.msk.bf16.mxu0 %vm8228_vm2, %v10307_v4  ;;  %v8183_v24 = vld [vmem:[%s8287_s22 + $0x56c] sm:$0xff]  }
 0x2d8   : > { %7869 = vmatprep.mubr.msk.bf16.mxu1 %vm8228_vm2, %v10307_v4 }
 0x2d9   : > { %v9729_v42 = vpop.f32.mrb[248].mxu0 }
 0x2da   : > { %v9731_v31 = vpop.f32.mrb[248].mxu1  ;;  %v7587_v19 = vpop.f32.mrb[249].mxu0 }
 0x2db   : > { %v7643_v21 = vpop.f32.mrb[249].mxu1  ;;  %v9736_v56 = vpop.f32.mrb[250].mxu0 }
 0x2dc   : > { %v9739_v14 = vpop.f32.mrb[250].mxu1  ;;  %v7588_v57 = vpop.f32.mrb[251].mxu0 }
 0x2dd   : > { %v7644_v6 = vpop.f32.mrb[251].mxu1  ;;  %v8184_v57 = vld [vmem:[%s8287_s22 + $0x510] ss:$0 sps:$4 sm:$0x33]  }
 0x2de   : > { %7814 = vmatmul.mubr.msk.bf16.gmra.mrb[100].mxu0 %vm284_vm3, %v8182_v7 }
 0x2df   : > { %7870 = vmatmul.mubr.msk.bf16.gmra.mrb[100].mxu1 %vm284_vm3, %v8183_v24  ;;  %7817 = vmatprep.mubr.msk.bf16.mxu0 %vm8228_vm2, %v10307_v4  ;;  %v8185_v24 = vld [vmem:[%s8287_s22 + $0x574] ss:$0 sps:$4 sm:$0x33]  }
 0x2e0   : > { %7873 = vmatprep.mubr.msk.bf16.mxu1 %vm8228_vm2, %v10307_v4 }
 0x2e1   : > { %v9749_v21 = vpop.f32.mrb[252].mxu0 }
 0x2e2   : > { %v9751_v19 = vpop.f32.mrb[252].mxu1  ;;  %v7591_v58 = vpop.f32.mrb[253].mxu0 }
 0x2e3   : > { %v7647_v41 = vpop.f32.mrb[253].mxu1  ;;  %v9756_v7 = vpop.f32.mrb[254].mxu0 }
 0x2e4   : > { %v9759_v38 = vpop.f32.mrb[254].mxu1  ;;  %v7592_v9 = vpop.f32.mrb[255].mxu0 }
 0x2e5   : > { %10331 = vst [vmem:[#allocation2_spill] sm:$0xff] %v9759_v38  ;;  %v7648_v35 = vpop.f32.mrb[255].mxu1  ;;  %v8186_v9 = vld [vmem:[%s8287_s22 + $0x578] sm:$0xff]  }
 0x2e6   : > { %7818 = vmatmul.mubr.msk.bf16.gmra.mrb[104].mxu0 %vm284_vm3, %v8184_v57 }
 0x2e7   : > { %7874 = vmatmul.mubr.msk.bf16.gmra.mrb[104].mxu1 %vm284_vm3, %v8185_v24  ;;  %7881 = vmatprep.mubr.msk.bf16.mxu0 %vm8228_vm2, %v10307_v4  ;;  %v8187_v24 = vld [vmem:[%s8287_s22 + $0x5dc] sm:$0xff]  }
 0x2e8   : > { %7937 = vmatprep.mubr.msk.bf16.mxu1 %vm8228_vm2, %v10307_v4 }
 0x2e9   : > { %v9769_v41 = vpop.f32.mrb[0].mxu0 }
 0x2ea   : > { %10332 = vst [vmem:[#allocation3_spill] sm:$0xff] %v9769_v41  ;;  %v9771_v58 = vpop.f32.mrb[0].mxu1  ;;  %v7595_v6 = vpop.f32.mrb[1].mxu0 }
 0x2eb   : > { %10333 = vst [vmem:[#allocation4_spill] sm:$0xff] %v9771_v58  ;;  %v7651_v23 = vpop.f32.mrb[1].mxu1  ;;  %v3085_v57 = vpop.f32.mrb[2].mxu0 }
 0x2ec   : > { %v3349_v10 = vpop.f32.mrb[2].mxu1  ;;  %v7596_v55 = vpop.f32.mrb[3].mxu0 }
 0x2ed   : > { %v7652_v37 = vpop.f32.mrb[3].mxu1  ;;  %v8188_v10 = vld [vmem:[%s8287_s22 + $0x580] sm:$0xff]  }
 0x2ee   : > { %7882 = vmatmul.mubr.msk.bf16.vlgmr.msra.gmra.mrb[108].mxu0 %vm284_vm3, %v8186_v9 }
 0x2ef   : > { %7938 = vmatmul.mubr.msk.bf16.vlgmr.msra.gmra.mrb[108].mxu1 %vm284_vm3, %v8187_v24  ;;  %7885 = vmatprep.mubr.msk.bf16.mxu0 %vm8228_vm2, %v10307_v4 }
 0x2f0   : > { %7941 = vmatprep.mubr.msk.bf16.mxu1 %vm8228_vm2, %v10307_v4 }
 0x2f1   : > { %v3539_v6 = vpop.f32.mrb[4].mxu0 }
 0x2f2   : > { %v3641_v23 = vmax.f32 %v3352_v8, %v3539_v6  ;;  %v3828_v57 = vpop.f32.mrb[4].mxu1  ;;  %v7659_v35 = vpop.f32.mrb[5].mxu0 }
 0x2f3   : > { %v7715_v55 = vpop.f32.mrb[5].mxu1  ;;  %v3542_v37 = vpop.f32.mrb[6].mxu0 }
 0x2f4   : > { %v3930_v9 = vmax.f32 %v3641_v23, %v3828_v57  ;;  %v3642_v24 = vmax.f32 %v3353_v20, %v3542_v37  ;;  %v3831_v30 = vpop.f32.mrb[6].mxu1  ;;  %v7660_v58 = vpop.f32.mrb[7].mxu0  ;;  %v8190_v23 = vld [vmem:[%s8287_s22 + $0x588] sm:$0xff]  }
 0x2f5   : > { %v7716_v41 = vpop.f32.mrb[7].mxu1  ;;  %v10334_v58 = vmax.f32 %v9549_v46, %v9551_v16 }
 0x2f6   : > { %v3955_v11 = vadd.f32 %v9794_v0, %v3930_v9  ;;  %v3931_v8 = vmax.f32 %v3642_v24, %v3831_v30  ;;  %7886 = vmatmul.mubr.msk.bf16.gmra.mrb[112].mxu0 %vm284_vm3, %v8188_v10  ;;  %v8191_v10 = vld [vmem:[%s8287_s22 + $0x5ec] sm:$0xff]   ;;  %v10335_v9 = vmax.f32 %v9556_v27, %v9559_v25 }
 0x2f7   : > { %7942 = vmatmul.mubr.msk.bf16.gmra.mrb[112].mxu1 %vm284_vm3, %v8189_v50  ;;  %7889 = vmatprep.mubr.msk.bf16.mxu0 %vm8228_vm2, %v10307_v4 }
 0x2f8   : > { %v3956_v32 = vadd.f32 %v9794_v0, %v3931_v8  ;;  %7945 = vmatprep.mubr.msk.bf16.mxu1 %vm8228_vm2, %v10307_v4  ;;  %v3980_v20 = vmax.f32 %v3955_v11, 0.0 }
 0x2f9   : > { %v3547_v29 = vpop.f32.mrb[8].mxu0 }
 0x2fa   : > { %v3981_v41 = vmax.f32 %v3956_v32, 0.0  ;;  %v3643_v30 = vmax.f32 %v10334_v58, %v3547_v29  ;;  %v3836_v35 = vpop.f32.mrb[8].mxu1  ;;  %v7663_v6 = vpop.f32.mrb[9].mxu0  ;;  %v10336_v29 = vmax.f32 %v9569_v63, %v9571_v1 }
 0x2fb   : > { %v7719_v50 = vpop.f32.mrb[9].mxu1  ;;  %v3550_v57 = vpop.f32.mrb[10].mxu0 }
 0x2fc   : > { %v6696_v55 = vpack.c.bf16 %v3981_v41, %v3980_v20  ;;  %v3932_v37 = vmax.f32 %v3643_v30, %v3836_v35  ;;  %v3644_v24 = vmax.f32 %v10335_v9, %v3550_v57  ;;  %v3839_v8 = vpop.f32.mrb[10].mxu1  ;;  %v7664_v38 = vpop.f32.mrb[11].mxu0  ;;  %v8192_v30 = vld [vmem:[%s8287_s22 + $0x590] sm:$0xff]  }
 0x2fd   : > { %v7720_v11 = vpop.f32.mrb[11].mxu1 }
 0x2fe   : > { %6830 = vst [vmem:[%s8825_s30 + $0xc8] sm:$0xff] %v6696_v55   ;;  %v3957_v46 = vadd.f32 %v9794_v0, %v3932_v37  ;;  %v3933_v16 = vmax.f32 %v3644_v24, %v3839_v8  ;;  %7890 = vmatmul.mubr.msk.bf16.gmra.mrb[116].mxu0 %vm284_vm3, %v8190_v23  ;;  %v8193_v23 = vld [vmem:[%s8287_s22 + $0x5f4] sm:$0xff]  }
 0x2ff   : > { %7946 = vmatmul.mubr.msk.bf16.gmra.mrb[116].mxu1 %vm284_vm3, %v8191_v10  ;;  %7893 = vmatprep.mubr.msk.bf16.mxu0 %vm8228_vm2, %v10307_v4  ;;  %v10337_v10 = vmax.f32 %v9576_v2, %v9579_v53 }
 0x300   : > { %v3958_v32 = vadd.f32 %v9794_v0, %v3933_v16  ;;  %7949 = vmatprep.mubr.msk.bf16.mxu1 %vm8228_vm2, %v10307_v4  ;;  %v3982_v25 = vmax.f32 %v3957_v46, 0.0  ;;  %v10338_v46 = vmax.f32 %v9589_v28, %v9591_v60 }
 0x301   : > { %v3555_v27 = vpop.f32.mrb[12].mxu0 }
 0x302   : > { %v3983_v38 = vmax.f32 %v3958_v32, 0.0  ;;  %v3645_v20 = vmax.f32 %v10336_v29, %v3555_v27  ;;  %v3844_v41 = vpop.f32.mrb[12].mxu1  ;;  %v7667_v58 = vpop.f32.mrb[13].mxu0 }
 0x303   : > { %v7723_v35 = vpop.f32.mrb[13].mxu1  ;;  %v3558_v6 = vpop.f32.mrb[14].mxu0 }
 0x304   : > { %v6701_v50 = vpack.c.bf16 %v3983_v38, %v3982_v25  ;;  %v3934_v57 = vmax.f32 %v3645_v20, %v3844_v41  ;;  %v3646_v55 = vmax.f32 %v10337_v10, %v3558_v6  ;;  %v3847_v37 = vpop.f32.mrb[14].mxu1  ;;  %v7668_v9 = vpop.f32.mrb[15].mxu0  ;;  %v8194_v25 = vld [vmem:[%s8287_s22 + $0x598] sm:$0xff]  }
 0x305   : > { %v7724_v24 = vpop.f32.mrb[15].mxu1  ;;  %v8195_v20 = vld [vmem:[%s8287_s22 + $0x5fc] sm:$0xff]  }
 0x306   : > { %6831 = vst [vmem:[%s8825_s30 + $0xd0] sm:$0xff] %v6701_v50   ;;  %v3959_v63 = vadd.f32 %v9794_v0, %v3934_v57  ;;  %v3935_v1 = vmax.f32 %v3646_v55, %v3847_v37  ;;  %7894 = vmatmul.mubr.msk.bf16.gmra.mrb[120].mxu0 %vm284_vm3, %v8192_v30  ;;  %v10339_v30 = vmax.f32 %v9596_v49, %v9599_v22 }
 0x307   : > { %7950 = vmatmul.mubr.msk.bf16.gmra.mrb[120].mxu1 %vm284_vm3, %v8193_v23  ;;  %7897 = vmatprep.mubr.msk.bf16.mxu0 %vm8228_vm2, %v10307_v4  ;;  %v10340_v55 = vmax.f32 %v9609_v3, %v9611_v36 }
 0x308   : > { %v3960_v8 = vadd.f32 %v9794_v0, %v3935_v1  ;;  %7953 = vmatprep.mubr.msk.bf16.mxu1 %vm8228_vm2, %v10307_v4  ;;  %v3984_v53 = vmax.f32 %v3959_v63, 0.0  ;;  %v8196_v63 = vld [vmem:[%s8287_s22 + $0x5a0] sm:$0xff]  }
 0x309   : > { %v3563_v2 = vpop.f32.mrb[16].mxu0 }
 0x30a   : > { %v3985_v11 = vmax.f32 %v3960_v8, 0.0  ;;  %v3647_v16 = vmax.f32 %v10338_v46, %v3563_v2  ;;  %v3852_v32 = vpop.f32.mrb[16].mxu1  ;;  %v7671_v27 = vpop.f32.mrb[17].mxu0  ;;  %v8197_v2 = vld [vmem:[%s8287_s22 + $0x604] sm:$0xff]   ;;  %v10341_v46 = vmax.f32 %v9616_v43, %v9619_v54 }
 0x30b   : > { %v7727_v38 = vpop.f32.mrb[17].mxu1  ;;  %v3566_v29 = vpop.f32.mrb[18].mxu0 }
 0x30c   : > { %v6706_v41 = vpack.c.bf16 %v3985_v11, %v3984_v53  ;;  %v3936_v58 = vmax.f32 %v3647_v16, %v3852_v32  ;;  %v3648_v35 = vmax.f32 %v10339_v30, %v3566_v29  ;;  %v3855_v6 = vpop.f32.mrb[18].mxu1  ;;  %v7672_v23 = vpop.f32.mrb[19].mxu0 }
 0x30d   : > { %v7728_v50 = vpop.f32.mrb[19].mxu1 }
 0x30e   : > { %6832 = vst [vmem:[%s8825_s30 + $0xd8] sm:$0xff] %v6706_v41   ;;  %v3961_v28 = vadd.f32 %v9794_v0, %v3936_v58  ;;  %v3937_v60 = vmax.f32 %v3648_v35, %v3855_v6  ;;  %7898 = vmatmul.mubr.msk.bf16.gmra.mrb[124].mxu0 %vm284_vm3, %v8194_v25  ;;  %v8198_v35 = vld [vmem:[%s8287_s22 + $0x5a8] sm:$0xff]  }
 0x30f   : > { %7954 = vmatmul.mubr.msk.bf16.gmra.mrb[124].mxu1 %vm284_vm3, %v8195_v20  ;;  %7901 = vmatprep.mubr.msk.bf16.mxu0 %vm8228_vm2, %v10307_v4  ;;  %v10342_v20 = vmax.f32 %v9629_v52, %v9631_v39  ;;  %v8199_v50 = vld [vmem:[%s8287_s22 + $0x60c] sm:$0xff]  }
 0x310   : > { %v3962_v57 = vadd.f32 %v9794_v0, %v3937_v60  ;;  %7957 = vmatprep.mubr.msk.bf16.mxu1 %vm8228_vm2, %v10307_v4  ;;  %v3986_v22 = vmax.f32 %v3961_v28, 0.0 }
 0x311   : > { %v3571_v49 = vpop.f32.mrb[20].mxu0 }
 0x312   : > { %v3987_v10 = vmax.f32 %v3962_v57, 0.0  ;;  %v3649_v37 = vmax.f32 %v10340_v55, %v3571_v49  ;;  %v3860_v9 = vpop.f32.mrb[20].mxu1  ;;  %v7675_v24 = vpop.f32.mrb[21].mxu0  ;;  %v10343_v57 = vmax.f32 %v9636_v48, %v9639_v59 }
 0x313   : > { %v7731_v1 = vpop.f32.mrb[21].mxu1  ;;  %v3574_v8 = vpop.f32.mrb[22].mxu0  ;;  %v10344_v24 = vmax.f32 %v9649_v12, %v9651_v47 }
 0x314   : > { %v6711_v53 = vpack.c.bf16 %v3987_v10, %v3986_v22  ;;  %v3938_v11 = vmax.f32 %v3649_v37, %v3860_v9  ;;  %v3650_v16 = vmax.f32 %v10341_v46, %v3574_v8  ;;  %v3863_v32 = vpop.f32.mrb[22].mxu1  ;;  %v7676_v27 = vpop.f32.mrb[23].mxu0  ;;  %v8201_v46 = vld [vmem:[%s8287_s22 + $0x614] sm:$0xff]  }
 0x315   : > { %v7732_v25 = vpop.f32.mrb[23].mxu1  ;;  %v10345_v27 = vmax.f32 %v9656_v34, %v9659_v40 }
 0x316   : > { %6833 = vst [vmem:[%s8825_s30 + $0xe0] sm:$0xff] %v6711_v53   ;;  %v3963_v3 = vadd.f32 %v9794_v0, %v3938_v11  ;;  %v3939_v36 = vmax.f32 %v3650_v16, %v3863_v32  ;;  %7902 = vmatmul.mubr.msk.bf16.gmra.mrb[128].mxu0 %vm284_vm3, %v8196_v63 }
 0x317   : > { %7958 = vmatmul.mubr.msk.bf16.gmra.mrb[128].mxu1 %vm284_vm3, %v8197_v2  ;;  %7905 = vmatprep.mubr.msk.bf16.mxu0 %vm8228_vm2, %v10307_v4  ;;  %v8200_v2 = vld [vmem:[%s8287_s22 + $0x5b0] sm:$0xff]  }
 0x318   : > { %v3964_v38 = vadd.f32 %v9794_v0, %v3939_v36  ;;  %7961 = vmatprep.mubr.msk.bf16.mxu1 %vm8228_vm2, %v10307_v4  ;;  %v3988_v54 = vmax.f32 %v3963_v3, 0.0 }
 0x319   : > { %v3579_v43 = vpop.f32.mrb[24].mxu0 }
 0x31a   : > { %v3989_v29 = vmax.f32 %v3964_v38, 0.0  ;;  %v3651_v41 = vmax.f32 %v10342_v20, %v3579_v43  ;;  %v3868_v58 = vpop.f32.mrb[24].mxu1  ;;  %v7679_v30 = vpop.f32.mrb[25].mxu0 }
 0x31b   : > { %v7735_v6 = vpop.f32.mrb[25].mxu1  ;;  %v3582_v23 = vpop.f32.mrb[26].mxu0  ;;  %v8202_v30 = vld [vmem:[%s8287_s22 + $0x5b8] sm:$0xff]  }
 0x31c   : > { %v6716_v28 = vpack.c.bf16 %v3989_v29, %v3988_v54  ;;  %v3940_v60 = vmax.f32 %v3651_v41, %v3868_v58  ;;  %v3652_v49 = vmax.f32 %v10343_v57, %v3582_v23  ;;  %v3871_v22 = vpop.f32.mrb[26].mxu1  ;;  %v7680_v10 = vpop.f32.mrb[27].mxu0  ;;  %v10346_v29 = vmax.f32 %v9669_v17, %v9671_v5  ;;  %v8203_v23 = vld [vmem:[%s8287_s22 + $0x61c] sm:$0xff]  }
 0x31d   : > { %v7736_v55 = vpop.f32.mrb[27].mxu1 }
 0x31e   : > { %6834 = vst [vmem:[%s8825_s30 + $0xe8] sm:$0xff] %v6716_v28   ;;  %v3965_v52 = vadd.f32 %v9794_v0, %v3940_v60  ;;  %v3941_v39 = vmax.f32 %v3652_v49, %v3871_v22  ;;  %7906 = vmatmul.mubr.msk.bf16.gmra.mrb[132].mxu0 %vm284_vm3, %v8198_v35  ;;  %v10347_v60 = vmax.f32 %v9676_v15, %v9679_v44 }
 0x31f   : > { %7962 = vmatmul.mubr.msk.bf16.gmra.mrb[132].mxu1 %vm284_vm3, %v8199_v50  ;;  %7909 = vmatprep.mubr.msk.bf16.mxu0 %vm8228_vm2, %v10307_v4 }
 0x320   : > { %v3966_v37 = vadd.f32 %v9794_v0, %v3941_v39  ;;  %7965 = vmatprep.mubr.msk.bf16.mxu1 %vm8228_vm2, %v10307_v4  ;;  %v3990_v59 = vmax.f32 %v3965_v52, 0.0  ;;  %v10348_v39 = vmax.f32 %v9689_v18, %v9691_v45 }
 0x321   : > { %v3587_v48 = vpop.f32.mrb[28].mxu0 }
 0x322   : > { %v3991_v9 = vmax.f32 %v3966_v37, 0.0  ;;  %v3653_v63 = vmax.f32 %v10344_v24, %v3587_v48  ;;  %v3876_v1 = vpop.f32.mrb[28].mxu1  ;;  %v7683_v8 = vpop.f32.mrb[29].mxu0 }
 0x323   : > { %v7739_v53 = vpop.f32.mrb[29].mxu1  ;;  %v3590_v11 = vpop.f32.mrb[30].mxu0 }
 0x324   : > { %v6721_v16 = vpack.c.bf16 %v3991_v9, %v3990_v59  ;;  %v3942_v32 = vmax.f32 %v3653_v63, %v3876_v1  ;;  %v3654_v25 = vmax.f32 %v10345_v27, %v3590_v11  ;;  %v3879_v3 = vpop.f32.mrb[30].mxu1  ;;  %v7684_v36 = vpop.f32.mrb[31].mxu0  ;;  %v8204_v9 = vld [vmem:[%s8287_s22 + $0x5c0] sm:$0xff]   ;;  %v10349_v53 = vmax.f32 %v9696_v13, %v9699_v51 }
 0x325   : > { %v7740_v38 = vpop.f32.mrb[31].mxu1  ;;  %v8205_v1 = vld [vmem:[%s8287_s22 + $0x624] sm:$0xff]  }
 0x326   : > { %6835 = vst [vmem:[%s8825_s30 + $0xf0] sm:$0xff] %v6721_v16   ;;  %v3967_v12 = vadd.f32 %v9794_v0, %v3942_v32  ;;  %v3943_v47 = vmax.f32 %v3654_v25, %v3879_v3  ;;  %7910 = vmatmul.mubr.msk.bf16.gmra.mrb[136].mxu0 %vm284_vm3, %v8200_v2  ;;  %v10350_v3 = vmax.f32 %v9709_v61, %v9711_v33 }
 0x327   : > { %7966 = vmatmul.mubr.msk.bf16.gmra.mrb[136].mxu1 %vm284_vm3, %v8201_v46  ;;  %7913 = vmatprep.mubr.msk.bf16.mxu0 %vm8228_vm2, %v10307_v4 }
 0x328   : > { %v3968_v43 = vadd.f32 %v9794_v0, %v3943_v47  ;;  %7969 = vmatprep.mubr.msk.bf16.mxu1 %vm8228_vm2, %v10307_v4  ;;  %v3992_v40 = vmax.f32 %v3967_v12, 0.0  ;;  %v8206_v47 = vld [vmem:[%s8287_s22 + $0x5c8] sm:$0xff]  }
 0x329   : > { %v3595_v34 = vpop.f32.mrb[32].mxu0 }
 0x32a   : > { %v3993_v54 = vmax.f32 %v3968_v43, 0.0  ;;  %v3655_v20 = vmax.f32 %v10346_v29, %v3595_v34  ;;  %v3884_v41 = vpop.f32.mrb[32].mxu1  ;;  %v7687_v58 = vpop.f32.mrb[33].mxu0 }
 0x32b   : > { %v7743_v35 = vpop.f32.mrb[33].mxu1  ;;  %v3598_v6 = vpop.f32.mrb[34].mxu0 }
 0x32c   : > { %v6726_v50 = vpack.c.bf16 %v3993_v54, %v3992_v40  ;;  %v3944_v28 = vmax.f32 %v3655_v20, %v3884_v41  ;;  %v3656_v57 = vmax.f32 %v10347_v60, %v3598_v6  ;;  %v3887_v49 = vpop.f32.mrb[34].mxu1  ;;  %v7688_v22 = vpop.f32.mrb[35].mxu0  ;;  %v8207_v40 = vld [vmem:[%s8287_s22 + $0x62c] sm:$0xff]   ;;  %v10351_v20 = vmax.f32 %v9716_v62, %v9719_v26 }
 0x32d   : > { %v7744_v10 = vpop.f32.mrb[35].mxu1 }
 0x32e   : > { %6836 = vst [vmem:[%s8825_s30 + $0xf8] sm:$0xff] %v6726_v50   ;;  %v3969_v17 = vadd.f32 %v9794_v0, %v3944_v28  ;;  %v3945_v5 = vmax.f32 %v3656_v57, %v3887_v49  ;;  %7914 = vmatmul.mubr.msk.bf16.gmra.mrb[140].mxu0 %vm284_vm3, %v8202_v30  ;;  %v10352_v50 = vmax.f32 %v9729_v42, %v9731_v31  ;;  %v8208_v49 = vld [vmem:[%s8287_s22 + $0x5d0] sm:$0xff]  }
 0x32f   : > { %7970 = vmatmul.mubr.msk.bf16.gmra.mrb[140].mxu1 %vm284_vm3, %v8203_v23  ;;  %7917 = vmatprep.mubr.msk.bf16.mxu0 %vm8228_vm2, %v10307_v4 }
 0x330   : > { %v3970_v55 = vadd.f32 %v9794_v0, %v3945_v5  ;;  %7973 = vmatprep.mubr.msk.bf16.mxu1 %vm8228_vm2, %v10307_v4  ;;  %v3994_v44 = vmax.f32 %v3969_v17, 0.0  ;;  %v8209_v17 = vld [vmem:[%s8287_s22 + $0x634] sm:$0xff]  }
 0x331   : > { %v3603_v15 = vpop.f32.mrb[36].mxu0 }
 0x332   : > { %v3995_v52 = vmax.f32 %v3970_v55, 0.0  ;;  %v3657_v37 = vmax.f32 %v10348_v39, %v3603_v15  ;;  %v3892_v48 = vpop.f32.mrb[36].mxu1  ;;  %v7691_v59 = vpop.f32.mrb[37].mxu0  ;;  %v10353_v15 = vmax.f32 %v9736_v56, %v9739_v14  ;;  %v8210_v56 = vld [vmem:[%s8287_s22 + $0x5d8] ss:$0 sps:$4 sm:$0x33]  }
 0x333   : > { %v7747_v24 = vpop.f32.mrb[37].mxu1  ;;  %v3606_v63 = vpop.f32.mrb[38].mxu0 }
 0x334   : > { %v6731_v8 = vpack.c.bf16 %v3995_v52, %v3994_v44  ;;  %v3946_v2 = vmax.f32 %v3657_v37, %v3892_v48  ;;  %v3658_v11 = vmax.f32 %v10349_v53, %v3606_v63  ;;  %v3895_v46 = vpop.f32.mrb[38].mxu1  ;;  %v7692_v16 = vpop.f32.mrb[39].mxu0  ;;  %v10354_v24 = vmax.f32 %v9749_v21, %v9751_v19 }
 0x335   : > { %v7748_v32 = vpop.f32.mrb[39].mxu1 }
 0x336   : > { %6837 = vst [vmem:[%s8825_s30 + $0x100] sm:$0xff] %v6731_v8   ;;  %v3971_v18 = vadd.f32 %v9794_v0, %v3946_v2  ;;  %v3947_v45 = vmax.f32 %v3658_v11, %v3895_v46  ;;  %7918 = vmatmul.mubr.msk.bf16.gmra.mrb[144].mxu0 %vm284_vm3, %v8204_v9  ;;  %v8211_v11 = vld [vmem:[%s8287_s22 + $0x63c] ss:$0 sps:$4 sm:$0x33]   ;;  %v10355_v32 = vld [vmem:[#allocation2_spill] sm:$0xff] }
 0x337   : > { %7974 = vmatmul.mubr.msk.bf16.gmra.mrb[144].mxu1 %vm284_vm3, %v8205_v1  ;;  %7921 = vmatprep.mubr.msk.bf16.mxu0 %vm8228_vm2, %v10307_v4 }
 0x338   : > { %v3972_v27 = vadd.f32 %v9794_v0, %v3947_v45  ;;  %7977 = vmatprep.mubr.msk.bf16.mxu1 %vm8228_vm2, %v10307_v4  ;;  %v3996_v51 = vmax.f32 %v3971_v18, 0.0  ;;  %v10356_v18 = vmax.f32 %v9756_v7, %v10355_v32  ;;  %v10358_v7 = vld [vmem:[#allocation4_spill] sm:$0xff] }
 0x339   : > { %v3611_v13 = vpop.f32.mrb[40].mxu0 }
 0x33a   : > { %v3997_v25 = vmax.f32 %v3972_v27, 0.0  ;;  %v3659_v36 = vmax.f32 %v10350_v3, %v3611_v13  ;;  %v3900_v38 = vpop.f32.mrb[40].mxu1  ;;  %v7695_v12 = vpop.f32.mrb[41].mxu0 }
 0x33b   : > { %v7751_v43 = vpop.f32.mrb[41].mxu1  ;;  %v3614_v34 = vpop.f32.mrb[42].mxu0 }
 0x33c   : > { %v6736_v54 = vpack.c.bf16 %v3997_v25, %v3996_v51  ;;  %v3948_v29 = vmax.f32 %v3659_v36, %v3900_v38  ;;  %v3660_v41 = vmax.f32 %v10351_v20, %v3614_v34  ;;  %v3903_v58 = vpop.f32.mrb[42].mxu1  ;;  %v7696_v30 = vpop.f32.mrb[43].mxu0  ;;  %v10357_v38 = vld [vmem:[#allocation3_spill] sm:$0xff] }
 0x33d   : > { %v7752_v35 = vpop.f32.mrb[43].mxu1  ;;  %v10359_v12 = vmax.f32 %v10357_v38, %v10358_v7 }
 0x33e   : > { %6838 = vst [vmem:[%s8825_s30 + $0x108] sm:$0xff] %v6736_v54   ;;  %v3973_v61 = vadd.f32 %v9794_v0, %v3948_v29  ;;  %v3949_v33 = vmax.f32 %v3660_v41, %v3903_v58  ;;  %7922 = vmatmul.mubr.msk.bf16.gmra.mrb[148].mxu0 %vm284_vm3, %v8206_v47 }
 0x33f   : > { %7978 = vmatmul.mubr.msk.bf16.gmra.mrb[148].mxu1 %vm284_vm3, %v8207_v40  ;;  %7925 = vmatprep.mubr.msk.bf16.mxu0 %vm8228_vm2, %v10307_v4 }
 0x340   : > { %v3974_v6 = vadd.f32 %v9794_v0, %v3949_v33  ;;  %7981 = vmatprep.mubr.msk.bf16.mxu1 %vm8228_vm2, %v10307_v4  ;;  %v3998_v26 = vmax.f32 %v3973_v61, 0.0 }
 0x341   : > { %v3619_v62 = vpop.f32.mrb[44].mxu0 }
 0x342   : > { %v3999_v23 = vmax.f32 %v3974_v6, 0.0  ;;  %v3661_v28 = vmax.f32 %v10352_v50, %v3619_v62  ;;  %v3908_v60 = vpop.f32.mrb[44].mxu1  ;;  %v7699_v57 = vpop.f32.mrb[45].mxu0 }
 0x343   : > { %v7755_v22 = vpop.f32.mrb[45].mxu1  ;;  %v3622_v10 = vpop.f32.mrb[46].mxu0 }
 0x344   : > { %v6741_v5 = vpack.c.bf16 %v3999_v23, %v3998_v26  ;;  %v3950_v55 = vmax.f32 %v3661_v28, %v3908_v60  ;;  %v3662_v44 = vmax.f32 %v10353_v15, %v3622_v10  ;;  %v3911_v52 = vpop.f32.mrb[46].mxu1  ;;  %v7700_v39 = vpop.f32.mrb[47].mxu0 }
 0x345   : > { %v7756_v37 = vpop.f32.mrb[47].mxu1 }
 0x346   : > { %6839 = vst [vmem:[%s8825_s30 + $0x110] sm:$0xff] %v6741_v5   ;;  %v3975_v42 = vadd.f32 %v9794_v0, %v3950_v55  ;;  %v3951_v31 = vmax.f32 %v3662_v44, %v3911_v52  ;;  %7926 = vmatmul.mubr.msk.bf16.gmra.mrb[152].mxu0 %vm284_vm3, %v8208_v49 }
 0x347   : > { %7982 = vmatmul.mubr.msk.bf16.gmra.mrb[152].mxu1 %vm284_vm3, %v8209_v17  ;;  %7929 = vmatprep.mubr.msk.bf16.mxu0 %vm8228_vm2, %v10307_v4 }
 0x348   : > { %v3976_v48 = vadd.f32 %v9794_v0, %v3951_v31  ;;  %7985 = vmatprep.mubr.msk.bf16.mxu1 %vm8228_vm2, %v10307_v4  ;;  %v4000_v59 = vmax.f32 %v3975_v42, 0.0 }
 0x349   : > { %v3627_v14 = vpop.f32.mrb[48].mxu0 }
 0x34a   : > { %v4001_v9 = vmax.f32 %v3976_v48, 0.0  ;;  %v3663_v63 = vmax.f32 %v10354_v24, %v3627_v14  ;;  %v3916_v1 = vpop.f32.mrb[48].mxu1  ;;  %v7703_v8 = vpop.f32.mrb[49].mxu0 }
 0x34b   : > { %v7759_v2 = vpop.f32.mrb[49].mxu1  ;;  %v3630_v53 = vpop.f32.mrb[50].mxu0 }
 0x34c   : > { %v6746_v46 = vpack.c.bf16 %v4001_v9, %v4000_v59  ;;  %v3952_v16 = vmax.f32 %v3663_v63, %v3916_v1  ;;  %v3664_v4 = vmax.f32 %v10356_v18, %v3630_v53  ;;  %v3919_v45 = vpop.f32.mrb[50].mxu1  ;;  %v7704_v27 = vpop.f32.mrb[51].mxu0 }
 0x34d   : > { %v7760_v13 = vpop.f32.mrb[51].mxu1 }
 0x34e   : > { %6840 = vst [vmem:[%s8825_s30 + $0x118] sm:$0xff] %v6746_v46   ;;  %v3977_v51 = vadd.f32 %v9794_v0, %v3952_v16  ;;  %v3953_v25 = vmax.f32 %v3664_v4, %v3919_v45  ;;  %7930 = vmatmul.mubr.msk.bf16.gmra.mrb[156].mxu0 %vm284_vm3, %v8210_v56 }
 0x34f   : > { %7986 = vmatmul.mubr.msk.bf16.gmra.mrb[156].mxu1 %vm284_vm3, %v8211_v11 }
 0x350   : > { %v3978_v21 = vadd.f32 %v9794_v0, %v3953_v25  ;;  %v4002_v3 = vmax.f32 %v3977_v51, 0.0 }
 0x351   : > { %v3635_v19 = vpop.f32.mrb[52].mxu0 }
 0x352   : > { %v4003_v36 = vmax.f32 %v3978_v21, 0.0  ;;  %v3665_v47 = vmax.f32 %v10359_v12, %v3635_v19  ;;  %v3924_v43 = vpop.f32.mrb[52].mxu1  ;;  %v7707_v34 = vpop.f32.mrb[53].mxu0 }
 0x353   : > { %v7763_v40 = vpop.f32.mrb[53].mxu1  ;;  %v3638_v54 = vpop.f32.mrb[54].mxu0 }
 0x354   : > { %v6751_v29 = vpack.c.bf16 %v4003_v36, %v4002_v3  ;;  %v3954_v20 = vmax.f32 %v3665_v47, %v3924_v43  ;;  %v3927_v41 = vpop.f32.mrb[54].mxu1  ;;  %v7708_v58 = vpop.f32.mrb[55].mxu0 }
 0x355   : > { %v7764_v30 = vpop.f32.mrb[55].mxu1 }
 0x356   : > { %6841 = vst [vmem:[%s8825_s30 + $0x120] sm:$0xff] %v6751_v29   ;;  %v3979_v35 = vadd.f32 %v9794_v0, %v3954_v20 }
 0x358   : > { %v4004_v61 = vmax.f32 %v3979_v35, 0.0 }
 0x359   : > { %v9992_v33 = vpop.f32.mrb[56].mxu0 }
 0x35a   : > { %v6552_v6 = vpack.c.bf16 %v4004_v61, %v4004_v61  ;;  %v9994_v62 = vpop.f32.mrb[56].mxu1  ;;  %v7771_v26 = vpop.f32.mrb[57].mxu0 }
 0x35b   : > { %v4660_v23 = vmax.f32 %v9992_v33, %v9994_v62  ;;  %v7827_v50 = vpop.f32.mrb[57].mxu1  ;;  %v9998_v28 = vpop.f32.mrb[58].mxu0 }
 0x35c   : > { %6221 = vst [vmem:[%s8825_s30 + $0x128] sm:$0x3] %v6552_v6  ;;  %v10001_v60 = vpop.f32.mrb[58].mxu1  ;;  %v7772_v57 = vpop.f32.mrb[59].mxu0 }
 0x35d   : > { %v7828_v22 = vpop.f32.mrb[59].mxu1 }
 0x361   : > { %v10005_v10 = vpop.f32.mrb[60].mxu0 }
 0x362   : > { %v10007_v17 = vpop.f32.mrb[60].mxu1  ;;  %v7775_v5 = vpop.f32.mrb[61].mxu0 }
 0x363   : > { %v7831_v15 = vpop.f32.mrb[61].mxu1  ;;  %v10011_v44 = vpop.f32.mrb[62].mxu0  ;;  %v10365_v62 = vmax.f32 %v10005_v10, %v10007_v17 }
 0x364   : > { %v10013_v52 = vpop.f32.mrb[62].mxu1  ;;  %v7776_v39 = vpop.f32.mrb[63].mxu0 }
 0x365   : > { %v7832_v42 = vpop.f32.mrb[63].mxu1 }
 0x369   : > { %v10017_v31 = vpop.f32.mrb[64].mxu0 }
 0x36a   : > { %v10019_v48 = vpop.f32.mrb[64].mxu1  ;;  %v7779_v14 = vpop.f32.mrb[65].mxu0 }
 0x36b   : > { %v7835_v59 = vpop.f32.mrb[65].mxu1  ;;  %v10023_v9 = vpop.f32.mrb[66].mxu0 }
 0x36c   : > { %v10025_v24 = vpop.f32.mrb[66].mxu1  ;;  %v7780_v63 = vpop.f32.mrb[67].mxu0 }
 0x36d   : > { %v7836_v8 = vpop.f32.mrb[67].mxu1 }
 0x371   : > { %v10029_v2 = vpop.f32.mrb[68].mxu0 }
 0x372   : > { %v10031_v53 = vpop.f32.mrb[68].mxu1  ;;  %v7783_v11 = vpop.f32.mrb[69].mxu0 }
 0x373   : > { %v7839_v16 = vpop.f32.mrb[69].mxu1  ;;  %v10035_v32 = vpop.f32.mrb[70].mxu0 }
 0x374   : > { %v10037_v18 = vpop.f32.mrb[70].mxu1  ;;  %v7784_v4 = vpop.f32.mrb[71].mxu0 }
 0x375   : > { %v7840_v27 = vpop.f32.mrb[71].mxu1 }
 0x379   : > { %v10041_v13 = vpop.f32.mrb[72].mxu0 }
 0x37a   : > { %v10043_v51 = vpop.f32.mrb[72].mxu1  ;;  %v7787_v25 = vpop.f32.mrb[73].mxu0 }
 0x37b   : > { %v7843_v19 = vpop.f32.mrb[73].mxu1  ;;  %v10047_v3 = vpop.f32.mrb[74].mxu0 }
 0x37c   : > { %v10049_v36 = vpop.f32.mrb[74].mxu1  ;;  %v7788_v38 = vpop.f32.mrb[75].mxu0 }
 0x37d   : > { %v7844_v12 = vpop.f32.mrb[75].mxu1 }
 0x381   : > { %v10053_v47 = vpop.f32.mrb[76].mxu0 }
 0x382   : > { %v10055_v43 = vpop.f32.mrb[76].mxu1  ;;  %v7791_v34 = vpop.f32.mrb[77].mxu0 }
 0x383   : > { %v7847_v54 = vpop.f32.mrb[77].mxu1  ;;  %v10059_v29 = vpop.f32.mrb[78].mxu0 }
 0x384   : > { %v10061_v20 = vpop.f32.mrb[78].mxu1  ;;  %v7792_v41 = vpop.f32.mrb[79].mxu0 }
 0x385   : > { %v7848_v30 = vpop.f32.mrb[79].mxu1 }
 0x389   : > { %v10065_v35 = vpop.f32.mrb[80].mxu0 }
 0x38a   : > { %v10067_v61 = vpop.f32.mrb[80].mxu1  ;;  %v7795_v6 = vpop.f32.mrb[81].mxu0 }
 0x38b   : > { %v7851_v50 = vpop.f32.mrb[81].mxu1  ;;  %v10071_v57 = vpop.f32.mrb[82].mxu0 }
 0x38c   : > { %v10073_v22 = vpop.f32.mrb[82].mxu1  ;;  %v7796_v5 = vpop.f32.mrb[83].mxu0 }
 0x38d   : > { %v7852_v39 = vpop.f32.mrb[83].mxu1 }
 0x391   : > { %v10077_v42 = vpop.f32.mrb[84].mxu0 }
 0x392   : > { %v10079_v14 = vpop.f32.mrb[84].mxu1  ;;  %v7799_v59 = vpop.f32.mrb[85].mxu0 }
 0x393   : > { %v7855_v8 = vpop.f32.mrb[85].mxu1  ;;  %v10083_v11 = vpop.f32.mrb[86].mxu0 }
 0x394   : > { %v10085_v16 = vpop.f32.mrb[86].mxu1  ;;  %v7800_v4 = vpop.f32.mrb[87].mxu0 }
 0x395   : > { %v7856_v25 = vpop.f32.mrb[87].mxu1 }
 0x399   : > { %v10089_v19 = vpop.f32.mrb[88].mxu0 }
 0x39a   : > { %v10091_v38 = vpop.f32.mrb[88].mxu1  ;;  %v7803_v12 = vpop.f32.mrb[89].mxu0 }
 0x39b   : > { %v7859_v54 = vpop.f32.mrb[89].mxu1  ;;  %v10095_v41 = vpop.f32.mrb[90].mxu0 }
 0x39c   : > { %v10097_v30 = vpop.f32.mrb[90].mxu1  ;;  %v7804_v6 = vpop.f32.mrb[91].mxu0 }
 0x39d   : > { %v7860_v5 = vpop.f32.mrb[91].mxu1 }
 0x3a1   : > { %v10101_v39 = vpop.f32.mrb[92].mxu0 }
 0x3a2   : > { %v10103_v59 = vpop.f32.mrb[92].mxu1  ;;  %v7807_v8 = vpop.f32.mrb[93].mxu0 }
 0x3a3   : > { %v7863_v25 = vpop.f32.mrb[93].mxu1  ;;  %v10107_v12 = vpop.f32.mrb[94].mxu0 }
 0x3a4   : > { %v10109_v54 = vpop.f32.mrb[94].mxu1  ;;  %v7808_v34 = vpop.f32.mrb[95].mxu0 }
 0x3a5   : > { %v7864_v27 = vpop.f32.mrb[95].mxu1 }
 0x3a9   : > { %v10113_v50 = vpop.f32.mrb[96].mxu0 }
 0x3aa   : > { %v10115_v5 = vpop.f32.mrb[96].mxu1  ;;  %v7811_v63 = vpop.f32.mrb[97].mxu0 }
 0x3ab   : > { %v7867_v15 = vpop.f32.mrb[97].mxu1  ;;  %v10119_v4 = vpop.f32.mrb[98].mxu0 }
 0x3ac   : > { %v10121_v25 = vpop.f32.mrb[98].mxu1  ;;  %v7812_v26 = vpop.f32.mrb[99].mxu0 }
 0x3ad   : > { %v7868_v58 = vpop.f32.mrb[99].mxu1 }
 0x3b1   : > { %v10125_v6 = vpop.f32.mrb[100].mxu0 }
 0x3b2   : > { %v10127_v27 = vpop.f32.mrb[100].mxu1  ;;  %v7815_v40 = vpop.f32.mrb[101].mxu0 }
 0x3b3   : > { %v7871_v7 = vpop.f32.mrb[101].mxu1  ;;  %v10131_v8 = vpop.f32.mrb[102].mxu0 }
 0x3b4   : > { %10360 = vst [vmem:[#allocation2_spill] sm:$0xff] %v10131_v8  ;;  %v10133_v15 = vpop.f32.mrb[102].mxu1  ;;  %v7816_v21 = vpop.f32.mrb[103].mxu0 }
 0x3b5   : > { %10361 = vst [vmem:[#allocation3_spill] sm:$0xff] %v10133_v15  ;;  %v7872_v45 = vpop.f32.mrb[103].mxu1 }
 0x3b9   : > { %v10137_v34 = vpop.f32.mrb[104].mxu0 }
 0x3ba   : > { %10362 = vst [vmem:[#allocation4_spill] sm:$0xff] %v10137_v34  ;;  %v10139_v58 = vpop.f32.mrb[104].mxu1  ;;  %v7819_v46 = vpop.f32.mrb[105].mxu0 }
 0x3bb   : > { %10363 = vst [vmem:[#allocation5_spill] sm:$0xff] %v10139_v58  ;;  %v7875_v1 = vpop.f32.mrb[105].mxu1  ;;  %v4393_v63 = vpop.f32.mrb[106].mxu0  ;;  %v10364_v46 = vmax.f32 %v9998_v28, %v10001_v60 }
 0x3bc   : > { %v4657_v7 = vpop.f32.mrb[106].mxu1  ;;  %v7820_v56 = vpop.f32.mrb[107].mxu0 }
 0x3bd   : > { %v7876_v37 = vpop.f32.mrb[107].mxu1 }
 0x3c1   : > { %v4847_v55 = vpop.f32.mrb[108].mxu0 }
 0x3c2   : > { %v4949_v21 = vmax.f32 %v4660_v23, %v4847_v55  ;;  %v5136_v26 = vpop.f32.mrb[108].mxu1  ;;  %v7883_v45 = vpop.f32.mrb[109].mxu0 }
 0x3c3   : > { %v7939_v49 = vpop.f32.mrb[109].mxu1  ;;  %v4850_v15 = vpop.f32.mrb[110].mxu0 }
 0x3c4   : > { %v5238_v8 = vmax.f32 %v4949_v21, %v5136_v26  ;;  %v4950_v40 = vmax.f32 %v10364_v46, %v4850_v15  ;;  %v5139_v1 = vpop.f32.mrb[110].mxu1  ;;  %v7884_v63 = vpop.f32.mrb[111].mxu0  ;;  %v10366_v15 = vmax.f32 %v10011_v44, %v10013_v52 }
 0x3c5   : > { %v7940_v7 = vpop.f32.mrb[111].mxu1 }
 0x3c6   : > { %v5263_v37 = vadd.f32 %v9794_v0, %v5238_v8  ;;  %v5239_v56 = vmax.f32 %v4950_v40, %v5139_v1  ;;  %v10367_v7 = vmax.f32 %v10017_v31, %v10019_v48 }
 0x3c8   : > { %v5288_v58 = vmax.f32 %v5263_v37, 0.0  ;;  %v5264_v28 = vadd.f32 %v9794_v0, %v5239_v56 }
 0x3c9   : > { %v4855_v34 = vpop.f32.mrb[112].mxu0 }
 0x3ca   : > { %v6553_v33 = vpack.c.bf16 %v5288_v58, %v5288_v58  ;;  %v4951_v23 = vmax.f32 %v10365_v62, %v4855_v34  ;;  %v5144_v49 = vpop.f32.mrb[112].mxu1  ;;  %v7887_v55 = vpop.f32.mrb[113].mxu0  ;;  %v5289_v17 = vmax.f32 %v5264_v28, 0.0 }
 0x3cb   : > { %v7943_v26 = vpop.f32.mrb[113].mxu1  ;;  %v4858_v21 = vpop.f32.mrb[114].mxu0 }
 0x3cc   : > { %6451 = vst [vmem:[%s8825_s30 + $0x12c] sm:$0xf] %v6553_v33  ;;  %v5240_v60 = vmax.f32 %v4951_v23, %v5144_v49  ;;  %v4952_v8 = vmax.f32 %v10366_v15, %v4858_v21  ;;  %v5147_v40 = vpop.f32.mrb[114].mxu1  ;;  %v7888_v45 = vpop.f32.mrb[115].mxu0  ;;  %v10368_v49 = vmax.f32 %v10023_v9, %v10025_v24 }
 0x3cd   : > { %v7944_v58 = vpop.f32.mrb[115].mxu1  ;;  %v10369_v45 = vmax.f32 %v10029_v2, %v10031_v53 }
 0x3ce   : > { %v5265_v46 = vadd.f32 %v9794_v0, %v5240_v60  ;;  %v5241_v10 = vmax.f32 %v4952_v8, %v5147_v40 }
 0x3d0   : > { %v5290_v34 = vmax.f32 %v5265_v46, 0.0  ;;  %v5266_v52 = vadd.f32 %v9794_v0, %v5241_v10 }
 0x3d1   : > { %v4863_v1 = vpop.f32.mrb[116].mxu0 }
 0x3d2   : > { %v6756_v63 = vpack.c.bf16 %v5290_v34, %v5289_v17  ;;  %v4953_v37 = vmax.f32 %v10367_v7, %v4863_v1  ;;  %v5152_v56 = vpop.f32.mrb[116].mxu1  ;;  %v7891_v33 = vpop.f32.mrb[117].mxu0  ;;  %v5291_v48 = vmax.f32 %v5266_v52, 0.0  ;;  %v10370_v1 = vmax.f32 %v10035_v32, %v10037_v18 }
 0x3d3   : > { %v7947_v62 = vpop.f32.mrb[117].mxu1  ;;  %v4866_v44 = vpop.f32.mrb[118].mxu0 }
 0x3d4   : > { %6842 = vst [vmem:[%s8825_s30 + $0x130] sm:$0xff] %v6756_v63   ;;  %v5242_v23 = vmax.f32 %v4953_v37, %v5152_v56  ;;  %v4954_v55 = vmax.f32 %v10368_v49, %v4866_v44  ;;  %v5155_v26 = vpop.f32.mrb[118].mxu1  ;;  %v7892_v21 = vpop.f32.mrb[119].mxu0 }
 0x3d5   : > { %v7948_v28 = vpop.f32.mrb[119].mxu1 }
 0x3d6   : > { %v5267_v60 = vadd.f32 %v9794_v0, %v5242_v23  ;;  %v5243_v31 = vmax.f32 %v4954_v55, %v5155_v26  ;;  %v10371_v23 = vmax.f32 %v10041_v13, %v10043_v51 }
 0x3d8   : > { %v5292_v15 = vmax.f32 %v5267_v60, 0.0  ;;  %v5268_v24 = vadd.f32 %v9794_v0, %v5243_v31  ;;  %v10372_v60 = vmax.f32 %v10047_v3, %v10049_v36 }
 0x3d9   : > { %v4871_v8 = vpop.f32.mrb[120].mxu0 }
 0x3da   : > { %v6761_v40 = vpack.c.bf16 %v5292_v15, %v5291_v48  ;;  %v4955_v58 = vmax.f32 %v10369_v45, %v4871_v8  ;;  %v5160_v46 = vpop.f32.mrb[120].mxu1  ;;  %v7895_v10 = vpop.f32.mrb[121].mxu0  ;;  %v5293_v53 = vmax.f32 %v5268_v24, 0.0 }
 0x3db   : > { %v7951_v17 = vpop.f32.mrb[121].mxu1  ;;  %v4874_v9 = vpop.f32.mrb[122].mxu0  ;;  %v10373_v10 = vmax.f32 %v10053_v47, %v10055_v43  ;;  %v10197_v47 = vld [vmem:[%s10267_s2] ss:$0 sm:$0xff] }
 0x3dc   : > { %6843 = vst [vmem:[%s8825_s30 + $0x138] sm:$0xff] %v6761_v40   ;;  %v5244_v34 = vmax.f32 %v4955_v58, %v5160_v46  ;;  %v4956_v63 = vmax.f32 %v10370_v1, %v4874_v9  ;;  %v5163_v7 = vpop.f32.mrb[122].mxu1  ;;  %v7896_v37 = vpop.f32.mrb[123].mxu0 }
 0x3dd   : > { %v7952_v56 = vpop.f32.mrb[123].mxu1 }
 0x3de   : > { %v5269_v33 = vadd.f32 %v9794_v0, %v5244_v34  ;;  %v5245_v2 = vmax.f32 %v4956_v63, %v5163_v7  ;;  %v10374_v63 = vmax.f32 %v10059_v29, %v10061_v20  ;;  %v10375_v29 = vmax.f32 %v10065_v35, %v10067_v61 }
 0x3e0   : > { %v5294_v62 = vmax.f32 %v5269_v33, 0.0  ;;  %v5270_v18 = vadd.f32 %v9794_v0, %v5245_v2 }
 0x3e1   : > { %v4879_v44 = vpop.f32.mrb[124].mxu0 }
 0x3e2   : > { %v6766_v52 = vpack.c.bf16 %v5294_v62, %v5293_v53  ;;  %v4957_v49 = vmax.f32 %v10371_v23, %v4879_v44  ;;  %v5168_v55 = vpop.f32.mrb[124].mxu1  ;;  %v7899_v26 = vpop.f32.mrb[125].mxu0  ;;  %v5295_v51 = vmax.f32 %v5270_v18, 0.0 }
 0x3e3   : > { %v7955_v21 = vpop.f32.mrb[125].mxu1  ;;  %v4882_v32 = vpop.f32.mrb[126].mxu0 }
 0x3e4   : > { %6844 = vst [vmem:[%s8825_s30 + $0x140] sm:$0xff] %v6766_v52   ;;  %v5246_v28 = vmax.f32 %v4957_v49, %v5168_v55  ;;  %v4958_v31 = vmax.f32 %v10372_v60, %v4882_v32  ;;  %v5171_v48 = vpop.f32.mrb[126].mxu1  ;;  %v7900_v15 = vpop.f32.mrb[127].mxu0  ;;  %v10376_v32 = vmax.f32 %v10071_v57, %v10073_v22 }
 0x3e5   : > { %v7956_v8 = vpop.f32.mrb[127].mxu1 }
 0x3e6   : > { %v5271_v40 = vadd.f32 %v9794_v0, %v5246_v28  ;;  %v5247_v13 = vmax.f32 %v4958_v31, %v5171_v48 }
 0x3e8   : > { %v5296_v45 = vmax.f32 %v5271_v40, 0.0  ;;  %v5272_v36 = vadd.f32 %v9794_v0, %v5247_v13  ;;  %v10377_v13 = vmax.f32 %v10077_v42, %v10079_v14 }
 0x3e9   : > { %v4887_v58 = vpop.f32.mrb[128].mxu0 }
 0x3ea   : > { %v6771_v46 = vpack.c.bf16 %v5296_v45, %v5295_v51  ;;  %v4959_v17 = vmax.f32 %v10373_v10, %v4887_v58  ;;  %v5176_v9 = vpop.f32.mrb[128].mxu1  ;;  %v7903_v24 = vpop.f32.mrb[129].mxu0  ;;  %v5297_v53 = vmax.f32 %v5272_v36, 0.0 }
 0x3eb   : > { %v7959_v34 = vpop.f32.mrb[129].mxu1  ;;  %v4890_v3 = vpop.f32.mrb[130].mxu0 }
 0x3ec   : > { %6845 = vst [vmem:[%s8825_s30 + $0x148] sm:$0xff] %v6771_v46   ;;  %v5248_v1 = vmax.f32 %v4959_v17, %v5176_v9  ;;  %v4960_v7 = vmax.f32 %v10374_v63, %v4890_v3  ;;  %v5179_v37 = vpop.f32.mrb[130].mxu1  ;;  %v7904_v56 = vpop.f32.mrb[131].mxu0  ;;  %v10378_v17 = vmax.f32 %v10083_v11, %v10085_v16 }
 0x3ed   : > { %v7960_v33 = vpop.f32.mrb[131].mxu1 }
 0x3ee   : > { %v5273_v43 = vadd.f32 %v10197_v47, %v5248_v1  ;;  %v5249_v2 = vmax.f32 %v4960_v7, %v5179_v37  ;;  %v10379_v37 = vmax.f32 %v10089_v19, %v10091_v38 }
 0x3f0   : > { %v5298_v62 = vmax.f32 %v5273_v43, 0.0  ;;  %v5274_v26 = vadd.f32 %v10197_v47, %v5249_v2 }
 0x3f1   : > { %v4895_v0 = vpop.f32.mrb[132].mxu0 }
 0x3f2   : > { %v6776_v44 = vpack.c.bf16 %v5298_v62, %v5297_v53  ;;  %v4961_v20 = vmax.f32 %v10375_v29, %v4895_v0  ;;  %v5184_v52 = vpop.f32.mrb[132].mxu1  ;;  %v7907_v23 = vpop.f32.mrb[133].mxu0  ;;  %v5299_v61 = vmax.f32 %v5274_v26, 0.0  ;;  %v10380_v62 = vmax.f32 %v10095_v41, %v10097_v30 }
 0x3f3   : > { %v7963_v49 = vpop.f32.mrb[133].mxu1  ;;  %v4898_v55 = vpop.f32.mrb[134].mxu0  ;;  %v10381_v26 = vmax.f32 %v10101_v39, %v10103_v59 }
 0x3f4   : > { %6846 = vst [vmem:[%s8825_s30 + $0x150] sm:$0xff] %v6776_v44   ;;  %v5250_v21 = vmax.f32 %v4961_v20, %v5184_v52  ;;  %v4962_v18 = vmax.f32 %v10376_v32, %v4898_v55  ;;  %v5187_v28 = vpop.f32.mrb[134].mxu1  ;;  %v7908_v60 = vpop.f32.mrb[135].mxu0 }
 0x3f5   : > { %v7964_v31 = vpop.f32.mrb[135].mxu1 }
 0x3f6   : > { %v5275_v48 = vadd.f32 %v10197_v47, %v5250_v21  ;;  %v5251_v35 = vmax.f32 %v4962_v18, %v5187_v28  ;;  %v10382_v31 = vmax.f32 %v10107_v12, %v10109_v54 }
 0x3f8   : > { %v5300_v15 = vmax.f32 %v5275_v48, 0.0  ;;  %v5276_v22 = vadd.f32 %v10197_v47, %v5251_v35 }
 0x3f9   : > { %v4903_v8 = vpop.f32.mrb[136].mxu0 }
 0x3fa   : > { %v6781_v40 = vpack.c.bf16 %v5300_v15, %v5299_v61  ;;  %v4963_v51 = vmax.f32 %v10377_v13, %v4903_v8  ;;  %v5192_v45 = vpop.f32.mrb[136].mxu1  ;;  %v7911_v58 = vpop.f32.mrb[137].mxu0  ;;  %v5301_v14 = vmax.f32 %v5276_v22, 0.0 }
 0x3fb   : > { %v7967_v46 = vpop.f32.mrb[137].mxu1  ;;  %v4906_v57 = vpop.f32.mrb[138].mxu0 }
 0x3fc   : > { %6847 = vst [vmem:[%s8825_s30 + $0x158] sm:$0xff] %v6781_v40   ;;  %v5252_v10 = vmax.f32 %v4963_v51, %v5192_v45  ;;  %v4964_v9 = vmax.f32 %v10378_v17, %v4906_v57  ;;  %v5195_v24 = vpop.f32.mrb[138].mxu1  ;;  %v7912_v34 = vpop.f32.mrb[139].mxu0  ;;  %v10383_v45 = vmax.f32 %v10113_v50, %v10115_v5  ;;  %v10384_v17 = vmax.f32 %v10119_v4, %v10121_v25 }
 0x3fd   : > { %v7968_v3 = vpop.f32.mrb[139].mxu1 }
 0x3fe   : > { %v5277_v36 = vadd.f32 %v10197_v47, %v5252_v10  ;;  %v5253_v42 = vmax.f32 %v4964_v9, %v5195_v24 }
 0x400   : > { %v5302_v1 = vmax.f32 %v5277_v36, 0.0  ;;  %v5278_v16 = vadd.f32 %v10197_v47, %v5253_v42 }
 0x401   : > { %v4911_v63 = vpop.f32.mrb[140].mxu0 }
 0x402   : > { %v6786_v7 = vpack.c.bf16 %v5302_v1, %v5301_v14  ;;  %v4965_v56 = vmax.f32 %v10379_v37, %v4911_v63  ;;  %v5200_v33 = vpop.f32.mrb[140].mxu1  ;;  %v7915_v43 = vpop.f32.mrb[141].mxu0  ;;  %v5303_v38 = vmax.f32 %v5278_v16, 0.0  ;;  %v10385_v63 = vmax.f32 %v10125_v6, %v10127_v27 }
 0x403   : > { %v7971_v2 = vpop.f32.mrb[141].mxu1  ;;  %v4914_v11 = vpop.f32.mrb[142].mxu0 }
 0x404   : > { %6848 = vst [vmem:[%s8825_s30 + $0x160] sm:$0xff] %v6786_v7   ;;  %v5254_v53 = vmax.f32 %v4965_v56, %v5200_v33  ;;  %v4966_v0 = vmax.f32 %v10380_v62, %v4914_v11  ;;  %v5203_v44 = vpop.f32.mrb[142].mxu1  ;;  %v7916_v29 = vpop.f32.mrb[143].mxu0  ;;  %v10386_v2 = vld [vmem:[#allocation2_spill] sm:$0xff]  ;;  %v10387_v11 = vld [vmem:[#allocation3_spill] sm:$0xff] }
 0x405   : > { %v7972_v20 = vpop.f32.mrb[143].mxu1  ;;  %v10388_v16 = vmax.f32 %v10386_v2, %v10387_v11 }
 0x406   : > { %v5279_v52 = vadd.f32 %v10197_v47, %v5254_v53  ;;  %v5255_v19 = vmax.f32 %v4966_v0, %v5203_v44 }
 0x408   : > { %v5304_v23 = vmax.f32 %v5279_v52, 0.0  ;;  %v5280_v30 = vadd.f32 %v10197_v47, %v5255_v19 }
 0x409   : > { %v4919_v49 = vpop.f32.mrb[144].mxu0 }
 0x40a   : > { %v6791_v55 = vpack.c.bf16 %v5304_v23, %v5303_v38  ;;  %v4967_v21 = vmax.f32 %v10381_v26, %v4919_v49  ;;  %v5208_v32 = vpop.f32.mrb[144].mxu1  ;;  %v7919_v18 = vpop.f32.mrb[145].mxu0  ;;  %v5305_v59 = vmax.f32 %v5280_v30, 0.0  ;;  %v10389_v49 = vld [vmem:[#allocation4_spill] sm:$0xff] }
 0x40b   : > { %v7975_v28 = vpop.f32.mrb[145].mxu1  ;;  %v4922_v41 = vpop.f32.mrb[146].mxu0 }
 0x40c   : > { %6849 = vst [vmem:[%s8825_s30 + $0x168] sm:$0xff] %v6791_v55   ;;  %v5256_v60 = vmax.f32 %v4967_v21, %v5208_v32  ;;  %v4968_v48 = vmax.f32 %v10382_v31, %v4922_v41  ;;  %v5211_v35 = vpop.f32.mrb[146].mxu1  ;;  %v7920_v61 = vpop.f32.mrb[147].mxu0  ;;  %v10390_v55 = vld [vmem:[#allocation5_spill] sm:$0xff] }
 0x40d   : > { %v7976_v15 = vpop.f32.mrb[147].mxu1  ;;  %v10391_v26 = vmax.f32 %v10389_v49, %v10390_v55 }
 0x40e   : > { %v5281_v8 = vadd.f32 %v10197_v47, %v5256_v60  ;;  %v5257_v39 = vmax.f32 %v4968_v48, %v5211_v35 }
 0x410   : > { %v5306_v40 = vmax.f32 %v5281_v8, 0.0  ;;  %v5282_v54 = vadd.f32 %v10197_v47, %v5257_v39 }
 0x411   : > { %v4927_v13 = vpop.f32.mrb[148].mxu0 }
 0x412   : > { %v6796_v51 = vpack.c.bf16 %v5306_v40, %v5305_v59  ;;  %v4969_v58 = vmax.f32 %v10383_v45, %v4927_v13  ;;  %v5216_v46 = vpop.f32.mrb[148].mxu1  ;;  %v7923_v57 = vpop.f32.mrb[149].mxu0  ;;  %v5307_v5 = vmax.f32 %v5282_v54, 0.0 }
 0x413   : > { %v7979_v22 = vpop.f32.mrb[149].mxu1  ;;  %v4930_v12 = vpop.f32.mrb[150].mxu0 }
 0x414   : > { %6850 = vst [vmem:[%s8825_s30 + $0x170] sm:$0xff] %v6796_v51   ;;  %v5258_v10 = vmax.f32 %v4969_v58, %v5216_v46  ;;  %v4970_v9 = vmax.f32 %v10384_v17, %v4930_v12  ;;  %v5219_v24 = vpop.f32.mrb[150].mxu1  ;;  %v7924_v34 = vpop.f32.mrb[151].mxu0 }
 0x415   : > { %v7980_v3 = vpop.f32.mrb[151].mxu1 }
 0x416   : > { %v5283_v36 = vadd.f32 %v10197_v47, %v5258_v10  ;;  %v5259_v50 = vmax.f32 %v4970_v9, %v5219_v24 }
 0x418   : > { %v5308_v42 = vmax.f32 %v5283_v36, 0.0  ;;  %v5284_v25 = vadd.f32 %v10197_v47, %v5259_v50 }
 0x419   : > { %v4935_v14 = vpop.f32.mrb[152].mxu0 }
 0x41a   : > { %v6801_v1 = vpack.c.bf16 %v5308_v42, %v5307_v5  ;;  %v4971_v7 = vmax.f32 %v10385_v63, %v4935_v14  ;;  %v5224_v37 = vpop.f32.mrb[152].mxu1  ;;  %v7927_v56 = vpop.f32.mrb[153].mxu0  ;;  %v5309_v27 = vmax.f32 %v5284_v25, 0.0 }
 0x41b   : > { %v7983_v33 = vpop.f32.mrb[153].mxu1  ;;  %v4938_v4 = vpop.f32.mrb[154].mxu0 }
 0x41c   : > { %6851 = vst [vmem:[%s8825_s30 + $0x178] sm:$0xff] %v6801_v1   ;;  %v5260_v43 = vmax.f32 %v4971_v7, %v5224_v37  ;;  %v4972_v53 = vmax.f32 %v10388_v16, %v4938_v4  ;;  %v5227_v62 = vpop.f32.mrb[154].mxu1  ;;  %v7928_v0 = vpop.f32.mrb[155].mxu0 }
 0x41d   : > { %v7984_v44 = vpop.f32.mrb[155].mxu1 }
 0x41e   : > { %v5285_v29 = vadd.f32 %v10197_v47, %v5260_v43  ;;  %v5261_v6 = vmax.f32 %v4972_v53, %v5227_v62 }
 0x420   : > { %v5310_v20 = vmax.f32 %v5285_v29, 0.0  ;;  %v5286_v52 = vadd.f32 %v10197_v47, %v5261_v6 }
 0x421   : > { %v4943_v19 = vpop.f32.mrb[156].mxu0 }
 0x422   : > { %v6806_v38 = vpack.c.bf16 %v5310_v20, %v5309_v27  ;;  %v5311_v23 = vmax.f32 %v5286_v52, 0.0  ;;  %v4973_v21 = vmax.f32 %v10391_v26, %v4943_v19  ;;  %v5232_v32 = vpop.f32.mrb[156].mxu1  ;;  %v7931_v18 = vpop.f32.mrb[157].mxu0 }
 0x423   : > { %v7987_v28 = vpop.f32.mrb[157].mxu1  ;;  %v4946_v41 = vpop.f32.mrb[158].mxu0 }
 0x424   : > { %6852 = vst [vmem:[%s8825_s30 + $0x180] sm:$0xff] %v6806_v38   ;;  %v6576_v30 = vpack.c.bf16 %v5311_v23, %v5311_v23  ;;  %v5262_v60 = vmax.f32 %v4973_v21, %v5232_v32  ;;  %v5235_v31 = vpop.f32.mrb[158].mxu1  ;;  %v7932_v48 = vpop.f32.mrb[159].mxu0 }
 0x425   : > { %v7988_v35 = vpop.f32.mrb[159].mxu1 }
 0x426   : > { %6474 = vst [vmem:[%s8825_s30 + $0x188] sm:$0xf] %v6576_v30  ;;  %v5287_v61 = vadd.f32 %v10197_v47, %v5262_v60 }
 0x428   : > { %v5312_v15 = vmax.f32 %v5287_v61, 0.0 }
 0x42a   : > { %v6577_v8 = vpack.c.bf16 %v5312_v15, %v5312_v15 }
 0x42c   : > { %6475 = vst [vmem:[%s8825_s30 + $0x18c] sm:$0x3] %v6577_v8 }
 0x42d PF: > { %s13_s12 = sadd.s32 1, %s8224_s12  }
 0x42e   : > { %p10_p4 = scmp.ge.s32.totalorder %s13_s12, 4  }
 0x430   :  { %12 = sbr.rel (!%p10_p4) target bundleno = 1 (0x1), region = 80 }

// kernel: prototypical_net_forward.4
= control target key start
LH: loop header
LB: loop body
LE: loop exit
PB: predicated region body
PF: predicated region fallthrough
CT: control target
= control target key end

     0   :  { %s3159_s12 = smov 0   ;;  %s3584_s0 = inlined_call_operand.vmem [shape: bf16[8,4,49,72], index: 0, kind: input, shape index: {}]   ;;  %s3585_s1 = inlined_call_operand.vmem [shape: bf16[72,128], index: 1, kind: input, shape index: {}]   ;;  %s3586_s2 = inlined_call_operand.vmem [shape: f32[1,128], index: 2, kind: input, shape index: {}]   ;;  %s3587_s3 = inlined_call_operand.vmem [shape: bf16[8,49,128], index: 3, kind: output, shape index: {}]  }
   0x1 LB: > { %s2215_s13 = sadd.s32 4294967295, %s3137_s12   ;;  %p2219_p0 = scmp.ge.s32.totalorder %s3137_s12, 1  ;;  %s3137_s12 = sphi %s3159_s12, %s13_s12  }
   0x2   : > { %p139_p1 = scmp.lt.s32.totalorder %s3137_s12, 3 }
   0x4   : > { %p140_p2 = pnand %p2219_p0, %p139_p1 }
   0x5   : > { %v3170_v0 = vld [vmem:[%s3585_s1] sm:$0xff] (!%p140_p2)   ;;  %v3175_v1 = vld [vmem:[%s3585_s1 + $0x8] sm:$0xff] (!%p140_p2)   ;;  %s2220_s18 = sshll.u32 (!%p140_p2), %s2215_s13, 2  ;;  %v3186_v2 = vld [vmem:[%s3585_s1 + $0x10] sm:$0xff] (!%p140_p2)   ;;  %vm242_vm0 = vcmask (!%p140_p2), 588800   ;;  %vm255_vm1 = vcmask (!%p140_p2), 1043456  }
   0x6   : > { %143 = sbr.rel (%p140_p2) target bundleno = 400 (0x190), region = 32  ;;  %2748 = vmatprep.subr.bf16.mxu0 (!%p140_p2), %v3170_v0  ;;  %2766 = vmatprep.subr.bf16.mxu1 (!%p140_p2), %v3170_v0  ;;  %p166_p3 = scmp.lt.s32.totalorder (!%p140_p2), %s2220_s18, 7  ;;  %v3198_v3 = vld [vmem:[%s3585_s1 + $0x18] sm:$0xff] (!%p140_p2)   ;;  %v3214_v6 = vld [vmem:[%s3585_s1 + $0x20] ss:$0 sps:$4 sm:$0xff] (!%p140_p2)   ;;  %vm705_vm2 = vcmask (!%p140_p2), 1040384  }
   0x7   : > { %2749 = vmatpush3.bf16.msra.mxu0 (!%p140_p2), %v3170_v0  ;;  %2767 = vmatpush3.bf16.msra.mxu1 (!%p140_p2), %v3170_v0  ;;  %v3226_v7 = vsel (!%p140_p2), %vm255_vm1, %v3214_v6, 0  ;;  %vm706_vm3 = vsmask.f32 (!%p140_p2), 256 }
   0x8   : > { %2750 = vmatprep.subr.bf16.mxu0 (!%p140_p2), %v3175_v1  ;;  %2768 = vmatprep.subr.bf16.mxu1 (!%p140_p2), %v3175_v1  ;;  %vm3527_vm4 = vmand (!%p140_p2), %vm705_vm2, %vm706_vm3 }
   0xb   : > { %2751 = vmatpush3.bf16.msra.mxu0 (!%p140_p2), %v3175_v1  ;;  %2769 = vmatpush3.bf16.msra.mxu1 (!%p140_p2), %v3175_v1 }
   0xc   : > { %2752 = vmatprep.subr.bf16.mxu0 (!%p140_p2), %v3186_v2  ;;  %2770 = vmatprep.subr.bf16.mxu1 (!%p140_p2), %v3186_v2 }
   0xd   : > { %s3591_s18 = smov (!%p166_p3, %s2220_s18), 7 }
   0xe   : > { %s3052_s21 = smul.u32 112, %s3591_s18 }
   0xf   : > { %2753 = vmatpush3.bf16.msra.mxu0 %v3186_v2  ;;  %2771 = vmatpush3.bf16.msra.mxu1 %v3186_v2  ;;  %s3053_s4 = smul.u32 28, %s3591_s18 }
  0x10   : > { %s3203_s26 = scalar_lea.vmem %s3584_s0, %s3052_s21  ;;  %2754 = vmatprep.subr.bf16.mxu0 %v3198_v3  ;;  %2772 = vmatprep.subr.bf16.mxu1 %v3198_v3 }
  0x11   : > { %v3067_v4 = vld [vmem:[%s3203_s26] sm:$0xff]   ;;  %v3069_v8 = vld [vmem:[%s3203_s26 + $0x8] sm:$0xff]   ;;  %v3071_v10 = vld [vmem:[%s3203_s26 + $0x10] sm:$0xff]   ;;  %s3521_s7 = scalar_lea.vmem %s3587_s3, %s3053_s4 }
  0x12   : > { %v3068_v5 = vld [vmem:[%s3203_s26 + $0x1c] sm:$0xff]   ;;  %2758 = vmatprep.mubr.msk.bf16.mxu0 %vm242_vm0, %v3067_v4  ;;  %v3070_v9 = vld [vmem:[%s3203_s26 + $0x24] sm:$0xff]   ;;  %v3072_v11 = vld [vmem:[%s3203_s26 + $0x2c] sm:$0xff]  }
  0x13   : > { %2776 = vmatprep.mubr.msk.bf16.mxu1 %vm242_vm0, %v3068_v5  ;;  %2755 = vmatpush3.bf16.msra.mxu0 %v3198_v3  ;;  %v3073_v12 = vld [vmem:[%s3203_s26 + $0x18] ss:$0 sps:$4 sm:$0x11]   ;;  %v3074_v13 = vld [vmem:[%s3203_s26 + $0x34] ss:$0 sps:$4 sm:$0x11]  }
  0x14   : > { %2773 = vmatpush3.bf16.msra.mxu1 %v3198_v3  ;;  %3036 = vmatprep.subr.msk.bf16.mxu0 %vm255_vm1, %v3214_v6  ;;  %v3075_v14 = vld [vmem:[%s3203_s26 + $0x38] sm:$0xff]   ;;  %v3077_v16 = vld [vmem:[%s3203_s26 + $0x40] sm:$0xff]   ;;  %v3079_v18 = vld [vmem:[%s3203_s26 + $0x48] sm:$0xff]  }
  0x15   : > { %3037 = vmatprep.subr.msk.bf16.mxu1 %vm255_vm1, %v3214_v6  ;;  %v3076_v15 = vld [vmem:[%s3203_s26 + $0x54] sm:$0xff]   ;;  %v3078_v17 = vld [vmem:[%s3203_s26 + $0x5c] sm:$0xff]   ;;  %v3081_v19 = vld [vmem:[%s3203_s26 + $0x64] sm:$0xff]  }
  0x16   : > { %v3080_v20 = vld [vmem:[%s3203_s26 + $0x50] ss:$0 sps:$4 sm:$0x11]   ;;  %v3082_v21 = vld [vmem:[%s3203_s26 + $0x6c] ss:$0 sps:$4 sm:$0x11]  }
  0x17   : > { %2757 = vmatpush3.bf16.msra.mxu0 %v3226_v7  ;;  %v3083_v22 = vld [vmem:[%s3203_s26 + $0x70] sm:$0xff]   ;;  %v3085_v24 = vld [vmem:[%s3203_s26 + $0x78] sm:$0xff]   ;;  %v3087_v26 = vld [vmem:[%s3203_s26 + $0x80] sm:$0xff]  }
  0x18   : > { %2775 = vmatpush3.bf16.msra.mxu1 %v3226_v7  ;;  %2784 = vmatprep.subr.bf16.mxu0 %v3170_v0  ;;  %v3084_v23 = vld [vmem:[%s3203_s26 + $0x8c] sm:$0xff]   ;;  %v3086_v25 = vld [vmem:[%s3203_s26 + $0x94] sm:$0xff]   ;;  %v3088_v27 = vld [vmem:[%s3203_s26 + $0x9c] sm:$0xff]  }
  0x19   : > { %2802 = vmatprep.subr.bf16.mxu1 %v3170_v0  ;;  %v3089_v28 = vld [vmem:[%s3203_s26 + $0x88] ss:$0 sps:$4 sm:$0x11]   ;;  %v3090_v29 = vld [vmem:[%s3203_s26 + $0xa4] ss:$0 sps:$4 sm:$0x11]  }
  0x1a   : > { %2759 = vmatmul.mubr.msk.bf16.vlgmr.msra.gmra.mrb[0].mxu0 %vm242_vm0, %v3069_v8  ;;  %v3091_v30 = vld [vmem:[%s3203_s26 + $0xa8] sm:$0xff]   ;;  %v3093_v32 = vld [vmem:[%s3203_s26 + $0xb0] sm:$0xff]   ;;  %v3095_v34 = vld [vmem:[%s3203_s26 + $0xb8] sm:$0xff]  }
  0x1b   : > { %2777 = vmatmul.mubr.msk.bf16.vlgmr.msra.gmra.mrb[0].mxu1 %vm242_vm0, %v3070_v9  ;;  %2785 = vmatpush3.bf16.msra.mxu0 %v3170_v0  ;;  %v3092_v31 = vld [vmem:[%s3203_s26 + $0xc4] sm:$0xff]   ;;  %v3094_v33 = vld [vmem:[%s3203_s26 + $0xcc] sm:$0xff]   ;;  %v3097_v35 = vld [vmem:[%s3203_s26 + $0xd4] sm:$0xff]  }
  0x1c   : > { %2803 = vmatpush3.bf16.msra.mxu1 %v3170_v0  ;;  %2786 = vmatprep.subr.bf16.mxu0 %v3175_v1  ;;  %v3096_v36 = vld [vmem:[%s3203_s26 + $0xc0] ss:$0 sps:$4 sm:$0x11]   ;;  %v3098_v37 = vld [vmem:[%s3203_s26 + $0xdc] ss:$0 sps:$4 sm:$0x11]  }
  0x1d   : > { %2804 = vmatprep.subr.bf16.mxu1 %v3175_v1  ;;  %2762 = vmatprep.mubr.msk.bf16.mxu0 %vm242_vm0, %v3071_v10  ;;  %v3099_v38 = vld [vmem:[%s3203_s26 + $0xe0] sm:$0xff]   ;;  %v3101_v40 = vld [vmem:[%s3203_s26 + $0xe8] sm:$0xff]   ;;  %v3103_v42 = vld [vmem:[%s3203_s26 + $0xf0] sm:$0xff]  }
  0x1e   : > { %2780 = vmatprep.mubr.msk.bf16.mxu1 %vm242_vm0, %v3072_v11  ;;  %v3100_v39 = vld [vmem:[%s3203_s26 + $0xfc] sm:$0xff]   ;;  %v3102_v41 = vld [vmem:[%s3203_s26 + $0x104] sm:$0xff]   ;;  %v3104_v43 = vld [vmem:[%s3203_s26 + $0x10c] sm:$0xff]  }
  0x1f   : > { %2787 = vmatpush3.bf16.msra.mxu0 %v3175_v1  ;;  %v3105_v44 = vld [vmem:[%s3203_s26 + $0xf8] ss:$0 sps:$4 sm:$0x11]   ;;  %v3106_v45 = vld [vmem:[%s3203_s26 + $0x114] ss:$0 sps:$4 sm:$0x11]  }
  0x20   : > { %2805 = vmatpush3.bf16.msra.mxu1 %v3175_v1  ;;  %2788 = vmatprep.subr.bf16.mxu0 %v3186_v2  ;;  %v3107_v46 = vld [vmem:[%s3203_s26 + $0x118] sm:$0xff]   ;;  %v3109_v48 = vld [vmem:[%s3203_s26 + $0x120] sm:$0xff]   ;;  %v3111_v50 = vld [vmem:[%s3203_s26 + $0x128] sm:$0xff]  }
  0x21   : > { %2806 = vmatprep.subr.bf16.mxu1 %v3186_v2  ;;  %v3108_v47 = vld [vmem:[%s3203_s26 + $0x134] sm:$0xff]   ;;  %v3110_v49 = vld [vmem:[%s3203_s26 + $0x13c] sm:$0xff]   ;;  %v3113_v51 = vld [vmem:[%s3203_s26 + $0x144] sm:$0xff]  }
  0x22   : > { %2763 = vmatmul.mubr.msk.bf16.gmra.mrb[4].mxu0 %vm242_vm0, %v3073_v12  ;;  %v3112_v52 = vld [vmem:[%s3203_s26 + $0x130] ss:$0 sps:$4 sm:$0x11]   ;;  %v3114_v53 = vld [vmem:[%s3203_s26 + $0x14c] ss:$0 sps:$4 sm:$0x11]  }
  0x23   : > { %2781 = vmatmul.mubr.msk.bf16.gmra.mrb[4].mxu1 %vm242_vm0, %v3074_v13  ;;  %2789 = vmatpush3.bf16.msra.mxu0 %v3186_v2  ;;  %v3115_v54 = vld [vmem:[%s3203_s26 + $0x150] sm:$0xff]   ;;  %v3117_v56 = vld [vmem:[%s3203_s26 + $0x158] sm:$0xff]   ;;  %v3119_v58 = vld [vmem:[%s3203_s26 + $0x160] sm:$0xff]  }
  0x24   : > { %2807 = vmatpush3.bf16.msra.mxu1 %v3186_v2  ;;  %2790 = vmatprep.subr.bf16.mxu0 %v3198_v3  ;;  %v3116_v55 = vld [vmem:[%s3203_s26 + $0x16c] sm:$0xff]   ;;  %v3118_v57 = vld [vmem:[%s3203_s26 + $0x174] sm:$0xff]   ;;  %v3120_v59 = vld [vmem:[%s3203_s26 + $0x17c] sm:$0xff]  }
  0x25   : > { %2808 = vmatprep.subr.bf16.mxu1 %v3198_v3  ;;  %2794 = vmatprep.mubr.msk.bf16.mxu0 %vm242_vm0, %v3075_v14  ;;  %v3121_v60 = vld [vmem:[%s3203_s26 + $0x168] ss:$0 sps:$4 sm:$0x11]   ;;  %v3122_v61 = vld [vmem:[%s3203_s26 + $0x184] ss:$0 sps:$4 sm:$0x11]  }
  0x26   : > { %2812 = vmatprep.mubr.msk.bf16.mxu1 %vm242_vm0, %v3076_v15  ;;  %v3123_v62 = vld [vmem:[%s3203_s26 + $0x188] sm:$0xff]   ;;  %v3128_v4 = vld [vmem:[%s3203_s26 + $0x1b4] sm:$0xff]   ;;  %v3130_v5 = vld [vmem:[%s3203_s26 + $0x1bc] ss:$0 sps:$4 sm:$0x11]  }
  0x27   : > { %2791 = vmatpush3.bf16.msra.mxu0 %v3198_v3  ;;  %v3124_v63 = vld [vmem:[%s3203_s26 + $0x1a4] sm:$0xff]  }
  0x28   : > { %2809 = vmatpush3.bf16.msra.mxu1 %v3198_v3  ;;  %3038 = vmatprep.subr.msk.bf16.mxu0 %vm255_vm1, %v3214_v6 }
  0x29   : > { %3039 = vmatprep.subr.msk.bf16.mxu1 %vm255_vm1, %v3214_v6 }
  0x2b   : > { %2793 = vmatpush3.bf16.msra.mxu0 %v3226_v7 }
  0x2c   : > { %2811 = vmatpush3.bf16.msra.mxu1 %v3226_v7  ;;  %2820 = vmatprep.subr.bf16.mxu0 %v3170_v0 }
  0x2d   : > { %2838 = vmatprep.subr.bf16.mxu1 %v3170_v0 }
  0x2e   : > { %2795 = vmatmul.mubr.msk.bf16.vlgmr.msra.gmra.mrb[8].mxu0 %vm242_vm0, %v3077_v16 }
  0x2f   : > { %2813 = vmatmul.mubr.msk.bf16.vlgmr.msra.gmra.mrb[8].mxu1 %vm242_vm0, %v3078_v17  ;;  %2821 = vmatpush3.bf16.msra.mxu0 %v3170_v0 }
  0x30   : > { %2839 = vmatpush3.bf16.msra.mxu1 %v3170_v0  ;;  %2822 = vmatprep.subr.bf16.mxu0 %v3175_v1 }
  0x31   : > { %2840 = vmatprep.subr.bf16.mxu1 %v3175_v1  ;;  %2798 = vmatprep.mubr.msk.bf16.mxu0 %vm242_vm0, %v3079_v18 }
  0x32   : > { %2816 = vmatprep.mubr.msk.bf16.mxu1 %vm242_vm0, %v3081_v19 }
  0x33   : > { %2823 = vmatpush3.bf16.msra.mxu0 %v3175_v1 }
  0x34   : > { %2841 = vmatpush3.bf16.msra.mxu1 %v3175_v1  ;;  %2824 = vmatprep.subr.bf16.mxu0 %v3186_v2 }
  0x35   : > { %2842 = vmatprep.subr.bf16.mxu1 %v3186_v2 }
  0x36   : > { %2799 = vmatmul.mubr.msk.bf16.gmra.mrb[12].mxu0 %vm242_vm0, %v3080_v20 }
  0x37   : > { %2817 = vmatmul.mubr.msk.bf16.gmra.mrb[12].mxu1 %vm242_vm0, %v3082_v21  ;;  %2825 = vmatpush3.bf16.msra.mxu0 %v3186_v2 }
  0x38   : > { %2843 = vmatpush3.bf16.msra.mxu1 %v3186_v2  ;;  %2826 = vmatprep.subr.bf16.mxu0 %v3198_v3 }
  0x39   : > { %2844 = vmatprep.subr.bf16.mxu1 %v3198_v3  ;;  %2830 = vmatprep.mubr.msk.bf16.mxu0 %vm242_vm0, %v3083_v22 }
  0x3a   : > { %2848 = vmatprep.mubr.msk.bf16.mxu1 %vm242_vm0, %v3084_v23 }
  0x3b   : > { %2827 = vmatpush3.bf16.msra.mxu0 %v3198_v3 }
  0x3c   : > { %2845 = vmatpush3.bf16.msra.mxu1 %v3198_v3  ;;  %3040 = vmatprep.subr.msk.bf16.mxu0 %vm255_vm1, %v3214_v6 }
  0x3d   : > { %3041 = vmatprep.subr.msk.bf16.mxu1 %vm255_vm1, %v3214_v6 }
  0x3f   : > { %2829 = vmatpush3.bf16.msra.mxu0 %v3226_v7 }
  0x40   : > { %2847 = vmatpush3.bf16.msra.mxu1 %v3226_v7  ;;  %2856 = vmatprep.subr.bf16.mxu0 %v3170_v0 }
  0x41   : > { %2874 = vmatprep.subr.bf16.mxu1 %v3170_v0 }
  0x42   : > { %2831 = vmatmul.mubr.msk.bf16.vlgmr.msra.gmra.mrb[16].mxu0 %vm242_vm0, %v3085_v24 }
  0x43   : > { %2849 = vmatmul.mubr.msk.bf16.vlgmr.msra.gmra.mrb[16].mxu1 %vm242_vm0, %v3086_v25  ;;  %2857 = vmatpush3.bf16.msra.mxu0 %v3170_v0 }
  0x44   : > { %2875 = vmatpush3.bf16.msra.mxu1 %v3170_v0  ;;  %2858 = vmatprep.subr.bf16.mxu0 %v3175_v1 }
  0x45   : > { %2876 = vmatprep.subr.bf16.mxu1 %v3175_v1  ;;  %2834 = vmatprep.mubr.msk.bf16.mxu0 %vm242_vm0, %v3087_v26 }
  0x46   : > { %2852 = vmatprep.mubr.msk.bf16.mxu1 %vm242_vm0, %v3088_v27 }
  0x47   : > { %2859 = vmatpush3.bf16.msra.mxu0 %v3175_v1 }
  0x48   : > { %2877 = vmatpush3.bf16.msra.mxu1 %v3175_v1  ;;  %2860 = vmatprep.subr.bf16.mxu0 %v3186_v2 }
  0x49   : > { %2878 = vmatprep.subr.bf16.mxu1 %v3186_v2 }
  0x4a   : > { %2835 = vmatmul.mubr.msk.bf16.gmra.mrb[20].mxu0 %vm242_vm0, %v3089_v28 }
  0x4b   : > { %2853 = vmatmul.mubr.msk.bf16.gmra.mrb[20].mxu1 %vm242_vm0, %v3090_v29  ;;  %2861 = vmatpush3.bf16.msra.mxu0 %v3186_v2 }
  0x4c   : > { %2879 = vmatpush3.bf16.msra.mxu1 %v3186_v2  ;;  %2862 = vmatprep.subr.bf16.mxu0 %v3198_v3 }
  0x4d   : > { %2880 = vmatprep.subr.bf16.mxu1 %v3198_v3  ;;  %2866 = vmatprep.mubr.msk.bf16.mxu0 %vm242_vm0, %v3091_v30 }
  0x4e   : > { %2884 = vmatprep.mubr.msk.bf16.mxu1 %vm242_vm0, %v3092_v31 }
  0x4f   : > { %2863 = vmatpush3.bf16.msra.mxu0 %v3198_v3 }
  0x50   : > { %2881 = vmatpush3.bf16.msra.mxu1 %v3198_v3  ;;  %3042 = vmatprep.subr.msk.bf16.mxu0 %vm255_vm1, %v3214_v6 }
  0x51   : > { %3043 = vmatprep.subr.msk.bf16.mxu1 %vm255_vm1, %v3214_v6 }
  0x53   : > { %2865 = vmatpush3.bf16.msra.mxu0 %v3226_v7 }
  0x54   : > { %2883 = vmatpush3.bf16.msra.mxu1 %v3226_v7  ;;  %2892 = vmatprep.subr.bf16.mxu0 %v3170_v0 }
  0x55   : > { %2910 = vmatprep.subr.bf16.mxu1 %v3170_v0 }
  0x56   : > { %2867 = vmatmul.mubr.msk.bf16.vlgmr.msra.gmra.mrb[24].mxu0 %vm242_vm0, %v3093_v32 }
  0x57   : > { %2885 = vmatmul.mubr.msk.bf16.vlgmr.msra.gmra.mrb[24].mxu1 %vm242_vm0, %v3094_v33  ;;  %2893 = vmatpush3.bf16.msra.mxu0 %v3170_v0 }
  0x58   : > { %2911 = vmatpush3.bf16.msra.mxu1 %v3170_v0  ;;  %2894 = vmatprep.subr.bf16.mxu0 %v3175_v1 }
  0x59   : > { %2912 = vmatprep.subr.bf16.mxu1 %v3175_v1  ;;  %2870 = vmatprep.mubr.msk.bf16.mxu0 %vm242_vm0, %v3095_v34  ;;  %v3511_v34 = vld [vmem:[%s3586_s2] ss:$0 sm:$0xff] }
  0x5a   : > { %2888 = vmatprep.mubr.msk.bf16.mxu1 %vm242_vm0, %v3097_v35 }
  0x5b   : > { %2895 = vmatpush3.bf16.msra.mxu0 %v3175_v1 }
  0x5c   : > { %2913 = vmatpush3.bf16.msra.mxu1 %v3175_v1  ;;  %2896 = vmatprep.subr.bf16.mxu0 %v3186_v2 }
  0x5d   : > { %2914 = vmatprep.subr.bf16.mxu1 %v3186_v2 }
  0x5e   : > { %2871 = vmatmul.mubr.msk.bf16.gmra.mrb[28].mxu0 %vm242_vm0, %v3096_v36 }
  0x5f   : > { %2889 = vmatmul.mubr.msk.bf16.gmra.mrb[28].mxu1 %vm242_vm0, %v3098_v37  ;;  %2897 = vmatpush3.bf16.msra.mxu0 %v3186_v2 }
  0x60   : > { %2915 = vmatpush3.bf16.msra.mxu1 %v3186_v2  ;;  %2898 = vmatprep.subr.bf16.mxu0 %v3198_v3 }
  0x61   : > { %2916 = vmatprep.subr.bf16.mxu1 %v3198_v3  ;;  %2902 = vmatprep.mubr.msk.bf16.mxu0 %vm242_vm0, %v3099_v38 }
  0x62   : > { %2920 = vmatprep.mubr.msk.bf16.mxu1 %vm242_vm0, %v3100_v39 }
  0x63   : > { %2899 = vmatpush3.bf16.msra.mxu0 %v3198_v3 }
  0x64   : > { %2917 = vmatpush3.bf16.msra.mxu1 %v3198_v3  ;;  %3044 = vmatprep.subr.msk.bf16.mxu0 %vm255_vm1, %v3214_v6 }
  0x65   : > { %3045 = vmatprep.subr.msk.bf16.mxu1 %vm255_vm1, %v3214_v6 }
  0x67   : > { %2901 = vmatpush3.bf16.msra.mxu0 %v3226_v7 }
  0x68   : > { %2919 = vmatpush3.bf16.msra.mxu1 %v3226_v7  ;;  %2928 = vmatprep.subr.bf16.mxu0 %v3170_v0 }
  0x69   : > { %2946 = vmatprep.subr.bf16.mxu1 %v3170_v0 }
  0x6a   : > { %2903 = vmatmul.mubr.msk.bf16.vlgmr.msra.gmra.mrb[32].mxu0 %vm242_vm0, %v3101_v40 }
  0x6b   : > { %2921 = vmatmul.mubr.msk.bf16.vlgmr.msra.gmra.mrb[32].mxu1 %vm242_vm0, %v3102_v41  ;;  %2929 = vmatpush3.bf16.msra.mxu0 %v3170_v0 }
  0x6c   : > { %2947 = vmatpush3.bf16.msra.mxu1 %v3170_v0  ;;  %2930 = vmatprep.subr.bf16.mxu0 %v3175_v1 }
  0x6d   : > { %2948 = vmatprep.subr.bf16.mxu1 %v3175_v1  ;;  %2906 = vmatprep.mubr.msk.bf16.mxu0 %vm242_vm0, %v3103_v42 }
  0x6e   : > { %2924 = vmatprep.mubr.msk.bf16.mxu1 %vm242_vm0, %v3104_v43 }
  0x6f   : > { %2931 = vmatpush3.bf16.msra.mxu0 %v3175_v1 }
  0x70   : > { %2949 = vmatpush3.bf16.msra.mxu1 %v3175_v1  ;;  %2932 = vmatprep.subr.bf16.mxu0 %v3186_v2 }
  0x71   : > { %2950 = vmatprep.subr.bf16.mxu1 %v3186_v2 }
  0x72   : > { %2907 = vmatmul.mubr.msk.bf16.gmra.mrb[36].mxu0 %vm242_vm0, %v3105_v44 }
  0x73   : > { %2925 = vmatmul.mubr.msk.bf16.gmra.mrb[36].mxu1 %vm242_vm0, %v3106_v45  ;;  %2933 = vmatpush3.bf16.msra.mxu0 %v3186_v2 }
  0x74   : > { %2951 = vmatpush3.bf16.msra.mxu1 %v3186_v2  ;;  %2934 = vmatprep.subr.bf16.mxu0 %v3198_v3 }
  0x75   : > { %2952 = vmatprep.subr.bf16.mxu1 %v3198_v3  ;;  %2938 = vmatprep.mubr.msk.bf16.mxu0 %vm242_vm0, %v3107_v46 }
  0x76   : > { %2956 = vmatprep.mubr.msk.bf16.mxu1 %vm242_vm0, %v3108_v47 }
  0x77   : > { %2935 = vmatpush3.bf16.msra.mxu0 %v3198_v3 }
  0x78   : > { %2953 = vmatpush3.bf16.msra.mxu1 %v3198_v3  ;;  %3046 = vmatprep.subr.msk.bf16.mxu0 %vm255_vm1, %v3214_v6 }
  0x79   : > { %3047 = vmatprep.subr.msk.bf16.mxu1 %vm255_vm1, %v3214_v6 }
  0x7b   : > { %2937 = vmatpush3.bf16.msra.mxu0 %v3226_v7 }
  0x7c   : > { %2955 = vmatpush3.bf16.msra.mxu1 %v3226_v7  ;;  %2964 = vmatprep.subr.bf16.mxu0 %v3170_v0 }
  0x7d   : > { %2982 = vmatprep.subr.bf16.mxu1 %v3170_v0 }
  0x7e   : > { %2939 = vmatmul.mubr.msk.bf16.vlgmr.msra.gmra.mrb[40].mxu0 %vm242_vm0, %v3109_v48 }
  0x7f   : > { %2957 = vmatmul.mubr.msk.bf16.vlgmr.msra.gmra.mrb[40].mxu1 %vm242_vm0, %v3110_v49  ;;  %2965 = vmatpush3.bf16.msra.mxu0 %v3170_v0 }
  0x80   : > { %2983 = vmatpush3.bf16.msra.mxu1 %v3170_v0  ;;  %2966 = vmatprep.subr.bf16.mxu0 %v3175_v1 }
  0x81   : > { %2984 = vmatprep.subr.bf16.mxu1 %v3175_v1  ;;  %2942 = vmatprep.mubr.msk.bf16.mxu0 %vm242_vm0, %v3111_v50 }
  0x82   : > { %2960 = vmatprep.mubr.msk.bf16.mxu1 %vm242_vm0, %v3113_v51 }
  0x83   : > { %2967 = vmatpush3.bf16.msra.mxu0 %v3175_v1 }
  0x84   : > { %2985 = vmatpush3.bf16.msra.mxu1 %v3175_v1  ;;  %2968 = vmatprep.subr.bf16.mxu0 %v3186_v2 }
  0x85   : > { %2986 = vmatprep.subr.bf16.mxu1 %v3186_v2 }
  0x86   : > { %2943 = vmatmul.mubr.msk.bf16.gmra.mrb[44].mxu0 %vm242_vm0, %v3112_v52 }
  0x87   : > { %2961 = vmatmul.mubr.msk.bf16.gmra.mrb[44].mxu1 %vm242_vm0, %v3114_v53  ;;  %2969 = vmatpush3.bf16.msra.mxu0 %v3186_v2 }
  0x88   : > { %2987 = vmatpush3.bf16.msra.mxu1 %v3186_v2  ;;  %2970 = vmatprep.subr.bf16.mxu0 %v3198_v3 }
  0x89   : > { %2988 = vmatprep.subr.bf16.mxu1 %v3198_v3  ;;  %2974 = vmatprep.mubr.msk.bf16.mxu0 %vm242_vm0, %v3115_v54 }
  0x8a   : > { %2992 = vmatprep.mubr.msk.bf16.mxu1 %vm242_vm0, %v3116_v55 }
  0x8b   : > { %2971 = vmatpush3.bf16.msra.mxu0 %v3198_v3 }
  0x8c   : > { %2989 = vmatpush3.bf16.msra.mxu1 %v3198_v3  ;;  %3048 = vmatprep.subr.msk.bf16.mxu0 %vm255_vm1, %v3214_v6 }
  0x8d   : > { %3049 = vmatprep.subr.msk.bf16.mxu1 %vm255_vm1, %v3214_v6 }
  0x8f   : > { %2973 = vmatpush3.bf16.msra.mxu0 %v3226_v7 }
  0x90   : > { %2991 = vmatpush3.bf16.msra.mxu1 %v3226_v7  ;;  %3000 = vmatprep.subr.bf16.mxu0 %v3170_v0 }
  0x91   : > { %3018 = vmatprep.subr.bf16.mxu1 %v3170_v0 }
  0x92   : > { %2975 = vmatmul.mubr.msk.bf16.vlgmr.msra.gmra.mrb[48].mxu0 %vm242_vm0, %v3117_v56 }
  0x93   : > { %2993 = vmatmul.mubr.msk.bf16.vlgmr.msra.gmra.mrb[48].mxu1 %vm242_vm0, %v3118_v57  ;;  %3001 = vmatpush3.bf16.msra.mxu0 %v3170_v0 }
  0x94   : > { %3019 = vmatpush3.bf16.msra.mxu1 %v3170_v0  ;;  %3002 = vmatprep.subr.bf16.mxu0 %v3175_v1  ;;  %v3125_v0 = vld [vmem:[%s3203_s26 + $0x190] sm:$0xff]  }
  0x95   : > { %3020 = vmatprep.subr.bf16.mxu1 %v3175_v1  ;;  %2978 = vmatprep.mubr.msk.bf16.mxu0 %vm242_vm0, %v3119_v58 }
  0x96   : > { %2996 = vmatprep.mubr.msk.bf16.mxu1 %vm242_vm0, %v3120_v59 }
  0x97   : > { %3003 = vmatpush3.bf16.msra.mxu0 %v3175_v1 }
  0x98   : > { %3021 = vmatpush3.bf16.msra.mxu1 %v3175_v1  ;;  %3004 = vmatprep.subr.bf16.mxu0 %v3186_v2  ;;  %v3126_v1 = vld [vmem:[%s3203_s26 + $0x1ac] sm:$0xff]  }
  0x99   : > { %3022 = vmatprep.subr.bf16.mxu1 %v3186_v2 }
  0x9a   : > { %2979 = vmatmul.mubr.msk.bf16.gmra.mrb[52].mxu0 %vm242_vm0, %v3121_v60 }
  0x9b   : > { %2997 = vmatmul.mubr.msk.bf16.gmra.mrb[52].mxu1 %vm242_vm0, %v3122_v61  ;;  %3005 = vmatpush3.bf16.msra.mxu0 %v3186_v2 }
  0x9c   : > { %3023 = vmatpush3.bf16.msra.mxu1 %v3186_v2  ;;  %3006 = vmatprep.subr.bf16.mxu0 %v3198_v3  ;;  %v3127_v2 = vld [vmem:[%s3203_s26 + $0x198] sm:$0xff]  }
  0x9d   : > { %3024 = vmatprep.subr.bf16.mxu1 %v3198_v3  ;;  %3010 = vmatprep.mubr.msk.bf16.mxu0 %vm242_vm0, %v3123_v62 }
  0x9e   : > { %3028 = vmatprep.mubr.msk.bf16.mxu1 %vm242_vm0, %v3124_v63 }
  0x9f   : > { %3007 = vmatpush3.bf16.msra.mxu0 %v3198_v3 }
  0xa0   : > { %3025 = vmatpush3.bf16.msra.mxu1 %v3198_v3  ;;  %3050 = vmatprep.subr.msk.bf16.mxu0 %vm255_vm1, %v3214_v6  ;;  %v3129_v3 = vld [vmem:[%s3203_s26 + $0x1a0] ss:$0 sps:$4 sm:$0x11]  }
  0xa1   : > { %3051 = vmatprep.subr.msk.bf16.mxu1 %vm255_vm1, %v3214_v6 }
  0xa3   : > { %3009 = vmatpush3.bf16.msra.mxu0 %v3226_v7 }
  0xa4   : > { %3027 = vmatpush3.bf16.msra.mxu1 %v3226_v7 }
  0xa6   : > { %3011 = vmatmul.mubr.msk.bf16.vlgmr.msra.gmra.mrb[56].mxu0 %vm242_vm0, %v3125_v0 }
  0xa7   : > { %3029 = vmatmul.mubr.msk.bf16.vlgmr.msra.gmra.mrb[56].mxu1 %vm242_vm0, %v3126_v1  ;;  %3014 = vmatprep.mubr.msk.bf16.mxu0 %vm242_vm0, %v3127_v2 }
  0xa8   : > { %3032 = vmatprep.mubr.msk.bf16.mxu1 %vm242_vm0, %v3128_v4 }
  0xae   : > { %3015 = vmatmul.mubr.msk.bf16.gmra.mrb[60].mxu0 %vm242_vm0, %v3129_v3 }
  0xaf   : > { %3033 = vmatmul.mubr.msk.bf16.gmra.mrb[60].mxu1 %vm242_vm0, %v3130_v5 }
  0xed   : > { %v2760_v6 = vpop.f32.mrb[0].mxu0 }
  0xee   : > { %v2778_v8 = vpop.f32.mrb[0].mxu1  ;;  %v293_v7 = vpop.f32.mrb[1].mxu0 }
  0xef   : > { %v427_v9 = vmax.f32 %v2760_v6, %v2778_v8  ;;  %v395_v10 = vpop.f32.mrb[1].mxu1  ;;  %v2761_v12 = vpop.f32.mrb[2].mxu0 }
  0xf0   : > { %v425_v11 = vmax.f32 %v293_v7, %v395_v10  ;;  %v2779_v13 = vpop.f32.mrb[2].mxu1  ;;  %v296_v15 = vpop.f32.mrb[3].mxu0  ;;  %v708_v10 = vld [vmem:[%s3521_s7 + $0x18] sm:$0x1] }
  0xf1   : > { %v428_v14 = vmax.f32 %v2761_v12, %v2779_v13  ;;  %v398_v16 = vpop.f32.mrb[3].mxu1 }
  0xf2   : > { %v426_v17 = vmax.f32 %v296_v15, %v398_v16 }
  0xf5   : > { %v2764_v18 = vpop.f32.mrb[4].mxu0 }
  0xf6   : > { %v2782_v19 = vpop.f32.mrb[4].mxu1  ;;  %v309_v21 = vpop.f32.mrb[5].mxu0 }
  0xf7   : > { %v431_v20 = vmax.f32 %v2764_v18, %v2782_v19  ;;  %v411_v22 = vpop.f32.mrb[5].mxu1  ;;  %v2765_v24 = vpop.f32.mrb[6].mxu0 }
  0xf8   : > { %v429_v23 = vmax.f32 %v309_v21, %v411_v22  ;;  %v2783_v25 = vpop.f32.mrb[6].mxu1  ;;  %v312_v26 = vpop.f32.mrb[7].mxu0 }
  0xf9   : > { %v414_v27 = vpop.f32.mrb[7].mxu1 }
  0xfa   : > { %v430_v28 = vmax.f32 %v312_v26, %v414_v27 }
 0x101   : > { %v2796_v29 = vpop.f32.mrb[8].mxu0 }
 0x102   : > { %v2814_v30 = vpop.f32.mrb[8].mxu1  ;;  %v536_v31 = vmax.f32 %v427_v9, %v2796_v29  ;;  %v504_v32 = vpop.f32.mrb[9].mxu0 }
 0x103   : > { %v613_v33 = vpop.f32.mrb[9].mxu1  ;;  %v534_v35 = vmax.f32 %v425_v11, %v504_v32  ;;  %v2797_v36 = vpop.f32.mrb[10].mxu0 }
 0x104   : > { %v2815_v37 = vpop.f32.mrb[10].mxu1  ;;  %v645_v38 = vmax.f32 %v536_v31, %v2814_v30  ;;  %v537_v39 = vmax.f32 %v428_v14, %v2797_v36  ;;  %v507_v40 = vpop.f32.mrb[11].mxu0 }
 0x105   : > { %v616_v41 = vpop.f32.mrb[11].mxu1  ;;  %v643_v42 = vmax.f32 %v534_v35, %v613_v33  ;;  %v535_v43 = vmax.f32 %v426_v17, %v507_v40 }
 0x106   : > { %v658_v44 = vadd.f32 %v3511_v34, %v645_v38  ;;  %v646_v45 = vmax.f32 %v537_v39, %v2815_v37 }
 0x107   : > { %v656_v46 = vadd.f32 %v3511_v34, %v643_v42  ;;  %v644_v47 = vmax.f32 %v535_v43, %v616_v41 }
 0x108   : > { %v659_v48 = vadd.f32 %v3511_v34, %v646_v45  ;;  %v665_v52 = vmax.f32 %v658_v44, 0.0 }
 0x109   : > { %v657_v49 = vadd.f32 %v3511_v34, %v644_v47  ;;  %v2800_v50 = vpop.f32.mrb[12].mxu0  ;;  %v663_v57 = vmax.f32 %v656_v46, 0.0 }
 0x10a   : > { %v2818_v51 = vpop.f32.mrb[12].mxu1  ;;  %v666_v53 = vmax.f32 %v659_v48, 0.0  ;;  %v540_v54 = vmax.f32 %v431_v20, %v2800_v50  ;;  %v520_v55 = vpop.f32.mrb[13].mxu0 }
 0x10b   : > { %v629_v56 = vpop.f32.mrb[13].mxu1  ;;  %v664_v58 = vmax.f32 %v657_v49, 0.0  ;;  %v538_v59 = vmax.f32 %v429_v23, %v520_v55  ;;  %v2801_v60 = vpop.f32.mrb[14].mxu0 }
 0x10c   : > { %v2819_v61 = vpop.f32.mrb[14].mxu1  ;;  %v2553_v62 = vpack.c.bf16 %v666_v53, %v665_v52  ;;  %v649_v63 = vmax.f32 %v540_v54, %v2818_v51  ;;  %v523_v0 = vpop.f32.mrb[15].mxu0 }
 0x10d   : > { %v632_v1 = vpop.f32.mrb[15].mxu1  ;;  %v2548_v2 = vpack.c.bf16 %v664_v58, %v663_v57  ;;  %v539_v4 = vmax.f32 %v430_v28, %v523_v0  ;;  %v647_v3 = vmax.f32 %v538_v59, %v629_v56 }
 0x10e   : > { %2595 = vst [vmem:[%s3521_s7 + $0x8] sm:$0xff] %v2553_v62   ;;  %v662_v5 = vadd.f32 %v3511_v34, %v649_v63 }
 0x10f   : > { %2549 = vst [vmem:[%s3521_s7] sm:$0xff] %v2548_v2   ;;  %v660_v6 = vadd.f32 %v3511_v34, %v647_v3  ;;  %v648_v8 = vmax.f32 %v539_v4, %v632_v1 }
 0x110   : > { %v669_v9 = vmax.f32 %v662_v5, 0.0 }
 0x111   : > { %v661_v11 = vadd.f32 %v3511_v34, %v648_v8  ;;  %v667_v13 = vmax.f32 %v660_v6, 0.0 }
 0x112   : > { %v2523_v12 = vpack.c.bf16 %v669_v9, %v669_v9 }
 0x113   : > { %v668_v14 = vmax.f32 %v661_v11, 0.0 }
 0x114   : > { %v709_v15 = vsel %vm3527_vm4, %v2523_v12, %v708_v10 }
 0x115   : > { %710 = vst [vmem:[%s3521_s7 + $0x18] sm:$0x1] %v709_v15  ;;  %v2558_v16 = vpack.c.bf16 %v668_v14, %v667_v13  ;;  %v2832_v17 = vpop.f32.mrb[16].mxu0 }
 0x116   : > { %v2850_v18 = vpop.f32.mrb[16].mxu1  ;;  %v783_v20 = vpop.f32.mrb[17].mxu0 }
 0x117   : > { %v917_v19 = vmax.f32 %v2832_v17, %v2850_v18  ;;  %v885_v21 = vpop.f32.mrb[17].mxu1  ;;  %2596 = vst [vmem:[%s3521_s7 + $0x10] sm:$0xff] %v2558_v16   ;;  %v2833_v23 = vpop.f32.mrb[18].mxu0 }
 0x118   : > { %v915_v22 = vmax.f32 %v783_v20, %v885_v21  ;;  %v2851_v24 = vpop.f32.mrb[18].mxu1  ;;  %v786_v26 = vpop.f32.mrb[19].mxu0 }
 0x119   : > { %v918_v25 = vmax.f32 %v2833_v23, %v2851_v24  ;;  %v888_v27 = vpop.f32.mrb[19].mxu1  ;;  %v2363_v24 = vld [vmem:[%s3521_s7 + $0x34] sm:$0x1] }
 0x11a   : > { %v916_v28 = vmax.f32 %v786_v26, %v888_v27 }
 0x11d   : > { %v2836_v29 = vpop.f32.mrb[20].mxu0 }
 0x11e   : > { %v2854_v30 = vpop.f32.mrb[20].mxu1  ;;  %v799_v32 = vpop.f32.mrb[21].mxu0 }
 0x11f   : > { %v921_v31 = vmax.f32 %v2836_v29, %v2854_v30  ;;  %v901_v33 = vpop.f32.mrb[21].mxu1  ;;  %v2837_v36 = vpop.f32.mrb[22].mxu0 }
 0x120   : > { %v919_v35 = vmax.f32 %v799_v32, %v901_v33  ;;  %v2855_v37 = vpop.f32.mrb[22].mxu1  ;;  %v802_v38 = vpop.f32.mrb[23].mxu0 }
 0x121   : > { %v904_v39 = vpop.f32.mrb[23].mxu1 }
 0x122   : > { %v920_v40 = vmax.f32 %v802_v38, %v904_v39 }
 0x129   : > { %v2868_v41 = vpop.f32.mrb[24].mxu0 }
 0x12a   : > { %v2886_v42 = vpop.f32.mrb[24].mxu1  ;;  %v1026_v43 = vmax.f32 %v917_v19, %v2868_v41  ;;  %v994_v44 = vpop.f32.mrb[25].mxu0 }
 0x12b   : > { %v1103_v45 = vpop.f32.mrb[25].mxu1  ;;  %v1024_v46 = vmax.f32 %v915_v22, %v994_v44  ;;  %v2869_v47 = vpop.f32.mrb[26].mxu0 }
 0x12c   : > { %v2887_v48 = vpop.f32.mrb[26].mxu1  ;;  %v1135_v49 = vmax.f32 %v1026_v43, %v2886_v42  ;;  %v1027_v50 = vmax.f32 %v918_v25, %v2869_v47  ;;  %v997_v51 = vpop.f32.mrb[27].mxu0 }
 0x12d   : > { %v1106_v52 = vpop.f32.mrb[27].mxu1  ;;  %v1133_v53 = vmax.f32 %v1024_v46, %v1103_v45  ;;  %v1025_v54 = vmax.f32 %v916_v28, %v997_v51 }
 0x12e   : > { %v1136_v55 = vmax.f32 %v1027_v50, %v2887_v48  ;;  %v1142_v56 = vadd.f32 %v3511_v34, %v1135_v49 }
 0x12f   : > { %v1140_v57 = vadd.f32 %v3511_v34, %v1133_v53  ;;  %v1134_v58 = vmax.f32 %v1025_v54, %v1106_v52 }
 0x130   : > { %v1149_v2 = vmax.f32 %v1142_v56, 0.0  ;;  %v1143_v12 = vadd.f32 %v3511_v34, %v1136_v55 }
 0x131   : > { %v1147_v59 = vmax.f32 %v1140_v57, 0.0  ;;  %v1141_v60 = vadd.f32 %v3511_v34, %v1134_v58  ;;  %v2872_v61 = vpop.f32.mrb[28].mxu0 }
 0x132   : > { %v2890_v62 = vpop.f32.mrb[28].mxu1  ;;  %v1030_v63 = vmax.f32 %v921_v31, %v2872_v61  ;;  %v1010_v0 = vpop.f32.mrb[29].mxu0  ;;  %v1150_v20 = vmax.f32 %v1143_v12, 0.0 }
 0x133   : > { %v1119_v1 = vpop.f32.mrb[29].mxu1  ;;  %v2524_v4 = vpack.c.bf16 %v1147_v59, %v1147_v59  ;;  %v1148_v3 = vmax.f32 %v1141_v60, 0.0  ;;  %v1028_v5 = vmax.f32 %v919_v35, %v1010_v0  ;;  %v2873_v6 = vpop.f32.mrb[30].mxu0 }
 0x134   : > { %v2891_v8 = vpop.f32.mrb[30].mxu1  ;;  %v1139_v9 = vmax.f32 %v1030_v63, %v2890_v62  ;;  %v1013_v10 = vpop.f32.mrb[31].mxu0 }
 0x135   : > { %v1122_v11 = vpop.f32.mrb[31].mxu1  ;;  %2357 = vst [vmem:[%s3521_s7 + $0x1c] sm:$0xf] %v2524_v4  ;;  %v2563_v13 = vpack.c.bf16 %v1149_v2, %v1148_v3  ;;  %v1029_v14 = vmax.f32 %v920_v40, %v1013_v10  ;;  %v1137_v15 = vmax.f32 %v1028_v5, %v1119_v1 }
 0x136   : > { %v1146_v16 = vadd.f32 %v3511_v34, %v1139_v9 }
 0x137   : > { %2597 = vst [vmem:[%s3521_s7 + $0x20] sm:$0xff] %v2563_v13   ;;  %v1144_v17 = vadd.f32 %v3511_v34, %v1137_v15  ;;  %v1138_v18 = vmax.f32 %v1029_v14, %v1122_v11 }
 0x138   : > { %v1153_v19 = vmax.f32 %v1146_v16, 0.0 }
 0x139   : > { %v1151_v21 = vmax.f32 %v1144_v17, 0.0  ;;  %v1145_v22 = vadd.f32 %v3511_v34, %v1138_v18 }
 0x13a   : > { %v2530_v23 = vpack.c.bf16 %v1153_v19, %v1153_v19 }
 0x13b   : > { %v2568_v25 = vpack.c.bf16 %v1151_v21, %v1150_v20  ;;  %v1152_v26 = vmax.f32 %v1145_v22, 0.0 }
 0x13c   : > { %v1191_v27 = vsel %vm3527_vm4, %v2530_v23, %v2363_v24 }
 0x13d   : > { %2364 = vst [vmem:[%s3521_s7 + $0x34] sm:$0x1] %v1191_v27  ;;  %2598 = vst [vmem:[%s3521_s7 + $0x28] sm:$0xff] %v2568_v25   ;;  %v2529_v28 = vpack.c.bf16 %v1152_v26, %v1152_v26  ;;  %v2904_v29 = vpop.f32.mrb[32].mxu0 }
 0x13e   : > { %v2922_v30 = vpop.f32.mrb[32].mxu1  ;;  %v1265_v32 = vpop.f32.mrb[33].mxu0 }
 0x13f   : > { %v1399_v31 = vmax.f32 %v2904_v29, %v2922_v30  ;;  %v1367_v33 = vpop.f32.mrb[33].mxu1  ;;  %2362 = vst [vmem:[%s3521_s7 + $0x30] sm:$0xf] %v2529_v28  ;;  %v2905_v36 = vpop.f32.mrb[34].mxu0 }
 0x140   : > { %v1397_v35 = vmax.f32 %v1265_v32, %v1367_v33  ;;  %v2923_v37 = vpop.f32.mrb[34].mxu1  ;;  %v1268_v39 = vpop.f32.mrb[35].mxu0 }
 0x141   : > { %v1400_v38 = vmax.f32 %v2905_v36, %v2923_v37  ;;  %v1370_v40 = vpop.f32.mrb[35].mxu1  ;;  %v2438_v36 = vld [vmem:[%s3521_s7 + $0x50] sm:$0x1] }
 0x142   : > { %v1398_v41 = vmax.f32 %v1268_v39, %v1370_v40 }
 0x145   : > { %v2908_v42 = vpop.f32.mrb[36].mxu0 }
 0x146   : > { %v2926_v43 = vpop.f32.mrb[36].mxu1  ;;  %v1281_v45 = vpop.f32.mrb[37].mxu0 }
 0x147   : > { %v1403_v44 = vmax.f32 %v2908_v42, %v2926_v43  ;;  %v1383_v46 = vpop.f32.mrb[37].mxu1  ;;  %v2909_v48 = vpop.f32.mrb[38].mxu0 }
 0x148   : > { %v1401_v47 = vmax.f32 %v1281_v45, %v1383_v46  ;;  %v2927_v49 = vpop.f32.mrb[38].mxu1  ;;  %v1284_v50 = vpop.f32.mrb[39].mxu0 }
 0x149   : > { %v1386_v51 = vpop.f32.mrb[39].mxu1 }
 0x14a   : > { %v1402_v52 = vmax.f32 %v1284_v50, %v1386_v51 }
 0x151   : > { %v2940_v53 = vpop.f32.mrb[40].mxu0 }
 0x152   : > { %v2958_v54 = vpop.f32.mrb[40].mxu1  ;;  %v1508_v55 = vmax.f32 %v1399_v31, %v2940_v53  ;;  %v1476_v56 = vpop.f32.mrb[41].mxu0 }
 0x153   : > { %v1585_v57 = vpop.f32.mrb[41].mxu1  ;;  %v1506_v58 = vmax.f32 %v1397_v35, %v1476_v56  ;;  %v2941_v59 = vpop.f32.mrb[42].mxu0 }
 0x154   : > { %v2959_v60 = vpop.f32.mrb[42].mxu1  ;;  %v1617_v61 = vmax.f32 %v1508_v55, %v2958_v54  ;;  %v1509_v62 = vmax.f32 %v1400_v38, %v2941_v59  ;;  %v1479_v63 = vpop.f32.mrb[43].mxu0 }
 0x155   : > { %v1588_v0 = vpop.f32.mrb[43].mxu1  ;;  %v1615_v1 = vmax.f32 %v1506_v58, %v1585_v57  ;;  %v1507_v2 = vmax.f32 %v1398_v41, %v1479_v63 }
 0x156   : > { %v1624_v4 = vadd.f32 %v3511_v34, %v1617_v61  ;;  %v1618_v3 = vmax.f32 %v1509_v62, %v2959_v60 }
 0x157   : > { %v1622_v5 = vadd.f32 %v3511_v34, %v1615_v1  ;;  %v1616_v6 = vmax.f32 %v1507_v2, %v1588_v0 }
 0x158   : > { %v1625_v8 = vadd.f32 %v3511_v34, %v1618_v3  ;;  %v1631_v12 = vmax.f32 %v1624_v4, 0.0 }
 0x159   : > { %v1623_v9 = vadd.f32 %v3511_v34, %v1616_v6  ;;  %v2944_v10 = vpop.f32.mrb[44].mxu0  ;;  %v1629_v17 = vmax.f32 %v1622_v5, 0.0 }
 0x15a   : > { %v2962_v11 = vpop.f32.mrb[44].mxu1  ;;  %v1632_v13 = vmax.f32 %v1625_v8, 0.0  ;;  %v1512_v14 = vmax.f32 %v1403_v44, %v2944_v10  ;;  %v1492_v15 = vpop.f32.mrb[45].mxu0 }
 0x15b   : > { %v1601_v16 = vpop.f32.mrb[45].mxu1  ;;  %v1630_v18 = vmax.f32 %v1623_v9, 0.0  ;;  %v1510_v19 = vmax.f32 %v1401_v47, %v1492_v15  ;;  %v2945_v20 = vpop.f32.mrb[46].mxu0 }
 0x15c   : > { %v2963_v21 = vpop.f32.mrb[46].mxu1  ;;  %v2578_v22 = vpack.c.bf16 %v1632_v13, %v1631_v12  ;;  %v1621_v23 = vmax.f32 %v1512_v14, %v2962_v11  ;;  %v1495_v24 = vpop.f32.mrb[47].mxu0 }
 0x15d   : > { %v1604_v25 = vpop.f32.mrb[47].mxu1  ;;  %v2573_v26 = vpack.c.bf16 %v1630_v18, %v1629_v17  ;;  %v1511_v27 = vmax.f32 %v1402_v52, %v1495_v24  ;;  %v1619_v28 = vmax.f32 %v1510_v19, %v1601_v16 }
 0x15e   : > { %2600 = vst [vmem:[%s3521_s7 + $0x40] sm:$0xff] %v2578_v22   ;;  %v1628_v29 = vadd.f32 %v3511_v34, %v1621_v23 }
 0x15f   : > { %2599 = vst [vmem:[%s3521_s7 + $0x38] sm:$0xff] %v2573_v26   ;;  %v1626_v30 = vadd.f32 %v3511_v34, %v1619_v28  ;;  %v1620_v31 = vmax.f32 %v1511_v27, %v1604_v25 }
 0x160   : > { %v1635_v32 = vmax.f32 %v1628_v29, 0.0 }
 0x161   : > { %v1627_v33 = vadd.f32 %v3511_v34, %v1620_v31  ;;  %v1633_v37 = vmax.f32 %v1626_v30, 0.0 }
 0x162   : > { %v2537_v35 = vpack.c.bf16 %v1635_v32, %v1635_v32 }
 0x163   : > { %v1634_v38 = vmax.f32 %v1627_v33, 0.0 }
 0x164   : > { %v1673_v39 = vsel %vm3527_vm4, %v2537_v35, %v2438_v36 }
 0x165   : > { %2439 = vst [vmem:[%s3521_s7 + $0x50] sm:$0x1] %v1673_v39  ;;  %v2583_v40 = vpack.c.bf16 %v1634_v38, %v1633_v37  ;;  %v2976_v41 = vpop.f32.mrb[48].mxu0 }
 0x166   : > { %v2994_v42 = vpop.f32.mrb[48].mxu1  ;;  %v1747_v44 = vpop.f32.mrb[49].mxu0 }
 0x167   : > { %v1881_v43 = vmax.f32 %v2976_v41, %v2994_v42  ;;  %v1849_v45 = vpop.f32.mrb[49].mxu1  ;;  %2601 = vst [vmem:[%s3521_s7 + $0x48] sm:$0xff] %v2583_v40   ;;  %v2977_v47 = vpop.f32.mrb[50].mxu0 }
 0x168   : > { %v1879_v46 = vmax.f32 %v1747_v44, %v1849_v45  ;;  %v2995_v48 = vpop.f32.mrb[50].mxu1  ;;  %v1750_v50 = vpop.f32.mrb[51].mxu0 }
 0x169   : > { %v1882_v49 = vmax.f32 %v2977_v47, %v2995_v48  ;;  %v1852_v51 = vpop.f32.mrb[51].mxu1  ;;  %v2513_v48 = vld [vmem:[%s3521_s7 + $0x6c] sm:$0x1] }
 0x16a   : > { %v1880_v52 = vmax.f32 %v1750_v50, %v1852_v51 }
 0x16d   : > { %v2980_v53 = vpop.f32.mrb[52].mxu0 }
 0x16e   : > { %v2998_v54 = vpop.f32.mrb[52].mxu1  ;;  %v1763_v56 = vpop.f32.mrb[53].mxu0 }
 0x16f   : > { %v1885_v55 = vmax.f32 %v2980_v53, %v2998_v54  ;;  %v1865_v57 = vpop.f32.mrb[53].mxu1  ;;  %v2981_v59 = vpop.f32.mrb[54].mxu0 }
 0x170   : > { %v1883_v58 = vmax.f32 %v1763_v56, %v1865_v57  ;;  %v2999_v60 = vpop.f32.mrb[54].mxu1  ;;  %v1766_v61 = vpop.f32.mrb[55].mxu0 }
 0x171   : > { %v1868_v62 = vpop.f32.mrb[55].mxu1 }
 0x172   : > { %v1884_v63 = vmax.f32 %v1766_v61, %v1868_v62 }
 0x179   : > { %v3012_v0 = vpop.f32.mrb[56].mxu0 }
 0x17a   : > { %v3030_v1 = vpop.f32.mrb[56].mxu1  ;;  %v1990_v2 = vmax.f32 %v1881_v43, %v3012_v0  ;;  %v1958_v4 = vpop.f32.mrb[57].mxu0 }
 0x17b   : > { %v2067_v3 = vpop.f32.mrb[57].mxu1  ;;  %v1988_v5 = vmax.f32 %v1879_v46, %v1958_v4  ;;  %v3013_v6 = vpop.f32.mrb[58].mxu0 }
 0x17c   : > { %v3031_v8 = vpop.f32.mrb[58].mxu1  ;;  %v2099_v9 = vmax.f32 %v1990_v2, %v3030_v1  ;;  %v1991_v10 = vmax.f32 %v1882_v49, %v3013_v6  ;;  %v1961_v11 = vpop.f32.mrb[59].mxu0 }
 0x17d   : > { %v2070_v12 = vpop.f32.mrb[59].mxu1  ;;  %v2097_v13 = vmax.f32 %v1988_v5, %v2067_v3  ;;  %v1989_v14 = vmax.f32 %v1880_v52, %v1961_v11 }
 0x17e   : > { %v2100_v15 = vmax.f32 %v1991_v10, %v3031_v8  ;;  %v2106_v16 = vadd.f32 %v3511_v34, %v2099_v9 }
 0x17f   : > { %v2104_v17 = vadd.f32 %v3511_v34, %v2097_v13  ;;  %v2098_v18 = vmax.f32 %v1989_v14, %v2070_v12 }
 0x180   : > { %v2113_v26 = vmax.f32 %v2106_v16, 0.0  ;;  %v2107_v36 = vadd.f32 %v3511_v34, %v2100_v15 }
 0x181   : > { %v2111_v19 = vmax.f32 %v2104_v17, 0.0  ;;  %v2105_v20 = vadd.f32 %v3511_v34, %v2098_v18  ;;  %v3016_v21 = vpop.f32.mrb[60].mxu0 }
 0x182   : > { %v3034_v22 = vpop.f32.mrb[60].mxu1  ;;  %v1994_v23 = vmax.f32 %v1885_v55, %v3016_v21  ;;  %v1974_v24 = vpop.f32.mrb[61].mxu0  ;;  %v2114_v44 = vmax.f32 %v2107_v36, 0.0 }
 0x183   : > { %v2083_v25 = vpop.f32.mrb[61].mxu1  ;;  %v2538_v27 = vpack.c.bf16 %v2111_v19, %v2111_v19  ;;  %v2112_v28 = vmax.f32 %v2105_v20, 0.0  ;;  %v1992_v29 = vmax.f32 %v1883_v58, %v1974_v24  ;;  %v3017_v30 = vpop.f32.mrb[62].mxu0 }
 0x184   : > { %v3035_v31 = vpop.f32.mrb[62].mxu1  ;;  %v2103_v32 = vmax.f32 %v1994_v23, %v3034_v22  ;;  %v1977_v33 = vpop.f32.mrb[63].mxu0 }
 0x185   : > { %v2086_v35 = vpop.f32.mrb[63].mxu1  ;;  %2507 = vst [vmem:[%s3521_s7 + $0x54] sm:$0xf] %v2538_v27  ;;  %v2588_v37 = vpack.c.bf16 %v2113_v26, %v2112_v28  ;;  %v2101_v38 = vmax.f32 %v1992_v29, %v2083_v25  ;;  %v1993_v39 = vmax.f32 %v1884_v63, %v1977_v33 }
 0x186   : > { %v2110_v40 = vadd.f32 %v3511_v34, %v2103_v32 }
 0x187   : > { %2602 = vst [vmem:[%s3521_s7 + $0x58] sm:$0xff] %v2588_v37   ;;  %v2108_v41 = vadd.f32 %v3511_v34, %v2101_v38  ;;  %v2102_v42 = vmax.f32 %v1993_v39, %v2086_v35 }
 0x188   : > { %v2117_v43 = vmax.f32 %v2110_v40, 0.0 }
 0x189   : > { %v2115_v45 = vmax.f32 %v2108_v41, 0.0  ;;  %v2109_v46 = vadd.f32 %v3511_v34, %v2102_v42 }
 0x18a   : > { %v2544_v47 = vpack.c.bf16 %v2117_v43, %v2117_v43 }
 0x18b   : > { %v2593_v49 = vpack.c.bf16 %v2115_v45, %v2114_v44  ;;  %v2116_v50 = vmax.f32 %v2109_v46, 0.0 }
 0x18c   : > { %v2155_v51 = vsel %vm3527_vm4, %v2544_v47, %v2513_v48 }
 0x18d   : > { %2514 = vst [vmem:[%s3521_s7 + $0x6c] sm:$0x1] %v2155_v51  ;;  %2603 = vst [vmem:[%s3521_s7 + $0x60] sm:$0xff] %v2593_v49   ;;  %v2543_v52 = vpack.c.bf16 %v2116_v50, %v2116_v50 }
 0x18f   : > { %2512 = vst [vmem:[%s3521_s7 + $0x68] sm:$0xf] %v2543_v52 }
 0x190 PF: > { %s13_s12 = sadd.s32 1, %s3137_s12  }
 0x191   : > { %p10_p4 = scmp.ge.s32.totalorder %s13_s12, 4  }
 0x193   :  { %12 = sbr.rel (!%p10_p4) target bundleno = 1 (0x1), region = 80 }

// kernel: prototypical_net_forward.5
= control target key start
LH: loop header
LB: loop body
LE: loop exit
PB: predicated region body
PF: predicated region fallthrough
CT: control target
= control target key end

     0   :  { %v825_v1 = vmov 0   ;;  %v826_v40 = vmov 0.0   ;;  %vm827_vm0 = vmmov 0   ;;  %vm438_vm1 = vcmask 130048   ;;  %s1021_s2 = inlined_call_operand.vmem [shape: bf16[784,128], index: 2, kind: input, shape index: {}]   ;;  %s1022_s0 = inlined_call_operand.vmem [shape: bf16[8,784], index: 0, kind: input, shape index: {}]   ;;  %s1023_s1 = inlined_call_operand.vmem [shape: f32[8,1], index: 1, kind: input, shape index: {}]   ;;  %s1024_s3 = inlined_call_operand.vmem [shape: f32[1,128], index: 3, kind: input, shape index: {}]   ;;  %s1025_s4 = inlined_call_operand.vmem [shape: f32[8,128], index: 4, kind: output, shape index: {}]  }
   0x1   :  { %v767_v0 = vld [vmem:[%s1021_s2 + $0x40] sm:$0xff]   ;;  %766 = vset.pattern.permute.xlu0 %v825_v1  ;;  %v771_v5 = vld [vmem:[%s1021_s2 + $0x48] sm:$0xff]   ;;  %v775_v9 = vld [vmem:[%s1021_s2 + $0x50] sm:$0xff]  }
   0x2   :  { %v768_v2 = vld [vmem:[%s1021_s2 + $0xc0] sm:$0xff]   ;;  %689 = vmatprep.subr.bf16.mxu0 %v767_v0  ;;  %v772_v6 = vld [vmem:[%s1021_s2 + $0xc8] sm:$0xff]   ;;  %v776_v10 = vld [vmem:[%s1021_s2 + $0xd0] sm:$0xff]  }
   0x3   :  { %v769_v3 = vld [vmem:[%s1021_s2] sm:$0xff]   ;;  %711 = vmatprep.subr.bf16.mxu1 %v768_v2  ;;  %v773_v7 = vld [vmem:[%s1021_s2 + $0x8] sm:$0xff]   ;;  %v777_v11 = vld [vmem:[%s1021_s2 + $0x10] sm:$0xff]  }
   0x4   :  { %v770_v4 = vld [vmem:[%s1021_s2 + $0x80] sm:$0xff]   ;;  %690 = vmatpush3.bf16.msra.mxu0 %v769_v3  ;;  %v774_v8 = vld [vmem:[%s1021_s2 + $0x88] sm:$0xff]   ;;  %v778_v12 = vld [vmem:[%s1021_s2 + $0x90] sm:$0xff]  }
   0x5   :  { %712 = vmatpush3.bf16.msra.mxu1 %v770_v4  ;;  %691 = vmatprep.subr.bf16.mxu0 %v771_v5  ;;  %v779_v13 = vld [vmem:[%s1021_s2 + $0x58] sm:$0xff]   ;;  %v783_v17 = vld [vmem:[%s1021_s2 + $0x60] sm:$0xff]   ;;  %v787_v21 = vld [vmem:[%s1021_s2 + $0x68] sm:$0xff]  }
   0x6   :  { %713 = vmatprep.subr.bf16.mxu1 %v772_v6  ;;  %v780_v14 = vld [vmem:[%s1021_s2 + $0xd8] sm:$0xff]   ;;  %v784_v18 = vld [vmem:[%s1021_s2 + $0xe0] sm:$0xff]   ;;  %v788_v22 = vld [vmem:[%s1021_s2 + $0xe8] sm:$0xff]  }
   0x7   :  { %v781_v15 = vld [vmem:[%s1021_s2 + $0x18] sm:$0xff]   ;;  %v785_v19 = vld [vmem:[%s1021_s2 + $0x20] sm:$0xff]   ;;  %v789_v23 = vld [vmem:[%s1021_s2 + $0x28] sm:$0xff]  }
   0x8   :  { %692 = vmatpush3.bf16.msra.mxu0 %v773_v7  ;;  %v782_v16 = vld [vmem:[%s1021_s2 + $0x98] sm:$0xff]   ;;  %v786_v20 = vld [vmem:[%s1021_s2 + $0xa0] sm:$0xff]   ;;  %v790_v24 = vld [vmem:[%s1021_s2 + $0xa8] sm:$0xff]  }
   0x9   :  { %714 = vmatpush3.bf16.msra.mxu1 %v774_v8  ;;  %693 = vmatprep.subr.bf16.mxu0 %v775_v9  ;;  %v791_v25 = vld [vmem:[%s1021_s2 + $0x70] sm:$0xff]   ;;  %v795_v29 = vld [vmem:[%s1021_s2 + $0x78] sm:$0xff]   ;;  %v18_v33 = vld [vmem:[%s1022_s0] sm:$0xff] }
   0xa   :  { %715 = vmatprep.subr.bf16.mxu1 %v776_v10  ;;  %v792_v26 = vld [vmem:[%s1021_s2 + $0xf0] sm:$0xff]   ;;  %v796_v30 = vld [vmem:[%s1021_s2 + $0xf8] sm:$0xff]   ;;  %v631_v34 = vcombine.low %v18_v33, %v18_v33  ;;  %v632_v35 = vcombine.high %v18_v33, %v18_v33  ;;  %v19_v36 = vld [vmem:[%s1022_s0 + $0x8] sm:$0xff] }
   0xb   :  { %v793_v27 = vld [vmem:[%s1021_s2 + $0x30] sm:$0xff]   ;;  %v797_v31 = vld [vmem:[%s1021_s2 + $0x38] sm:$0xff]   ;;  %v633_v37 = vcombine.low %v19_v36, %v19_v36  ;;  %v634_v38 = vcombine.high %v19_v36, %v19_v36  ;;  %v804_v39 = vld [vmem:[%s1021_s2 + $0x140] sm:$0xff]  }
   0xc   :  { %694 = vmatpush3.bf16.msra.mxu0 %v777_v11  ;;  %v794_v28 = vld [vmem:[%s1021_s2 + $0xb0] sm:$0xff]   ;;  %v798_v32 = vld [vmem:[%s1021_s2 + $0xb8] sm:$0xff]   ;;  %474 = vmatprep.mubr.bf16.mxu0 %v632_v35  ;;  %v805_v41 = vld [vmem:[%s1021_s2 + $0x100] sm:$0xff]  }
   0xd   :  { %716 = vmatpush3.bf16.msra.mxu1 %v778_v12  ;;  %695 = vmatprep.subr.bf16.mxu0 %v779_v13  ;;  %v806_v42 = vld [vmem:[%s1021_s2 + $0x148] sm:$0xff]   ;;  %v808_v44 = vld [vmem:[%s1021_s2 + $0x150] sm:$0xff]   ;;  %v810_v46 = vld [vmem:[%s1021_s2 + $0x158] sm:$0xff]  }
   0xe   :  { %717 = vmatprep.subr.bf16.mxu1 %v780_v14  ;;  %514 = vmatprep.mubr.bf16.mxu1 %v634_v38  ;;  %v807_v43 = vld [vmem:[%s1021_s2 + $0x108] sm:$0xff]   ;;  %v809_v45 = vld [vmem:[%s1021_s2 + $0x110] sm:$0xff]   ;;  %v811_v47 = vld [vmem:[%s1021_s2 + $0x118] sm:$0xff]  }
   0xf   :  { %v812_v48 = vld [vmem:[%s1021_s2 + $0x160] sm:$0xff]   ;;  %v20_v51 = vld [vmem:[%s1022_s0 + $0x10] sm:$0xff]  ;;  %v801_v53 = vld [vmem:[%s1022_s0 + $0x18] ss:$0 sps:$4 sm:$0xff]  }
  0x10   :  { %696 = vmatpush3.bf16.msra.mxu0 %v781_v15  ;;  %v813_v49 = vld [vmem:[%s1021_s2 + $0x120] sm:$0xff]   ;;  %v814_v54 = vld [vmem:[%s1021_s2 + $0x168] sm:$0xff]   ;;  %v636_v55 = vcombine.high %v20_v51, %v20_v51  ;;  %v816_v57 = vld [vmem:[%s1021_s2 + $0x170] sm:$0xff]   ;;  %v635_v61 = vcombine.low %v20_v51, %v20_v51 }
  0x11   :  { %718 = vmatpush3.bf16.msra.mxu1 %v782_v16  ;;  %697 = vmatprep.subr.bf16.mxu0 %v783_v17  ;;  %v820_v50 = vld [vmem:[%s1021_s2 + $0x180] sm:$0xff]   ;;  %v815_v56 = vld [vmem:[%s1021_s2 + $0x128] sm:$0xff]   ;;  %v817_v58 = vld [vmem:[%s1021_s2 + $0x130] sm:$0xff]  }
  0x12   :  { %719 = vmatprep.subr.bf16.mxu1 %v784_v18  ;;  %v602_v52 = vld [vmem:[%s1023_s1] sm:$0xff]  ;;  %v818_v59 = vld [vmem:[%s1021_s2 + $0x178] sm:$0xff]  }
  0x13   :  { %606 = vperm.xlu0 %766, %v602_v52   ;;  %v819_v60 = vld [vmem:[%s1021_s2 + $0x138] sm:$0xff]   ;;  %v688_v18 = vld [vmem:[%s1024_s3] ss:$0 sm:$0xff] }
  0x14   :  { %698 = vmatpush3.bf16.msra.mxu0 %v785_v19 }
  0x15   :  { %720 = vmatpush3.bf16.msra.mxu1 %v786_v20  ;;  %699 = vmatprep.subr.bf16.mxu0 %v787_v21 }
  0x16   :  { %721 = vmatprep.subr.bf16.mxu1 %v788_v22 }
  0x18   :  { %700 = vmatpush3.bf16.msra.mxu0 %v789_v23 }
  0x19   :  { %722 = vmatpush3.bf16.msra.mxu1 %v790_v24  ;;  %701 = vmatprep.subr.bf16.mxu0 %v791_v25 }
  0x1a   :  { %723 = vmatprep.subr.bf16.mxu1 %v792_v26 }
  0x1c   :  { %702 = vmatpush3.bf16.msra.mxu0 %v793_v27 }
  0x1d   :  { %724 = vmatpush3.bf16.msra.mxu1 %v794_v28  ;;  %703 = vmatprep.subr.bf16.mxu0 %v795_v29 }
  0x1e   :  { %725 = vmatprep.subr.bf16.mxu1 %v796_v30 }
  0x20   :  { %704 = vmatpush3.bf16.msra.mxu0 %v797_v31 }
  0x21   :  { %726 = vmatpush3.bf16.msra.mxu1 %v798_v32  ;;  %733 = vmatprep.subr.bf16.mxu0 %v804_v39 }
  0x22   :  { %757 = vmatprep.subr.bf16.mxu1 %v826_v40 }
  0x23   :  { %475 = vmatmul.mubr.bf16.vlgmr.msra.gmra.mrb[0].mxu0 %v631_v34 }
  0x24   :  { %515 = vmatmul.mubr.bf16.vlgmr.msra.gmra.mrb[0].mxu1 %v633_v37  ;;  %734 = vmatpush3.bf16.msra.mxu0 %v805_v41 }
  0x25   :  { %759 = vmatprep.mubr.msk.bf16.mxu1 %vm827_vm0, %v826_v40  ;;  %735 = vmatprep.subr.bf16.mxu0 %v806_v42 }
  0x26   :  { %758 = vmatpush3.bf16.msra.mxu1 %v820_v50  ;;  %554 = vmatprep.mubr.bf16.mxu0 %v636_v55 }
  0x28   :  { %736 = vmatpush3.bf16.msra.mxu0 %v807_v43 }
  0x29   :  { %737 = vmatprep.subr.bf16.mxu0 %v808_v44 }
  0x2c   :  { %738 = vmatpush3.bf16.msra.mxu0 %v809_v45  ;;  %760 = vmatmul.mubr.msk.bf16.vlgmr.msra.gmra.mrb[4].mxu1 %vm438_vm1, %v801_v53 }
  0x2d   :  { %739 = vmatprep.subr.bf16.mxu0 %v810_v46 }
  0x30   :  { %740 = vmatpush3.bf16.msra.mxu0 %v811_v47 }
  0x31   :  { %741 = vmatprep.subr.bf16.mxu0 %v812_v48 }
  0x34   :  { %742 = vmatpush3.bf16.msra.mxu0 %v813_v49 }
  0x35   :  { %743 = vmatprep.subr.bf16.mxu0 %v814_v54 }
  0x38   :  { %744 = vmatpush3.bf16.msra.mxu0 %v815_v56 }
  0x39   :  { %745 = vmatprep.subr.bf16.mxu0 %v816_v57 }
  0x3c   :  { %746 = vmatpush3.bf16.msra.mxu0 %v817_v58 }
  0x3d   :  { %747 = vmatprep.subr.bf16.mxu0 %v818_v59 }
  0x40   :  { %748 = vmatpush3.bf16.msra.mxu0 %v819_v60 }
  0x43   :  { %555 = vmatmul.mubr.bf16.vlgmr.msra.gmra.mrb[4].mxu0 %v635_v61 }
  0x92   :  { %v607_v19 = vpop.permute.xlu0 %606 }
  0x93   :  { %v615_v22 = vadd.f32 %v688_v18, %v607_v19 }
  0xf6   :  { %v705_v62 = vpop.f32.mrb[0].mxu0 }
  0xf7   :  { %v727_v63 = vpop.f32.mrb[0].mxu1  ;;  %v706_v0 = vpop.f32.mrb[1].mxu0 }
  0xf8   :  { %v707_v1 = vadd.f32 %v706_v0, %v705_v62  ;;  %v728_v2 = vpop.f32.mrb[1].mxu1  ;;  %v708_v3 = vpop.f32.mrb[2].mxu0 }
  0xf9   :  { %v729_v4 = vadd.f32 %v728_v2, %v727_v63  ;;  %v709_v5 = vpop.f32.mrb[3].mxu0  ;;  %v730_v6 = vpop.f32.mrb[2].mxu1 }
  0xfa   :  { %v731_v7 = vpop.f32.mrb[3].mxu1 }
  0xfb   :  { %v517_v8 = vadd.f32 %v729_v4, %v707_v1 }
  0xff   :  { %v596_v9 = vpop.f32.mrb[4].mxu1 }
 0x100   :  { %v761_v10 = vpop.f32.mrb[5].mxu1 }
 0x101   :  { %v599_v11 = vpop.f32.mrb[6].mxu1 }
 0x102   :  { %v762_v12 = vpop.f32.mrb[7].mxu1 }
 0x116   :  { %v749_v13 = vpop.f32.mrb[4].mxu0 }
 0x117   :  { %v750_v14 = vpop.f32.mrb[5].mxu0 }
 0x118   :  { %v751_v15 = vadd.f32 %v750_v14, %v749_v13  ;;  %v752_v16 = vpop.f32.mrb[6].mxu0 }
 0x119   :  { %v753_v17 = vpop.f32.mrb[7].mxu0 }
 0x11a   :  { %v557_v20 = vadd.f32 %v751_v15, %v517_v8 }
 0x11c   :  { %v597_v21 = vadd.f32 %v596_v9, %v557_v20 }
 0x11e   :  { %v616_v23 = vmul.f32 2.0, %v597_v21 }
 0x120   :  { %v617_v24 = vsub.f32 %v615_v22, %v616_v23 }
 0x122   :  { %v618_v25 = vmax.f32 %v617_v24, 0.0 }
 0x124   :  { %823 = vrsqrt.f32 %v618_v25  ;;  %vm621_vm2 = vcmp.eq.f32.partialorder %v618_v25, inf  ;;  %v624_v28 = vand.u32 2147483648, %v618_v25  ;;  %vm623_vm3 = vcmp.eq.f32.partialorder %v618_v25, 0.0 }
 0x12e   :  { %v824_v26 = vpop.eup %823 }
 0x12f   :  { %v620_v27 = vmul.f32 %v824_v26, %v618_v25 }
 0x131   :  { %v622_v29 = vsel %vm621_vm2, %v618_v25, %v620_v27 }
 0x132   :  { %v625_v30 = vsel %vm623_vm3, %v624_v28, %v622_v29 }
 0x133   :  { %626 = vst [vmem:[%s1025_s4] sm:$0xff] %v625_v30 }

</bundles_post_ra>
